<compile_context>
chip_gen: v7x
topology: tpu7x:2x2x1
jax: 0.10.0
libtpu: 0.0.40
codegen_flags: <defaults>
</compile_context>

<pallas_src>
import jax
import jax.numpy as jnp
from jax import lax
from jax.experimental import pallas as pl
from jax.experimental.pallas import tpu as pltpu


def basic_block_kernel(xp_ref, w1_ref, b1_ref, w2_ref, b2_ref,
                       o_ref, mid_ref, patch_ref):
    # xp_ref   : (H+2, W+2, C)   spatially pre-padded input, one image (block)
    # w*_ref   : (9*C, C)        3x3 conv weights, im2col/HWIO order, BN scale folded in
    # b*_ref   : (1, C)          folded BN shift
    # o_ref    : (H, W, C)       output, one image (block)
    # mid_ref  : (H+2, W+2, C)   VMEM scratch: zero-padded conv1 output
    # patch_ref: (H*W, 9*C)      VMEM scratch: im2col slab (reused by both convs)
    Hp, Wp, C = xp_ref.shape
    H, W = Hp - 2, Wp - 2
    M = H * W

    # ---- conv1: assemble im2col slab once, single K=9*C MXU matmul ----
    for dh in range(3):
        for dw in range(3):
            j = dh * 3 + dw
            patch_ref[:, j * C:(j + 1) * C] = (
                xp_ref[dh:dh + H, dw:dw + W, :].reshape(M, C))
    acc1 = jnp.dot(patch_ref[...], w1_ref[...],
                   preferred_element_type=jnp.float32)
    # bn1 (scale folded into w1) + relu
    out1 = jnp.maximum(acc1 + b1_ref[...], 0.0)                          # (M, C)

    # ---- zero-pad intermediate (full memset is tiny; keeps scratch reuse safe) ----
    mid_ref[...] = jnp.zeros_like(mid_ref)
    mid_ref[1:1 + H, 1:1 + W, :] = out1.reshape(H, W, C)

    # ---- conv2: same im2col trick on the padded intermediate ----
    for dh in range(3):
        for dw in range(3):
            j = dh * 3 + dw
            patch_ref[:, j * C:(j + 1) * C] = (
                mid_ref[dh:dh + H, dw:dw + W, :].reshape(M, C))
    acc2 = jnp.dot(patch_ref[...], w2_ref[...],
                   preferred_element_type=jnp.float32)
    out2 = acc2 + b2_ref[...]                                            # (M, C)

    # ---- residual add (identity = interior of the padded input) + relu ----
    identity = xp_ref[1:1 + H, 1:1 + W, :].reshape(M, C)
    o_ref[...] = jnp.maximum(out2 + identity, 0.0).reshape(H, W, C).astype(o_ref.dtype)


@jax.jit
def basic_block_forward(x_nchw, w1, g1, be1, m1, v1, w2, g2, be2, m2, v2, eps=1e-5):
    """Wrapper: NCHW in/out (PyTorch convention); Pallas kernel works in NHWC."""
    # Fold BatchNorm (eval mode) into per-channel scale / shift.
    s1 = g1 / jnp.sqrt(v1 + eps)
    sh1 = be1 - m1 * s1
    s2 = g2 / jnp.sqrt(v2 + eps)
    sh2 = be2 - m2 * s2

    x = jnp.transpose(x_nchw, (0, 2, 3, 1))                 # NCHW -> NHWC
    N, H, W, Cin = x.shape
    Cout = w1.shape[0]
    assert Cin == Cout, "BasicBlock identity shortcut requires Cin == Cout"
    xp = jnp.pad(x, ((0, 0), (1, 1), (1, 1), (0, 0)))

    # OIHW -> HWIO -> (9*Cin, Cout): row index = (dh*3 + dw)*Cin + ci matches the
    # column order of the in-kernel im2col slab. BN scale folds into the weights
    # (per-output-channel scale commutes with the convolution).
    w1_flat = jnp.transpose(w1, (2, 3, 1, 0)).reshape(9 * Cin, Cout) * s1[None, :]
    w2_flat = jnp.transpose(w2, (2, 3, 1, 0)).reshape(9 * Cout, Cout) * s2[None, :]

    out_nhwc = pl.pallas_call(
        basic_block_kernel,
        out_shape=jax.ShapeDtypeStruct((N, H, W, Cout), x.dtype),
        grid=(N,),
        in_specs=[
            pl.BlockSpec((None, H + 2, W + 2, Cin), lambda n: (n, 0, 0, 0)),
            pl.BlockSpec((9 * Cin, Cout), lambda n: (0, 0)),
            pl.BlockSpec((1, Cout), lambda n: (0, 0)),
            pl.BlockSpec((9 * Cout, Cout), lambda n: (0, 0)),
            pl.BlockSpec((1, Cout), lambda n: (0, 0)),
        ],
        out_specs=pl.BlockSpec((None, H, W, Cout), lambda n: (n, 0, 0, 0)),
        scratch_shapes=[
            pltpu.VMEM((H + 2, W + 2, Cout), jnp.float32),   # padded conv1 output
            pltpu.VMEM((H * W, 9 * Cin), jnp.float32),       # im2col slab
        ],
        compiler_params=pltpu.CompilerParams(
            dimension_semantics=("parallel",)),
    )(xp, w1_flat, sh1.reshape(1, -1), w2_flat, sh2.reshape(1, -1))
    return jnp.transpose(out_nhwc, (0, 3, 1, 2))             # NHWC -> NCHW


def ref_forward(x, w1, g1, be1, m1, v1, w2, g2, be2, m2, v2, eps=1e-5):
    """Pure-JAX reference (NCHW), for correctness check."""
    dn = ('NCHW', 'OIHW', 'NCHW')
    s1 = g1 / jnp.sqrt(v1 + eps)
    sh1 = be1 - m1 * s1
    s2 = g2 / jnp.sqrt(v2 + eps)
    sh2 = be2 - m2 * s2
    y = lax.conv_general_dilated(x, w1, (1, 1), ((1, 1), (1, 1)), dimension_numbers=dn)
    y = y * s1[None, :, None, None] + sh1[None, :, None, None]
    y = jnp.maximum(y, 0.0)
    y = lax.conv_general_dilated(y, w2, (1, 1), ((1, 1), (1, 1)), dimension_numbers=dn)
    y = y * s2[None, :, None, None] + sh2[None, :, None, None]
    return jnp.maximum(y + x, 0.0)


if __name__ == "__main__":
    # Small, deterministic setup: inplanes = planes = 16, N = 2, H = W = 16.
    N, C, H, W = 2, 16, 16, 16
    key = jax.random.PRNGKey(0)
    keys = jax.random.split(key, 12)

    x = jax.random.normal(keys[0], (N, C, H, W), jnp.float32)

    # conv weights (PyTorch OIHW layout), bias=False
    w1 = 0.1 * jax.random.normal(keys[1], (C, C, 3, 3), jnp.float32)
    w2 = 0.1 * jax.random.normal(keys[2], (C, C, 3, 3), jnp.float32)

    # BatchNorm parameters / running stats (deterministic, non-trivial)
    g1 = 1.0 + 0.05 * jax.random.normal(keys[3], (C,), jnp.float32)
    be1 = 0.05 * jax.random.normal(keys[4], (C,), jnp.float32)
    m1 = 0.02 * jax.random.normal(keys[5], (C,), jnp.float32)
    v1 = 0.9 + 0.2 * jax.random.uniform(keys[6], (C,), jnp.float32)

    g2 = 1.0 + 0.05 * jax.random.normal(keys[7], (C,), jnp.float32)
    be2 = 0.05 * jax.random.normal(keys[8], (C,), jnp.float32)
    m2 = 0.02 * jax.random.normal(keys[9], (C,), jnp.float32)
    v2 = 0.9 + 0.2 * jax.random.uniform(keys[10], (C,), jnp.float32)

    out = basic_block_forward(x, w1, g1, be1, m1, v1, w2, g2, be2, m2, v2)
    out = jax.block_until_ready(out)

    ref = ref_forward(x, w1, g1, be1, m1, v1, w2, g2, be2, m2, v2)
    ref = jax.block_until_ready(ref)

    assert out.shape == (N, C, H, W)
    assert jnp.allclose(out, ref, rtol=1e-4, atol=1e-4), "mismatch vs JAX reference"

    print("KERNEL_OK")
</pallas_src>

<mosaic_0001>
module attributes {stable_mosaic.version = 11 : i64} {
  func.func @basic_block_kernel(%arg0: i32, %arg1: memref<1x18x18x16xf32, #tpu.memory_space<vmem>>, %arg2: memref<144x16xf32, #tpu.memory_space<vmem>>, %arg3: memref<1x16xf32, #tpu.memory_space<vmem>>, %arg4: memref<144x16xf32, #tpu.memory_space<vmem>>, %arg5: memref<1x16xf32, #tpu.memory_space<vmem>>, %arg6: memref<1x16x16x16xf32, #tpu.memory_space<vmem>>, %arg7: memref<18x18x16xf32, #tpu.memory_space<vmem>>, %arg8: memref<256x144xf32, #tpu.memory_space<vmem>>) attributes {dimension_semantics = [#tpu.dimension_semantics<parallel>], iteration_bounds = array<i64: 2>, scalar_prefetch = 0 : i64, scratch_operands = 2 : i64, tpu.core_type = #tpu.core_type<tc>, window_params = [{transform_indices = @transform_0, window_bounds = array<i64: 1, 18, 18, 16>}, {pipeline_mode = #tpu.pipeline_mode<synchronous>, transform_indices = @transform_1, window_bounds = array<i64: 144, 16>}, {pipeline_mode = #tpu.pipeline_mode<synchronous>, transform_indices = @transform_2, window_bounds = array<i64: 1, 16>}, {pipeline_mode = #tpu.pipeline_mode<synchronous>, transform_indices = @transform_3, window_bounds = array<i64: 144, 16>}, {pipeline_mode = #tpu.pipeline_mode<synchronous>, transform_indices = @transform_4, window_bounds = array<i64: 1, 16>}, {transform_indices = @transform_5, window_bounds = array<i64: 1, 16, 16, 16>}]} {
    %c0 = arith.constant 0 : index
    %c0_0 = arith.constant 0 : index
    %c0_1 = arith.constant 0 : index
    %c0_2 = arith.constant 0 : index
    %0 = vector.load %arg1[%c0, %c0_0, %c0_1, %c0_2] : memref<1x18x18x16xf32, #tpu.memory_space<vmem>>, vector<1x16x16x16xf32>
    %1 = vector.shape_cast %0 : vector<1x16x16x16xf32> to vector<16x16x16xf32>
    %2 = vector.shape_cast %1 : vector<16x16x16xf32> to vector<256x16xf32>
    %c0_3 = arith.constant 0 : index
    %c0_4 = arith.constant 0 : index
    %3 = vector.load %arg8[%c0_3, %c0_4] : memref<256x144xf32, #tpu.memory_space<vmem>>, vector<256x16xf32>
    tpu.vector_store %arg8[%c0_3, %c0_4], %2 {strides = array<i32>} : memref<256x144xf32, #tpu.memory_space<vmem>>, vector<256x16xf32>,
    %c0_5 = arith.constant 0 : index
    %c0_6 = arith.constant 0 : index
    %c1 = arith.constant 1 : index
    %c0_7 = arith.constant 0 : index
    %4 = vector.load %arg1[%c0_5, %c0_6, %c1, %c0_7] : memref<1x18x18x16xf32, #tpu.memory_space<vmem>>, vector<1x16x16x16xf32>
    %5 = vector.shape_cast %4 : vector<1x16x16x16xf32> to vector<16x16x16xf32>
    %6 = vector.shape_cast %5 : vector<16x16x16xf32> to vector<256x16xf32>
    %c0_8 = arith.constant 0 : index
    %c16 = arith.constant 16 : index
    %7 = vector.load %arg8[%c0_8, %c16] : memref<256x144xf32, #tpu.memory_space<vmem>>, vector<256x16xf32>
    tpu.vector_store %arg8[%c0_8, %c16], %6 {strides = array<i32>} : memref<256x144xf32, #tpu.memory_space<vmem>>, vector<256x16xf32>,
    %c0_9 = arith.constant 0 : index
    %c0_10 = arith.constant 0 : index
    %c2 = arith.constant 2 : index
    %c0_11 = arith.constant 0 : index
    %8 = vector.load %arg1[%c0_9, %c0_10, %c2, %c0_11] : memref<1x18x18x16xf32, #tpu.memory_space<vmem>>, vector<1x16x16x16xf32>
    %9 = vector.shape_cast %8 : vector<1x16x16x16xf32> to vector<16x16x16xf32>
    %10 = vector.shape_cast %9 : vector<16x16x16xf32> to vector<256x16xf32>
    %c0_12 = arith.constant 0 : index
    %c32 = arith.constant 32 : index
    %11 = vector.load %arg8[%c0_12, %c32] : memref<256x144xf32, #tpu.memory_space<vmem>>, vector<256x16xf32>
    tpu.vector_store %arg8[%c0_12, %c32], %10 {strides = array<i32>} : memref<256x144xf32, #tpu.memory_space<vmem>>, vector<256x16xf32>,
    %c0_13 = arith.constant 0 : index
    %c1_14 = arith.constant 1 : index
    %c0_15 = arith.constant 0 : index
    %c0_16 = arith.constant 0 : index
    %12 = vector.load %arg1[%c0_13, %c1_14, %c0_15, %c0_16] : memref<1x18x18x16xf32, #tpu.memory_space<vmem>>, vector<1x16x16x16xf32>
    %13 = vector.shape_cast %12 : vector<1x16x16x16xf32> to vector<16x16x16xf32>
    %14 = vector.shape_cast %13 : vector<16x16x16xf32> to vector<256x16xf32>
    %c0_17 = arith.constant 0 : index
    %c48 = arith.constant 48 : index
    %15 = vector.load %arg8[%c0_17, %c48] : memref<256x144xf32, #tpu.memory_space<vmem>>, vector<256x16xf32>
    tpu.vector_store %arg8[%c0_17, %c48], %14 {strides = array<i32>} : memref<256x144xf32, #tpu.memory_space<vmem>>, vector<256x16xf32>,
    %c0_18 = arith.constant 0 : index
    %c1_19 = arith.constant 1 : index
    %c1_20 = arith.constant 1 : index
    %c0_21 = arith.constant 0 : index
    %16 = vector.load %arg1[%c0_18, %c1_19, %c1_20, %c0_21] : memref<1x18x18x16xf32, #tpu.memory_space<vmem>>, vector<1x16x16x16xf32>
    %17 = vector.shape_cast %16 : vector<1x16x16x16xf32> to vector<16x16x16xf32>
    %18 = vector.shape_cast %17 : vector<16x16x16xf32> to vector<256x16xf32>
    %c0_22 = arith.constant 0 : index
    %c64 = arith.constant 64 : index
    %19 = vector.load %arg8[%c0_22, %c64] : memref<256x144xf32, #tpu.memory_space<vmem>>, vector<256x16xf32>
    tpu.vector_store %arg8[%c0_22, %c64], %18 {strides = array<i32>} : memref<256x144xf32, #tpu.memory_space<vmem>>, vector<256x16xf32>,
    %c0_23 = arith.constant 0 : index
    %c1_24 = arith.constant 1 : index
    %c2_25 = arith.constant 2 : index
    %c0_26 = arith.constant 0 : index
    %20 = vector.load %arg1[%c0_23, %c1_24, %c2_25, %c0_26] : memref<1x18x18x16xf32, #tpu.memory_space<vmem>>, vector<1x16x16x16xf32>
    %21 = vector.shape_cast %20 : vector<1x16x16x16xf32> to vector<16x16x16xf32>
    %22 = vector.shape_cast %21 : vector<16x16x16xf32> to vector<256x16xf32>
    %c0_27 = arith.constant 0 : index
    %c80 = arith.constant 80 : index
    %23 = vector.load %arg8[%c0_27, %c80] : memref<256x144xf32, #tpu.memory_space<vmem>>, vector<256x16xf32>
    tpu.vector_store %arg8[%c0_27, %c80], %22 {strides = array<i32>} : memref<256x144xf32, #tpu.memory_space<vmem>>, vector<256x16xf32>,
    %c0_28 = arith.constant 0 : index
    %c2_29 = arith.constant 2 : index
    %c0_30 = arith.constant 0 : index
    %c0_31 = arith.constant 0 : index
    %24 = vector.load %arg1[%c0_28, %c2_29, %c0_30, %c0_31] : memref<1x18x18x16xf32, #tpu.memory_space<vmem>>, vector<1x16x16x16xf32>
    %25 = vector.shape_cast %24 : vector<1x16x16x16xf32> to vector<16x16x16xf32>
    %26 = vector.shape_cast %25 : vector<16x16x16xf32> to vector<256x16xf32>
    %c0_32 = arith.constant 0 : index
    %c96 = arith.constant 96 : index
    %27 = vector.load %arg8[%c0_32, %c96] : memref<256x144xf32, #tpu.memory_space<vmem>>, vector<256x16xf32>
    tpu.vector_store %arg8[%c0_32, %c96], %26 {strides = array<i32>} : memref<256x144xf32, #tpu.memory_space<vmem>>, vector<256x16xf32>,
    %c0_33 = arith.constant 0 : index
    %c2_34 = arith.constant 2 : index
    %c1_35 = arith.constant 1 : index
    %c0_36 = arith.constant 0 : index
    %28 = vector.load %arg1[%c0_33, %c2_34, %c1_35, %c0_36] : memref<1x18x18x16xf32, #tpu.memory_space<vmem>>, vector<1x16x16x16xf32>
    %29 = vector.shape_cast %28 : vector<1x16x16x16xf32> to vector<16x16x16xf32>
    %30 = vector.shape_cast %29 : vector<16x16x16xf32> to vector<256x16xf32>
    %c0_37 = arith.constant 0 : index
    %c112 = arith.constant 112 : index
    %31 = vector.load %arg8[%c0_37, %c112] : memref<256x144xf32, #tpu.memory_space<vmem>>, vector<256x16xf32>
    tpu.vector_store %arg8[%c0_37, %c112], %30 {strides = array<i32>} : memref<256x144xf32, #tpu.memory_space<vmem>>, vector<256x16xf32>,
    %c0_38 = arith.constant 0 : index
    %c2_39 = arith.constant 2 : index
    %c2_40 = arith.constant 2 : index
    %c0_41 = arith.constant 0 : index
    %32 = vector.load %arg1[%c0_38, %c2_39, %c2_40, %c0_41] : memref<1x18x18x16xf32, #tpu.memory_space<vmem>>, vector<1x16x16x16xf32>
    %33 = vector.shape_cast %32 : vector<1x16x16x16xf32> to vector<16x16x16xf32>
    %34 = vector.shape_cast %33 : vector<16x16x16xf32> to vector<256x16xf32>
    %c0_42 = arith.constant 0 : index
    %c128 = arith.constant 128 : index
    %35 = vector.load %arg8[%c0_42, %c128] : memref<256x144xf32, #tpu.memory_space<vmem>>, vector<256x16xf32>
    tpu.vector_store %arg8[%c0_42, %c128], %34 {strides = array<i32>} : memref<256x144xf32, #tpu.memory_space<vmem>>, vector<256x16xf32>,
    %c0_43 = arith.constant 0 : index
    %c0_44 = arith.constant 0 : index
    %36 = vector.load %arg8[%c0_43, %c0_44] : memref<256x144xf32, #tpu.memory_space<vmem>>, vector<256x144xf32>
    %c0_45 = arith.constant 0 : index
    %c0_46 = arith.constant 0 : index
    %37 = vector.load %arg2[%c0_45, %c0_46] : memref<144x16xf32, #tpu.memory_space<vmem>>, vector<144x16xf32>
    %cst = arith.constant dense<0.000000e+00> : vector<256x16xf32>
    %38 = tpu.matmul %36, %37, %cst {dimension_numbers = #tpu.dot_dimension_numbers<[1], [0], [0], [1], [0, 0, 1, 1], [], []>} : vector<256x144xf32>, vector<144x16xf32>, vector<256x16xf32> -> vector<256x16xf32>
    %c0_47 = arith.constant 0 : index
    %c0_48 = arith.constant 0 : index
    %39 = vector.load %arg3[%c0_47, %c0_48] : memref<1x16xf32, #tpu.memory_space<vmem>>, vector<1x16xf32>
    %40 = vector.broadcast %39 : vector<1x16xf32> to vector<256x16xf32>
    %41 = arith.addf %38, %40 : vector<256x16xf32>
    %cst_49 = arith.constant 0.000000e+00 : f32
    %42 = vector.broadcast %cst_49 : f32 to vector<256x16xf32>
    %43 = arith.maximumf %41, %42 : vector<256x16xf32>
    %cst_50 = arith.constant 0.000000e+00 : f32
    %44 = vector.broadcast %cst_50 : f32 to vector<18x18x16xf32>
    %c0_51 = arith.constant 0 : index
    %c0_52 = arith.constant 0 : index
    %c0_53 = arith.constant 0 : index
    %45 = vector.load %arg7[%c0_51, %c0_52, %c0_53] : memref<18x18x16xf32, #tpu.memory_space<vmem>>, vector<18x18x16xf32>
    tpu.vector_store %arg7[%c0_51, %c0_52, %c0_53], %44 {strides = array<i32>} : memref<18x18x16xf32, #tpu.memory_space<vmem>>, vector<18x18x16xf32>,
    %46 = vector.shape_cast %43 : vector<256x16xf32> to vector<16x16x16xf32>
    %c1_54 = arith.constant 1 : index
    %c1_55 = arith.constant 1 : index
    %c0_56 = arith.constant 0 : index
    %47 = vector.load %arg7[%c1_54, %c1_55, %c0_56] : memref<18x18x16xf32, #tpu.memory_space<vmem>>, vector<16x16x16xf32>
    tpu.vector_store %arg7[%c1_54, %c1_55, %c0_56], %46 {strides = array<i32>} : memref<18x18x16xf32, #tpu.memory_space<vmem>>, vector<16x16x16xf32>,
    %c0_57 = arith.constant 0 : index
    %c0_58 = arith.constant 0 : index
    %c0_59 = arith.constant 0 : index
    %48 = vector.load %arg7[%c0_57, %c0_58, %c0_59] : memref<18x18x16xf32, #tpu.memory_space<vmem>>, vector<16x16x16xf32>
    %49 = vector.shape_cast %48 : vector<16x16x16xf32> to vector<256x16xf32>
    %c0_60 = arith.constant 0 : index
    %c0_61 = arith.constant 0 : index
    %50 = vector.load %arg8[%c0_60, %c0_61] : memref<256x144xf32, #tpu.memory_space<vmem>>, vector<256x16xf32>
    tpu.vector_store %arg8[%c0_60, %c0_61], %49 {strides = array<i32>} : memref<256x144xf32, #tpu.memory_space<vmem>>, vector<256x16xf32>,
    %c0_62 = arith.constant 0 : index
    %c1_63 = arith.constant 1 : index
    %c0_64 = arith.constant 0 : index
    %51 = vector.load %arg7[%c0_62, %c1_63, %c0_64] : memref<18x18x16xf32, #tpu.memory_space<vmem>>, vector<16x16x16xf32>
    %52 = vector.shape_cast %51 : vector<16x16x16xf32> to vector<256x16xf32>
    %c0_65 = arith.constant 0 : index
    %c16_66 = arith.constant 16 : index
    %53 = vector.load %arg8[%c0_65, %c16_66] : memref<256x144xf32, #tpu.memory_space<vmem>>, vector<256x16xf32>
    tpu.vector_store %arg8[%c0_65, %c16_66], %52 {strides = array<i32>} : memref<256x144xf32, #tpu.memory_space<vmem>>, vector<256x16xf32>,
    %c0_67 = arith.constant 0 : index
    %c2_68 = arith.constant 2 : index
    %c0_69 = arith.constant 0 : index
    %54 = vector.load %arg7[%c0_67, %c2_68, %c0_69] : memref<18x18x16xf32, #tpu.memory_space<vmem>>, vector<16x16x16xf32>
    %55 = vector.shape_cast %54 : vector<16x16x16xf32> to vector<256x16xf32>
    %c0_70 = arith.constant 0 : index
    %c32_71 = arith.constant 32 : index
    %56 = vector.load %arg8[%c0_70, %c32_71] : memref<256x144xf32, #tpu.memory_space<vmem>>, vector<256x16xf32>
    tpu.vector_store %arg8[%c0_70, %c32_71], %55 {strides = array<i32>} : memref<256x144xf32, #tpu.memory_space<vmem>>, vector<256x16xf32>,
    %c1_72 = arith.constant 1 : index
    %c0_73 = arith.constant 0 : index
    %c0_74 = arith.constant 0 : index
    %57 = vector.load %arg7[%c1_72, %c0_73, %c0_74] : memref<18x18x16xf32, #tpu.memory_space<vmem>>, vector<16x16x16xf32>
    %58 = vector.shape_cast %57 : vector<16x16x16xf32> to vector<256x16xf32>
    %c0_75 = arith.constant 0 : index
    %c48_76 = arith.constant 48 : index
    %59 = vector.load %arg8[%c0_75, %c48_76] : memref<256x144xf32, #tpu.memory_space<vmem>>, vector<256x16xf32>
    tpu.vector_store %arg8[%c0_75, %c48_76], %58 {strides = array<i32>} : memref<256x144xf32, #tpu.memory_space<vmem>>, vector<256x16xf32>,
    %c1_77 = arith.constant 1 : index
    %c1_78 = arith.constant 1 : index
    %c0_79 = arith.constant 0 : index
    %60 = vector.load %arg7[%c1_77, %c1_78, %c0_79] : memref<18x18x16xf32, #tpu.memory_space<vmem>>, vector<16x16x16xf32>
    %61 = vector.shape_cast %60 : vector<16x16x16xf32> to vector<256x16xf32>
    %c0_80 = arith.constant 0 : index
    %c64_81 = arith.constant 64 : index
    %62 = vector.load %arg8[%c0_80, %c64_81] : memref<256x144xf32, #tpu.memory_space<vmem>>, vector<256x16xf32>
    tpu.vector_store %arg8[%c0_80, %c64_81], %61 {strides = array<i32>} : memref<256x144xf32, #tpu.memory_space<vmem>>, vector<256x16xf32>,
    %c1_82 = arith.constant 1 : index
    %c2_83 = arith.constant 2 : index
    %c0_84 = arith.constant 0 : index
    %63 = vector.load %arg7[%c1_82, %c2_83, %c0_84] : memref<18x18x16xf32, #tpu.memory_space<vmem>>, vector<16x16x16xf32>
    %64 = vector.shape_cast %63 : vector<16x16x16xf32> to vector<256x16xf32>
    %c0_85 = arith.constant 0 : index
    %c80_86 = arith.constant 80 : index
    %65 = vector.load %arg8[%c0_85, %c80_86] : memref<256x144xf32, #tpu.memory_space<vmem>>, vector<256x16xf32>
    tpu.vector_store %arg8[%c0_85, %c80_86], %64 {strides = array<i32>} : memref<256x144xf32, #tpu.memory_space<vmem>>, vector<256x16xf32>,
    %c2_87 = arith.constant 2 : index
    %c0_88 = arith.constant 0 : index
    %c0_89 = arith.constant 0 : index
    %66 = vector.load %arg7[%c2_87, %c0_88, %c0_89] : memref<18x18x16xf32, #tpu.memory_space<vmem>>, vector<16x16x16xf32>
    %67 = vector.shape_cast %66 : vector<16x16x16xf32> to vector<256x16xf32>
    %c0_90 = arith.constant 0 : index
    %c96_91 = arith.constant 96 : index
    %68 = vector.load %arg8[%c0_90, %c96_91] : memref<256x144xf32, #tpu.memory_space<vmem>>, vector<256x16xf32>
    tpu.vector_store %arg8[%c0_90, %c96_91], %67 {strides = array<i32>} : memref<256x144xf32, #tpu.memory_space<vmem>>, vector<256x16xf32>,
    %c2_92 = arith.constant 2 : index
    %c1_93 = arith.constant 1 : index
    %c0_94 = arith.constant 0 : index
    %69 = vector.load %arg7[%c2_92, %c1_93, %c0_94] : memref<18x18x16xf32, #tpu.memory_space<vmem>>, vector<16x16x16xf32>
    %70 = vector.shape_cast %69 : vector<16x16x16xf32> to vector<256x16xf32>
    %c0_95 = arith.constant 0 : index
    %c112_96 = arith.constant 112 : index
    %71 = vector.load %arg8[%c0_95, %c112_96] : memref<256x144xf32, #tpu.memory_space<vmem>>, vector<256x16xf32>
    tpu.vector_store %arg8[%c0_95, %c112_96], %70 {strides = array<i32>} : memref<256x144xf32, #tpu.memory_space<vmem>>, vector<256x16xf32>,
    %c2_97 = arith.constant 2 : index
    %c2_98 = arith.constant 2 : index
    %c0_99 = arith.constant 0 : index
    %72 = vector.load %arg7[%c2_97, %c2_98, %c0_99] : memref<18x18x16xf32, #tpu.memory_space<vmem>>, vector<16x16x16xf32>
    %73 = vector.shape_cast %72 : vector<16x16x16xf32> to vector<256x16xf32>
    %c0_100 = arith.constant 0 : index
    %c128_101 = arith.constant 128 : index
    %74 = vector.load %arg8[%c0_100, %c128_101] : memref<256x144xf32, #tpu.memory_space<vmem>>, vector<256x16xf32>
    tpu.vector_store %arg8[%c0_100, %c128_101], %73 {strides = array<i32>} : memref<256x144xf32, #tpu.memory_space<vmem>>, vector<256x16xf32>,
    %c0_102 = arith.constant 0 : index
    %c0_103 = arith.constant 0 : index
    %75 = vector.load %arg8[%c0_102, %c0_103] : memref<256x144xf32, #tpu.memory_space<vmem>>, vector<256x144xf32>
    %c0_104 = arith.constant 0 : index
    %c0_105 = arith.constant 0 : index
    %76 = vector.load %arg4[%c0_104, %c0_105] : memref<144x16xf32, #tpu.memory_space<vmem>>, vector<144x16xf32>
    %cst_106 = arith.constant dense<0.000000e+00> : vector<256x16xf32>
    %77 = tpu.matmul %75, %76, %cst_106 {dimension_numbers = #tpu.dot_dimension_numbers<[1], [0], [0], [1], [0, 0, 1, 1], [], []>} : vector<256x144xf32>, vector<144x16xf32>, vector<256x16xf32> -> vector<256x16xf32>
    %c0_107 = arith.constant 0 : index
    %c0_108 = arith.constant 0 : index
    %78 = vector.load %arg5[%c0_107, %c0_108] : memref<1x16xf32, #tpu.memory_space<vmem>>, vector<1x16xf32>
    %79 = vector.broadcast %78 : vector<1x16xf32> to vector<256x16xf32>
    %80 = arith.addf %77, %79 : vector<256x16xf32>
    %c0_109 = arith.constant 0 : index
    %c1_110 = arith.constant 1 : index
    %c1_111 = arith.constant 1 : index
    %c0_112 = arith.constant 0 : index
    %81 = vector.load %arg1[%c0_109, %c1_110, %c1_111, %c0_112] : memref<1x18x18x16xf32, #tpu.memory_space<vmem>>, vector<1x16x16x16xf32>
    %82 = vector.shape_cast %81 : vector<1x16x16x16xf32> to vector<16x16x16xf32>
    %83 = vector.shape_cast %82 : vector<16x16x16xf32> to vector<256x16xf32>
    %84 = arith.addf %80, %83 : vector<256x16xf32>
    %cst_113 = arith.constant 0.000000e+00 : f32
    %85 = vector.broadcast %cst_113 : f32 to vector<256x16xf32>
    %86 = arith.maximumf %84, %85 : vector<256x16xf32>
    %87 = vector.shape_cast %86 : vector<256x16xf32> to vector<16x16x16xf32>
    %c0_114 = arith.constant 0 : index
    %c0_115 = arith.constant 0 : index
    %c0_116 = arith.constant 0 : index
    %c0_117 = arith.constant 0 : index
    %88 = vector.load %arg6[%c0_114, %c0_115, %c0_116, %c0_117] : memref<1x16x16x16xf32, #tpu.memory_space<vmem>>, vector<1x16x16x16xf32>
    %89 = vector.shape_cast %88 : vector<1x16x16x16xf32> to vector<16x16x16xf32>
    %90 = vector.shape_cast %87 : vector<16x16x16xf32> to vector<1x16x16x16xf32>
    tpu.vector_store %arg6[%c0_114, %c0_115, %c0_116, %c0_117], %90 {strides = array<i32>} : memref<1x16x16x16xf32, #tpu.memory_space<vmem>>, vector<1x16x16x16xf32>,
    return
  }
  func.func @transform_0(%arg0: i32) -> (i32, i32, i32, i32) {
    %c0_i32 = arith.constant 0 : i32
    %c0_i32_0 = arith.constant 0 : i32
    %c0_i32_1 = arith.constant 0 : i32
    %c0_i32_2 = arith.constant 0 : i32
    return %arg0, %c0_i32, %c0_i32_0, %c0_i32_1 : i32, i32, i32, i32
  }
  func.func @transform_1(%arg0: i32) -> (i32, i32) {
    %c0_i32 = arith.constant 0 : i32
    %c0_i32_0 = arith.constant 0 : i32
    %c0_i32_1 = arith.constant 0 : i32
    return %c0_i32, %c0_i32_0 : i32, i32
  }
  func.func @transform_2(%arg0: i32) -> (i32, i32) {
    %c0_i32 = arith.constant 0 : i32
    %c0_i32_0 = arith.constant 0 : i32
    %c0_i32_1 = arith.constant 0 : i32
    return %c0_i32, %c0_i32_0 : i32, i32
  }
  func.func @transform_3(%arg0: i32) -> (i32, i32) {
    %c0_i32 = arith.constant 0 : i32
    %c0_i32_0 = arith.constant 0 : i32
    %c0_i32_1 = arith.constant 0 : i32
    return %c0_i32, %c0_i32_0 : i32, i32
  }
  func.func @transform_4(%arg0: i32) -> (i32, i32) {
    %c0_i32 = arith.constant 0 : i32
    %c0_i32_0 = arith.constant 0 : i32
    %c0_i32_1 = arith.constant 0 : i32
    return %c0_i32, %c0_i32_0 : i32, i32
  }
  func.func @transform_5(%arg0: i32) -> (i32, i32, i32, i32) {
    %c0_i32 = arith.constant 0 : i32
    %c0_i32_0 = arith.constant 0 : i32
    %c0_i32_1 = arith.constant 0 : i32
    %c0_i32_2 = arith.constant 0 : i32
    return %arg0, %c0_i32, %c0_i32_0, %c0_i32_1 : i32, i32, i32, i32
  }
}

</mosaic_0001>

<bundles_post_ra>
// kernel: basic_block_forward.1
= control target key start
LH: loop header
LB: loop body
LE: loop exit
PB: predicated region body
PF: predicated region fallthrough
CT: control target
= control target key end

     0   :  { %s4724_s18 = smov 0   ;;  %s7183_s0 = inlined_call_operand.vmem [shape: f32[2,18,18,16], index: 0, kind: input, shape index: {}]   ;;  %s7184_s1 = inlined_call_operand.vmem [shape: f32[144,16], index: 1, kind: input, shape index: {}]   ;;  %s7185_s2 = inlined_call_operand.vmem [shape: f32[1,16], index: 2, kind: input, shape index: {}]   ;;  %s7186_s3 = inlined_call_operand.vmem [shape: f32[144,16], index: 3, kind: input, shape index: {}]   ;;  %s7187_s4 = inlined_call_operand.vmem [shape: f32[1,16], index: 4, kind: input, shape index: {}]   ;;  %s7188_s5 = inlined_call_operand.vmem [shape: f32[2,16,16,16], index: 5, kind: output, shape index: {}]  }
   0x1 LB: > { %s4303_s19 = sadd.s32 4294967295, %s4683_s18   ;;  %p4307_p0 = scmp.ge.s32.totalorder %s4683_s18, 1  ;;  %s4683_s18 = sphi %s4724_s18, %s15_s18  }
   0x2   : > { %p187_p1 = scmp.lt.s32.totalorder %s4683_s18, 3 }
   0x4   : > { %p188_p2 = pnand %p4307_p0, %p187_p1 }
   0x6   : > { %191 = sbr.rel (%p188_p2) target bundleno = 1433 (0x599), region = 40 }
   0xd   : > { %p215_p3 = scmp.lt.s32.totalorder %s4303_s19, 1  ;;  %s4685_s24 = smov 16   ;;  %vm257_vm0 = vcmask 130048   ;;  %vm450_vm1 = vcmask 261248   ;;  %vm643_vm2 = vcmask 392448   ;;  %vm837_vm3 = vcmask 523648  }
   0xe   : > { %s4686_s25 = smov 32   ;;  %s4687_s26 = smov 48   ;;  %vm1030_vm4 = vcmask 654848   ;;  %vm1223_vm5 = vcmask 786048   ;;  %vm1417_vm6 = vcmask 917248   ;;  %vm1610_vm7 = vcmask 1048448  }
   0xf   : > { %s7202_s19 = smov (!%p215_p3, %s4303_s19), 1  ;;  %s4689_s21 = smov 64   ;;  %vm2151_vm8 = vcmask 123904  }
  0x10   : > { %s4658_s20 = smul.u32 432, %s7202_s19  ;;  %s4690_s22 = smov 80  }
  0x11   : > { %s4691_s27 = smov 96   ;;  %s4692_s28 = smov 112  }
  0x12   : > { %s4738_s23 = scalar_lea.vmem %s7183_s0, %s4658_s20  ;;  %s4603_s16 = sshll.u32 %s7202_s19, 8 }
  0x13   : > { %v290_v0 = vld [vmem:[%s4738_s23 + $0x1] sm:$0xff]  ;;  %v4742_v1 = vld [vmem:[%s4738_s23 + $0x19] sm:$0xff]  ;;  %v291_v2 = vld [vmem:[%s4738_s23 + $0x9] sm:$0xff]  ;;  %s6907_s29 = scalar_lea.vmem %s7188_s5, %s4603_s16 }
  0x14   : > { %354 = vrot.lane.b32.xlu0 %v290_v0, %s4685_s24  ;;  %358 = vrot.lane.b32.xlu1 %v4742_v1, %s4685_s24  ;;  %v4749_v3 = vld [vmem:[%s4738_s23 + $0x21] sm:$0xff]  ;;  %v4755_v4 = vld [vmem:[%s4738_s23 + $0x31] sm:$0xff] }
  0x15   : > { %v4758_v5 = vld [vmem:[%s4738_s23 + $0x39] sm:$0xff]  ;;  %v4765_v6 = vld [vmem:[%s4738_s23 + $0x49] sm:$0xff]  ;;  %v4768_v7 = vld [vmem:[%s4738_s23 + $0x51] sm:$0xff] }
  0x16   : > { %v4775_v8 = vld [vmem:[%s4738_s23 + $0x61] sm:$0xff]  ;;  %v4778_v9 = vld [vmem:[%s4738_s23 + $0x69] sm:$0xff]  ;;  %v4785_v10 = vld [vmem:[%s4738_s23 + $0x79] sm:$0xff] }
  0x17   : > { %v4788_v11 = vld [vmem:[%s4738_s23 + $0x81] sm:$0xff]  ;;  %v4796_v13 = vld [vmem:[%s4738_s23 + $0x91] sm:$0xff]  ;;  %v4800_v14 = vld [vmem:[%s4738_s23 + $0x99] sm:$0xff] }
  0x18   : > { %356 = vrot.lane.b32.xlu0 %v291_v2, %s4685_s24  ;;  %360 = vrot.lane.b32.xlu1 %v4749_v3, %s4685_s24  ;;  %v225_v12 = vld [vmem:[%s4738_s23] sm:$0xff]  ;;  %v4803_v15 = vld [vmem:[%s4738_s23 + $0x18] sm:$0xff] }
  0x19   : > { %258 = vst.msk [vmem:[#allocation3] sm:$0xff] %vm257_vm0, %v225_v12  ;;  %v226_v16 = vld [vmem:[%s4738_s23 + $0x8] sm:$0xff]  ;;  %260 = vst.msk [vmem:[#allocation3 + $0x20] sm:$0xff] %vm257_vm0, %v4803_v15  ;;  %v4810_v17 = vld [vmem:[%s4738_s23 + $0x20] sm:$0xff] }
  0x1a   : > { %259 = vst.msk [vmem:[#allocation3 + $0x10] sm:$0xff] %vm257_vm0, %v226_v16  ;;  %v4813_v18 = vld [vmem:[%s4738_s23 + $0x30] sm:$0xff]  ;;  %261 = vst.msk [vmem:[#allocation3 + $0x30] sm:$0xff] %vm257_vm0, %v4810_v17  ;;  %v4823_v20 = vld [vmem:[%s4738_s23 + $0x38] sm:$0xff] }
  0x1b   : > { %v4816_v19 = vld [vmem:[%s4738_s23 + $0xa9] sm:$0xff]  ;;  %262 = vst.msk [vmem:[#allocation3 + $0x40] sm:$0xff] %vm257_vm0, %v4813_v18  ;;  %v4830_v21 = vld [vmem:[%s4738_s23 + $0xb1] sm:$0xff]  ;;  %263 = vst.msk [vmem:[#allocation3 + $0x50] sm:$0xff] %vm257_vm0, %v4823_v20 }
  0x1c   : > { %362 = vrot.lane.b32.xlu0 %v4755_v4, %s4685_s24  ;;  %364 = vrot.lane.b32.xlu1 %v4758_v5, %s4685_s24  ;;  %7193 = vst [vmem:[#allocation4_spill] sm:$0xff] %v4830_v21  ;;  %v4835_v22 = vld [vmem:[%s4738_s23 + $0x48] sm:$0xff]  ;;  %v4840_v23 = vld [vmem:[%s4738_s23 + $0x50] sm:$0xff] }
  0x1d   : > { %264 = vst.msk [vmem:[#allocation3 + $0x60] sm:$0xff] %vm257_vm0, %v4835_v22  ;;  %v4843_v24 = vld [vmem:[%s4738_s23 + $0x60] sm:$0xff]  ;;  %v4846_v25 = vld [vmem:[%s4738_s23 + $0x68] sm:$0xff]  ;;  %265 = vst.msk [vmem:[#allocation3 + $0x70] sm:$0xff] %vm257_vm0, %v4840_v23 }
  0x1e   : > { %266 = vst.msk [vmem:[#allocation3 + $0x80] sm:$0xff] %vm257_vm0, %v4843_v24  ;;  %267 = vst.msk [vmem:[#allocation3 + $0x90] sm:$0xff] %vm257_vm0, %v4846_v25  ;;  %v4855_v26 = vld [vmem:[%s4738_s23 + $0x78] sm:$0xff]  ;;  %v4858_v27 = vld [vmem:[%s4738_s23 + $0x80] sm:$0xff] }
  0x1f   : > { %v4861_v28 = vld [vmem:[%s4738_s23 + $0x90] sm:$0xff]  ;;  %v306_v29 = vld [vmem:[%s4738_s23 + $0xc1] sm:$0xff]  ;;  %268 = vst.msk [vmem:[#allocation3 + $0xa0] sm:$0xff] %vm257_vm0, %v4855_v26  ;;  %269 = vst.msk [vmem:[#allocation3 + $0xb0] sm:$0xff] %vm257_vm0, %v4858_v27 }
  0x20   : > { %366 = vrot.lane.b32.xlu0 %v4765_v6, %s4685_s24  ;;  %368 = vrot.lane.b32.xlu1 %v4768_v7, %s4685_s24  ;;  %v307_v30 = vld [vmem:[%s4738_s23 + $0xc9] sm:$0xff]  ;;  %270 = vst.msk [vmem:[#allocation3 + $0xc0] sm:$0xff] %vm257_vm0, %v4861_v28  ;;  %v4872_v31 = vld [vmem:[%s4738_s23 + $0x98] sm:$0xff] }
  0x21   : > { %v4875_v32 = vld [vmem:[%s4738_s23 + $0xa8] sm:$0xff]  ;;  %v4878_v33 = vld [vmem:[%s4738_s23 + $0xb0] sm:$0xff]  ;;  %271 = vst.msk [vmem:[#allocation3 + $0xd0] sm:$0xff] %vm257_vm0, %v4872_v31  ;;  %v4891_v34 = vld [vmem:[%s4738_s23 + $0xc0] sm:$0xff] }
  0x22   : > { %272 = vst.msk [vmem:[#allocation3 + $0xe0] sm:$0xff] %vm257_vm0, %v4875_v32  ;;  %273 = vst.msk [vmem:[#allocation3 + $0xf0] sm:$0xff] %vm257_vm0, %v4878_v33  ;;  %v4894_v35 = vld [vmem:[%s4738_s23 + $0xc8] sm:$0xff]  ;;  %v4901_v36 = vld [vmem:[%s4738_s23 + $0xd8] sm:$0xff] }
  0x23   : > { %274 = vst.msk [vmem:[#allocation3 + $0x100] sm:$0xff] %vm257_vm0, %v4891_v34  ;;  %275 = vst.msk [vmem:[#allocation3 + $0x110] sm:$0xff] %vm257_vm0, %v4894_v35  ;;  %v4904_v37 = vld [vmem:[%s4738_s23 + $0xe0] sm:$0xff]  ;;  %v4907_v38 = vld [vmem:[%s4738_s23 + $0xf0] sm:$0xff] }
  0x24   : > { %370 = vrot.lane.b32.xlu0 %v4775_v8, %s4685_s24  ;;  %372 = vrot.lane.b32.xlu1 %v4778_v9, %s4685_s24  ;;  %276 = vst.msk [vmem:[#allocation3 + $0x120] sm:$0xff] %vm257_vm0, %v4901_v36  ;;  %277 = vst.msk [vmem:[#allocation3 + $0x130] sm:$0xff] %vm257_vm0, %v4904_v37  ;;  %v4916_v39 = vld [vmem:[%s4738_s23 + $0xf8] sm:$0xff]  ;;  %v4919_v40 = vld [vmem:[%s4738_s23 + $0x108] sm:$0xff] }
  0x25   : > { %278 = vst.msk [vmem:[#allocation3 + $0x140] sm:$0xff] %vm257_vm0, %v4907_v38  ;;  %279 = vst.msk [vmem:[#allocation3 + $0x150] sm:$0xff] %vm257_vm0, %v4916_v39  ;;  %v4928_v41 = vld [vmem:[%s4738_s23 + $0x110] sm:$0xff]  ;;  %v308_v42 = vld [vmem:[%s4738_s23 + $0xd9] sm:$0xff] }
  0x26   : > { %280 = vst.msk [vmem:[#allocation3 + $0x160] sm:$0xff] %vm257_vm0, %v4919_v40  ;;  %v309_v43 = vld [vmem:[%s4738_s23 + $0xe1] sm:$0xff]  ;;  %281 = vst.msk [vmem:[#allocation3 + $0x170] sm:$0xff] %vm257_vm0, %v4928_v41  ;;  %v310_v46 = vld [vmem:[%s4738_s23 + $0xf1] sm:$0xff] }
  0x27   : > { %v4935_v44 = vld [vmem:[%s4738_s23 + $0x120] sm:$0xff]  ;;  %v4942_v45 = vld [vmem:[%s4738_s23 + $0x128] sm:$0xff]  ;;  %v4949_v48 = vld [vmem:[%s4738_s23 + $0x138] sm:$0xff] }
  0x28   : > { %374 = vrot.lane.b32.xlu0 %v4785_v10, %s4685_s24  ;;  %376 = vrot.lane.b32.xlu1 %v4788_v11, %s4685_s24  ;;  %282 = vst.msk [vmem:[#allocation3 + $0x180] sm:$0xff] %vm257_vm0, %v4935_v44  ;;  %v311_v47 = vld [vmem:[%s4738_s23 + $0xf9] sm:$0xff]  ;;  %283 = vst.msk [vmem:[#allocation3 + $0x190] sm:$0xff] %vm257_vm0, %v4942_v45  ;;  %v312_v50 = vld [vmem:[%s4738_s23 + $0x109] sm:$0xff] }
  0x29   : > { %284 = vst.msk [vmem:[#allocation3 + $0x1a0] sm:$0xff] %vm257_vm0, %v4949_v48  ;;  %v4956_v49 = vld [vmem:[%s4738_s23 + $0x140] sm:$0xff]  ;;  %v313_v51 = vld [vmem:[%s4738_s23 + $0x111] sm:$0xff]  ;;  %v315_v55 = vld [vmem:[%s4738_s23 + $0x129] sm:$0xff] }
  0x2a   : > { %285 = vst.msk [vmem:[#allocation3 + $0x1b0] sm:$0xff] %vm257_vm0, %v4956_v49  ;;  %v4963_v52 = vld [vmem:[%s4738_s23 + $0x150] sm:$0xff]  ;;  %v4970_v53 = vld [vmem:[%s4738_s23 + $0x158] sm:$0xff]  ;;  %v314_v54 = vld [vmem:[%s4738_s23 + $0x121] sm:$0xff] }
  0x2b   : > { %286 = vst.msk [vmem:[#allocation3 + $0x1c0] sm:$0xff] %vm257_vm0, %v4963_v52  ;;  %287 = vst.msk [vmem:[#allocation3 + $0x1d0] sm:$0xff] %vm257_vm0, %v4970_v53  ;;  %v4977_v56 = vld [vmem:[%s4738_s23 + $0x168] sm:$0xff]  ;;  %v256_v57 = vld [vmem:[%s4738_s23 + $0x170] sm:$0xff] }
  0x2c   : > { %378 = vrot.lane.b32.xlu0 %v4796_v13, %s4685_s24  ;;  %380 = vrot.lane.b32.xlu1 %v4800_v14, %s4685_s24  ;;  %288 = vst.msk [vmem:[#allocation3 + $0x1e0] sm:$0xff] %vm257_vm0, %v4977_v56  ;;  %v316_v58 = vld [vmem:[%s4738_s23 + $0x139] sm:$0xff]  ;;  %v317_v59 = vld [vmem:[%s4738_s23 + $0x141] sm:$0xff]  ;;  %289 = vst.msk [vmem:[#allocation3 + $0x1f0] sm:$0xff] %vm257_vm0, %v256_v57 }
  0x2d   : > { %v318_v60 = vld [vmem:[%s4738_s23 + $0x151] sm:$0xff]  ;;  %v319_v61 = vld [vmem:[%s4738_s23 + $0x159] sm:$0xff]  ;;  %v320_v62 = vld [vmem:[%s4738_s23 + $0x169] sm:$0xff] }
  0x2e   : > { %v321_v63 = vld [vmem:[%s4738_s23 + $0x171] sm:$0xff]  ;;  %v483_v0 = vld [vmem:[%s4738_s23 + $0x2] sm:$0xff]  ;;  %v5002_v12 = vld [vmem:[%s4738_s23 + $0x1a] sm:$0xff] }
  0x2f   : > { %v484_v2 = vld [vmem:[%s4738_s23 + $0xa] sm:$0xff]  ;;  %v5005_v16 = vld [vmem:[%s4738_s23 + $0x22] sm:$0xff] }
  0x30   : > { %382 = vrot.lane.b32.xlu0 %v4816_v19, %s4685_s24  ;;  %384 = vrot.lane.b32.xlu1 %v4830_v21, %s4685_s24  ;;  %v5062_v57 = vld [vmem:[%s4738_s23 + $0xaa] sm:$0xff] }
  0x31   : > { %7194 = vst [vmem:[#allocation5_spill] sm:$0xff] %v5062_v57 }
  0x34   : > { %386 = vrot.lane.b32.xlu0 %v306_v29, %s4685_s24  ;;  %388 = vrot.lane.b32.xlu1 %v307_v30, %s4685_s24  ;;  %v5012_v29 = vld [vmem:[%s4738_s23 + $0x32] sm:$0xff]  ;;  %v5015_v30 = vld [vmem:[%s4738_s23 + $0x3a] sm:$0xff] }
  0x38   : > { %390 = vrot.lane.b32.xlu0 %v308_v42, %s4685_s24  ;;  %392 = vrot.lane.b32.xlu1 %v309_v43, %s4685_s24  ;;  %v5022_v42 = vld [vmem:[%s4738_s23 + $0x4a] sm:$0xff]  ;;  %v5025_v43 = vld [vmem:[%s4738_s23 + $0x52] sm:$0xff] }
  0x3c   : > { %394 = vrot.lane.b32.xlu0 %v310_v46, %s4685_s24  ;;  %396 = vrot.lane.b32.xlu1 %v311_v47, %s4685_s24  ;;  %v5032_v46 = vld [vmem:[%s4738_s23 + $0x62] sm:$0xff]  ;;  %v5035_v47 = vld [vmem:[%s4738_s23 + $0x6a] sm:$0xff] }
  0x40   : > { %398 = vrot.lane.b32.xlu0 %v312_v50, %s4685_s24  ;;  %400 = vrot.lane.b32.xlu1 %v313_v51, %s4685_s24  ;;  %v5042_v50 = vld [vmem:[%s4738_s23 + $0x7a] sm:$0xff]  ;;  %v5045_v51 = vld [vmem:[%s4738_s23 + $0x82] sm:$0xff] }
  0x44   : > { %402 = vrot.lane.b32.xlu0 %v314_v54, %s4685_s24  ;;  %404 = vrot.lane.b32.xlu1 %v315_v55, %s4685_s24  ;;  %v5052_v54 = vld [vmem:[%s4738_s23 + $0x92] sm:$0xff]  ;;  %v5055_v55 = vld [vmem:[%s4738_s23 + $0x9a] sm:$0xff] }
  0x48   : > { %406 = vrot.lane.b32.xlu0 %v316_v58, %s4685_s24  ;;  %408 = vrot.lane.b32.xlu1 %v317_v59, %s4685_s24  ;;  %v5065_v58 = vld [vmem:[%s4738_s23 + $0xb2] sm:$0xff]  ;;  %v5072_v59 = vld [vmem:[%s4738_s23 + $0xc2] sm:$0xff] }
  0x49   : > { %7195 = vst [vmem:[#allocation6_spill] sm:$0xff] %v5065_v58  ;;  %7196 = vst [vmem:[#allocation7_spill] sm:$0xff] %v5072_v59 }
  0x4c   : > { %410 = vrot.lane.b32.xlu0 %v318_v60, %s4685_s24  ;;  %412 = vrot.lane.b32.xlu1 %v319_v61, %s4685_s24  ;;  %v500_v60 = vld [vmem:[%s4738_s23 + $0xca] sm:$0xff]  ;;  %v501_v61 = vld [vmem:[%s4738_s23 + $0xda] sm:$0xff] }
  0x50   : > { %414 = vrot.lane.b32.xlu0 %v320_v62, %s4685_s24  ;;  %416 = vrot.lane.b32.xlu1 %v321_v63, %s4685_s24  ;;  %v502_v62 = vld [vmem:[%s4738_s23 + $0xe2] sm:$0xff]  ;;  %v503_v63 = vld [vmem:[%s4738_s23 + $0xf2] sm:$0xff] }
  0x54   : > { %547 = vrot.lane.b32.xlu0 %v483_v0, %s4686_s25  ;;  %549 = vrot.lane.b32.xlu1 %v484_v2, %s4686_s25  ;;  %v504_v0 = vld [vmem:[%s4738_s23 + $0xfa] sm:$0xff]  ;;  %v505_v2 = vld [vmem:[%s4738_s23 + $0x10a] sm:$0xff] }
  0x58   : > { %551 = vrot.lane.b32.xlu0 %v5002_v12, %s4686_s25  ;;  %553 = vrot.lane.b32.xlu1 %v5005_v16, %s4686_s25 }
  0x5c   : > { %555 = vrot.lane.b32.xlu0 %v5012_v29, %s4686_s25  ;;  %557 = vrot.lane.b32.xlu1 %v5015_v30, %s4686_s25 }
  0x60   : > { %559 = vrot.lane.b32.xlu0 %v5022_v42, %s4686_s25  ;;  %561 = vrot.lane.b32.xlu1 %v5025_v43, %s4686_s25 }
  0x64   : > { %563 = vrot.lane.b32.xlu0 %v5032_v46, %s4686_s25  ;;  %565 = vrot.lane.b32.xlu1 %v5035_v47, %s4686_s25 }
  0x68   : > { %567 = vrot.lane.b32.xlu0 %v5042_v50, %s4686_s25  ;;  %569 = vrot.lane.b32.xlu1 %v5045_v51, %s4686_s25 }
  0x6c   : > { %571 = vrot.lane.b32.xlu0 %v5052_v54, %s4686_s25  ;;  %573 = vrot.lane.b32.xlu1 %v5055_v55, %s4686_s25 }
  0x70   : > { %575 = vrot.lane.b32.xlu0 %v5062_v57, %s4686_s25  ;;  %577 = vrot.lane.b32.xlu1 %v5065_v58, %s4686_s25  ;;  %v506_v58 = vld [vmem:[%s4738_s23 + $0x112] sm:$0xff] }
  0x74   : > { %579 = vrot.lane.b32.xlu0 %v5072_v59, %s4686_s25  ;;  %581 = vrot.lane.b32.xlu1 %v500_v60, %s4686_s25  ;;  %v507_v60 = vld [vmem:[%s4738_s23 + $0x122] sm:$0xff]  ;;  %v508_v59 = vld [vmem:[%s4738_s23 + $0x12a] sm:$0xff] }
  0x78   : > { %583 = vrot.lane.b32.xlu0 %v501_v61, %s4686_s25  ;;  %585 = vrot.lane.b32.xlu1 %v502_v62, %s4686_s25  ;;  %v509_v61 = vld [vmem:[%s4738_s23 + $0x13a] sm:$0xff]  ;;  %v510_v62 = vld [vmem:[%s4738_s23 + $0x142] sm:$0xff] }
  0x7c   : > { %587 = vrot.lane.b32.xlu0 %v503_v63, %s4686_s25  ;;  %589 = vrot.lane.b32.xlu1 %v504_v0, %s4686_s25 }
  0x80   : > { %591 = vrot.lane.b32.xlu0 %v505_v2, %s4686_s25  ;;  %593 = vrot.lane.b32.xlu1 %v506_v58, %s4686_s25  ;;  %v511_v58 = vld [vmem:[%s4738_s23 + $0x152] sm:$0xff]  ;;  %v512_v2 = vld [vmem:[%s4738_s23 + $0x15a] sm:$0xff] }
  0x84   : > { %595 = vrot.lane.b32.xlu0 %v507_v60, %s4686_s25  ;;  %597 = vrot.lane.b32.xlu1 %v508_v59, %s4686_s25  ;;  %v513_v59 = vld [vmem:[%s4738_s23 + $0x16a] sm:$0xff] }
  0x86   : > { %v355_v63 = vpop.permute.xlu0 %354  ;;  %v359_v0 = vpop.permute.xlu1 %358 }
  0x87   : > { %451 = vst.msk [vmem:[#allocation3] sm:$0xff] %vm450_vm1, %v355_v63  ;;  %453 = vst.msk [vmem:[#allocation3 + $0x20] sm:$0xff] %vm450_vm1, %v359_v0  ;;  %v514_v63 = vld [vmem:[%s4738_s23 + $0x172] sm:$0xff] }
  0x88   : > { %599 = vrot.lane.b32.xlu0 %v509_v61, %s4686_s25  ;;  %601 = vrot.lane.b32.xlu1 %v510_v62, %s4686_s25 }
  0x8a   : > { %v357_v60 = vpop.permute.xlu0 %356  ;;  %v361_v57 = vpop.permute.xlu1 %360 }
  0x8b   : > { %452 = vst.msk [vmem:[#allocation3 + $0x10] sm:$0xff] %vm450_vm1, %v357_v60  ;;  %454 = vst.msk [vmem:[#allocation3 + $0x30] sm:$0xff] %vm450_vm1, %v361_v57 }
  0x8c   : > { %603 = vrot.lane.b32.xlu0 %v511_v58, %s4686_s25  ;;  %605 = vrot.lane.b32.xlu1 %v512_v2, %s4686_s25 }
  0x8e   : > { %v363_v21 = vpop.permute.xlu0 %362  ;;  %v365_v0 = vpop.permute.xlu1 %364 }
  0x8f   : > { %455 = vst.msk [vmem:[#allocation3 + $0x40] sm:$0xff] %vm450_vm1, %v363_v21  ;;  %456 = vst.msk [vmem:[#allocation3 + $0x50] sm:$0xff] %vm450_vm1, %v365_v0 }
  0x90   : > { %607 = vrot.lane.b32.xlu0 %v513_v59, %s4686_s25  ;;  %609 = vrot.lane.b32.xlu1 %v514_v63, %s4686_s25 }
  0x92   : > { %v367_v61 = vpop.permute.xlu0 %366  ;;  %v369_v62 = vpop.permute.xlu1 %368 }
  0x93   : > { %457 = vst.msk [vmem:[#allocation3 + $0x60] sm:$0xff] %vm450_vm1, %v367_v61  ;;  %458 = vst.msk [vmem:[#allocation3 + $0x70] sm:$0xff] %vm450_vm1, %v369_v62  ;;  %v1771_v61 = vld [vmem:[%s7184_s1] sm:$0xff]  ;;  %v1772_v62 = vld [vmem:[%s7184_s1 + $0x8] sm:$0xff] }
  0x94   : > { %741 = vrot.lane.b32.xlu0 %v4803_v15, %s4687_s26  ;;  %743 = vrot.lane.b32.xlu1 %v4810_v17, %s4687_s26 }
  0x96   : > { %v371_v21 = vpop.permute.xlu0 %370  ;;  %v373_v57 = vpop.permute.xlu1 %372 }
  0x97   : > { %459 = vst.msk [vmem:[#allocation3 + $0x80] sm:$0xff] %vm450_vm1, %v371_v21  ;;  %460 = vst.msk [vmem:[#allocation3 + $0x90] sm:$0xff] %vm450_vm1, %v373_v57 }
  0x98   : > { %745 = vrot.lane.b32.xlu0 %v4813_v18, %s4687_s26  ;;  %747 = vrot.lane.b32.xlu1 %v4823_v20, %s4687_s26 }
  0x9a   : > { %v375_v58 = vpop.permute.xlu0 %374  ;;  %v377_v2 = vpop.permute.xlu1 %376 }
  0x9b   : > { %461 = vst.msk [vmem:[#allocation3 + $0xa0] sm:$0xff] %vm450_vm1, %v375_v58  ;;  %462 = vst.msk [vmem:[#allocation3 + $0xb0] sm:$0xff] %vm450_vm1, %v377_v2  ;;  %v4605_v58 = vpack.c.bf16 %v1772_v62, %v1771_v61  ;;  %v4688_v2 = vmov 0.0|0.0   ;;  %v1776_v61 = vld [vmem:[%s7184_s1 + $0x28] sm:$0xff] }
  0x9c   : > { %749 = vrot.lane.b32.xlu0 %v4835_v22, %s4687_s26  ;;  %751 = vrot.lane.b32.xlu1 %v4840_v23, %s4687_s26 }
  0x9d   : > { %4604 = vmatprep.subr.bf16.mxu0 %v4688_v2  ;;  %4631 = vmatprep.subr.bf16.mxu1 %v4688_v2 }
  0x9e   : > { %v379_v15 = vpop.permute.xlu0 %378  ;;  %v381_v17 = vpop.permute.xlu1 %380  ;;  %4606 = vmatpush1.bf16.msra.mxu0 %v4605_v58  ;;  %v1777_v58 = vld [vmem:[%s7184_s1 + $0x30] sm:$0xff] }
  0x9f   : > { %463 = vst.msk [vmem:[#allocation3 + $0xc0] sm:$0xff] %vm450_vm1, %v379_v15  ;;  %464 = vst.msk [vmem:[#allocation3 + $0xd0] sm:$0xff] %vm450_vm1, %v381_v17  ;;  %v1773_v15 = vld [vmem:[%s7184_s1 + $0x10] sm:$0xff]  ;;  %v1774_v17 = vld [vmem:[%s7184_s1 + $0x18] sm:$0xff]  ;;  %4607 = vmatprep.subr.bf16.mxu0 %v4688_v2 }
  0xa0   : > { %753 = vrot.lane.b32.xlu0 %v4843_v24, %s4687_s26  ;;  %755 = vrot.lane.b32.xlu1 %v4846_v25, %s4687_s26 }
  0xa2   : > { %v383_v60 = vpop.permute.xlu0 %382  ;;  %v385_v59 = vpop.permute.xlu1 %384 }
  0xa3   : > { %465 = vst.msk [vmem:[#allocation3 + $0xe0] sm:$0xff] %vm450_vm1, %v383_v60  ;;  %466 = vst.msk [vmem:[#allocation3 + $0xf0] sm:$0xff] %vm450_vm1, %v385_v59 }
  0xa4   : > { %757 = vrot.lane.b32.xlu0 %v4855_v26, %s4687_s26  ;;  %759 = vrot.lane.b32.xlu1 %v4858_v27, %s4687_s26 }
  0xa6   : > { %v387_v63 = vpop.permute.xlu0 %386  ;;  %v389_v0 = vpop.permute.xlu1 %388 }
  0xa7   : > { %467 = vst.msk [vmem:[#allocation3 + $0x100] sm:$0xff] %vm450_vm1, %v387_v63  ;;  %468 = vst.msk [vmem:[#allocation3 + $0x110] sm:$0xff] %vm450_vm1, %v389_v0  ;;  %v4608_v63 = vpack.c.bf16 %v1774_v17, %v1773_v15  ;;  %v1775_v0 = vld [vmem:[%s7184_s1 + $0x20] sm:$0xff]  ;;  %v1778_v15 = vld [vmem:[%s7184_s1 + $0x38] sm:$0xff] }
  0xa8   : > { %761 = vrot.lane.b32.xlu0 %v4861_v28, %s4687_s26  ;;  %763 = vrot.lane.b32.xlu1 %v4872_v31, %s4687_s26 }
  0xa9   : > { %4609 = vmatpush1.bf16.msra.mxu0 %v4608_v63  ;;  %v1779_v63 = vld [vmem:[%s7184_s1 + $0x40] sm:$0xff] }
  0xaa   : > { %v391_v21 = vpop.permute.xlu0 %390  ;;  %v393_v57 = vpop.permute.xlu1 %392  ;;  %4610 = vmatprep.subr.bf16.mxu0 %v4688_v2 }
  0xab   : > { %469 = vst.msk [vmem:[#allocation3 + $0x120] sm:$0xff] %vm450_vm1, %v391_v21  ;;  %470 = vst.msk [vmem:[#allocation3 + $0x130] sm:$0xff] %vm450_vm1, %v393_v57  ;;  %v4611_v57 = vpack.c.bf16 %v1776_v61, %v1775_v0  ;;  %v1780_v0 = vld [vmem:[%s7184_s1 + $0x48] sm:$0xff] }
  0xac   : > { %765 = vrot.lane.b32.xlu0 %v4875_v32, %s4687_s26  ;;  %767 = vrot.lane.b32.xlu1 %v4878_v33, %s4687_s26 }
  0xad   : > { %4612 = vmatpush1.bf16.msra.mxu0 %v4611_v57 }
  0xae   : > { %v395_v60 = vpop.permute.xlu0 %394  ;;  %v397_v59 = vpop.permute.xlu1 %396  ;;  %4613 = vmatprep.subr.bf16.mxu0 %v4688_v2 }
  0xaf   : > { %471 = vst.msk [vmem:[#allocation3 + $0x140] sm:$0xff] %vm450_vm1, %v395_v60  ;;  %472 = vst.msk [vmem:[#allocation3 + $0x150] sm:$0xff] %vm450_vm1, %v397_v59  ;;  %v4614_v59 = vpack.c.bf16 %v1778_v15, %v1777_v58 }
  0xb0   : > { %769 = vrot.lane.b32.xlu0 %v4891_v34, %s4687_s26  ;;  %771 = vrot.lane.b32.xlu1 %v4894_v35, %s4687_s26 }
  0xb1   : > { %4615 = vmatpush1.bf16.msra.mxu0 %v4614_v59 }
  0xb2   : > { %v399_v62 = vpop.permute.xlu0 %398  ;;  %v401_v21 = vpop.permute.xlu1 %400  ;;  %4616 = vmatprep.subr.bf16.mxu0 %v4688_v2 }
  0xb3   : > { %473 = vst.msk [vmem:[#allocation3 + $0x160] sm:$0xff] %vm450_vm1, %v399_v62  ;;  %474 = vst.msk [vmem:[#allocation3 + $0x170] sm:$0xff] %vm450_vm1, %v401_v21  ;;  %v4617_v21 = vpack.c.bf16 %v1780_v0, %v1779_v63  ;;  %v4471_v63 = vld [vmem:[%s4738_s23 + $0x32] sm:$0xff] }
  0xb4   : > { %773 = vrot.lane.b32.xlu0 %v4901_v36, %s4687_s26  ;;  %775 = vrot.lane.b32.xlu1 %v4904_v37, %s4687_s26  ;;  %1675 = vst.msk [vmem:[#allocation3 + $0x8] sm:$0xff] %vm257_vm0, %v4471_v63 }
  0xb5   : > { %4618 = vmatpush1.bf16.msra.mxu0 %v4617_v21  ;;  %v1788_v21 = vld [vmem:[%s7184_s1 + $0x88] sm:$0xff] }
  0xb6   : > { %v403_v17 = vpop.permute.xlu0 %402  ;;  %v405_v60 = vpop.permute.xlu1 %404  ;;  %4619 = vmatprep.subr.bf16.mxu0 %v4688_v2 }
  0xb7   : > { %475 = vst.msk [vmem:[#allocation3 + $0x180] sm:$0xff] %vm450_vm1, %v403_v17  ;;  %476 = vst.msk [vmem:[#allocation3 + $0x190] sm:$0xff] %vm450_vm1, %v405_v60 }
  0xb8   : > { %777 = vrot.lane.b32.xlu0 %v4907_v38, %s4687_s26  ;;  %779 = vrot.lane.b32.xlu1 %v4916_v39, %s4687_s26  ;;  %v1781_v38 = vld [vmem:[%s7184_s1 + $0x50] sm:$0xff]  ;;  %v1782_v39 = vld [vmem:[%s7184_s1 + $0x58] sm:$0xff] }
  0xb9   : > { %v4620_v15 = vpack.c.bf16 %v1782_v39, %v1781_v38 }
  0xba   : > { %v407_v61 = vpop.permute.xlu0 %406  ;;  %v409_v62 = vpop.permute.xlu1 %408 }
  0xbb   : > { %477 = vst.msk [vmem:[#allocation3 + $0x1a0] sm:$0xff] %vm450_vm1, %v407_v61  ;;  %478 = vst.msk [vmem:[#allocation3 + $0x1b0] sm:$0xff] %vm450_vm1, %v409_v62  ;;  %4621 = vmatpush1.bf16.msra.mxu0 %v4620_v15 }
  0xbc   : > { %781 = vrot.lane.b32.xlu0 %v4919_v40, %s4687_s26  ;;  %783 = vrot.lane.b32.xlu1 %v4928_v41, %s4687_s26  ;;  %v1783_v40 = vld [vmem:[%s7184_s1 + $0x60] sm:$0xff]  ;;  %v1784_v41 = vld [vmem:[%s7184_s1 + $0x68] sm:$0xff] }
  0xbd   : > { %4622 = vmatprep.subr.bf16.mxu0 %v4688_v2  ;;  %v4623_v59 = vpack.c.bf16 %v1784_v41, %v1783_v40  ;;  %v4473_v40 = vld [vmem:[%s4738_s23 + $0x4a] sm:$0xff] }
  0xbe   : > { %v411_v57 = vpop.permute.xlu0 %410  ;;  %v413_v58 = vpop.permute.xlu1 %412  ;;  %1677 = vst.msk [vmem:[#allocation3 + $0x28] sm:$0xff] %vm257_vm0, %v4473_v40 }
  0xbf   : > { %479 = vst.msk [vmem:[#allocation3 + $0x1c0] sm:$0xff] %vm450_vm1, %v411_v57  ;;  %480 = vst.msk [vmem:[#allocation3 + $0x1d0] sm:$0xff] %vm450_vm1, %v413_v58  ;;  %4624 = vmatpush1.bf16.msra.mxu0 %v4623_v59  ;;  %v4472_v57 = vld [vmem:[%s4738_s23 + $0x3a] sm:$0xff] }
  0xc0   : > { %785 = vrot.lane.b32.xlu0 %v4935_v44, %s4687_s26  ;;  %787 = vrot.lane.b32.xlu1 %v4942_v45, %s4687_s26  ;;  %v1785_v44 = vld [vmem:[%s7184_s1 + $0x70] sm:$0xff]  ;;  %v1786_v45 = vld [vmem:[%s7184_s1 + $0x78] sm:$0xff]  ;;  %1676 = vst.msk [vmem:[#allocation3 + $0x18] sm:$0xff] %vm257_vm0, %v4472_v57 }
  0xc1   : > { %4625 = vmatprep.subr.bf16.mxu0 %v4688_v2  ;;  %v4626_v62 = vpack.c.bf16 %v1786_v45, %v1785_v44 }
  0xc2   : > { %v415_v17 = vpop.permute.xlu0 %414  ;;  %v417_v60 = vpop.permute.xlu1 %416 }
  0xc3   : > { %481 = vst.msk [vmem:[#allocation3 + $0x1e0] sm:$0xff] %vm450_vm1, %v415_v17  ;;  %482 = vst.msk [vmem:[#allocation3 + $0x1f0] sm:$0xff] %vm450_vm1, %v417_v60  ;;  %4627 = vmatpush1.bf16.msra.mxu0 %v4626_v62 }
  0xc4   : > { %789 = vrot.lane.b32.xlu0 %v4949_v48, %s4687_s26  ;;  %791 = vrot.lane.b32.xlu1 %v4956_v49, %s4687_s26  ;;  %v5252_v48 = vld [vmem:[%s4738_s23 + $0xca] sm:$0xff]  ;;  %v1787_v49 = vld [vmem:[%s7184_s1 + $0x80] sm:$0xff] }
  0xc5   : > { %1688 = vst.msk [vmem:[#allocation3 + $0xd8] sm:$0xff] %vm257_vm0, %v5252_v48  ;;  %4628 = vmatprep.subr.bf16.mxu0 %v4688_v2 }
  0xc6   : > { %v548_v0 = vpop.permute.xlu0 %547  ;;  %v550_v61 = vpop.permute.xlu1 %549 }
  0xc7   : > { %644 = vst.msk [vmem:[#allocation3] sm:$0xff] %vm643_vm2, %v548_v0  ;;  %645 = vst.msk [vmem:[#allocation3 + $0x10] sm:$0xff] %vm643_vm2, %v550_v61 }
  0xc8   : > { %793 = vrot.lane.b32.xlu0 %v4963_v52, %s4687_s26  ;;  %795 = vrot.lane.b32.xlu1 %v4970_v53, %s4687_s26  ;;  %v4629_v52 = vpack.c.bf16 %v1788_v21, %v1787_v49  ;;  %v1708_v53 = vld [vmem:[#allocation3 + $0x8] sm:$0xff] }
  0xc9   : > { %4504 = vmatprep.mubr.msk.f32.mxu0 %vm257_vm0, %v1708_v53 }
  0xca   : > { %v552_v38 = vpop.permute.xlu0 %551  ;;  %v554_v39 = vpop.permute.xlu1 %553  ;;  %4630 = vmatpush1.bf16.msra.mxu0 %v4629_v52 }
  0xcb   : > { %646 = vst.msk [vmem:[#allocation3 + $0x20] sm:$0xff] %vm643_vm2, %v552_v38  ;;  %647 = vst.msk [vmem:[#allocation3 + $0x30] sm:$0xff] %vm643_vm2, %v554_v39 }
  0xcc   : > { %797 = vrot.lane.b32.xlu0 %v4977_v56, %s4687_s26  ;;  %934 = vrot.lane.b32.xlu1 %v4742_v1, %s4689_s21 }
  0xce   : > { %v556_v58 = vpop.permute.xlu0 %555  ;;  %v558_v15 = vpop.permute.xlu1 %557 }
  0xcf   : > { %648 = vst.msk [vmem:[#allocation3 + $0x40] sm:$0xff] %vm643_vm2, %v556_v58  ;;  %649 = vst.msk [vmem:[#allocation3 + $0x50] sm:$0xff] %vm643_vm2, %v558_v15 }
  0xd0   : > { %1127 = vrot.lane.b32.xlu0 %v5002_v12, %s4690_s22  ;;  %1321 = vrot.lane.b32.xlu1 %v4813_v18, %s4691_s27 }
  0xd2   : > { %v560_v1 = vpop.permute.xlu0 %559  ;;  %v562_v56 = vpop.permute.xlu1 %561 }
  0xd3   : > { %650 = vst.msk [vmem:[#allocation3 + $0x60] sm:$0xff] %vm643_vm2, %v560_v1  ;;  %651 = vst.msk [vmem:[#allocation3 + $0x70] sm:$0xff] %vm643_vm2, %v562_v56 }
  0xd4   : > { %1514 = vrot.lane.b32.xlu0 %v4755_v4, %s4692_s28  ;;  %936 = vrot.lane.b32.xlu1 %v4749_v3, %s4689_s21  ;;  %v4474_v3 = vld [vmem:[%s4738_s23 + $0x52] sm:$0xff] }
  0xd5   : > { %1678 = vst.msk [vmem:[#allocation3 + $0x38] sm:$0xff] %vm257_vm0, %v4474_v3 }
  0xd6   : > { %v564_v12 = vpop.permute.xlu0 %563  ;;  %v566_v41 = vpop.permute.xlu1 %565 }
  0xd7   : > { %652 = vst.msk [vmem:[#allocation3 + $0x80] sm:$0xff] %vm643_vm2, %v564_v12  ;;  %653 = vst.msk [vmem:[#allocation3 + $0x90] sm:$0xff] %vm643_vm2, %v566_v41  ;;  %v7197_v12 = vld [vmem:[#allocation4_spill] sm:$0xff] }
  0xd8   : > { %1129 = vrot.lane.b32.xlu0 %v5005_v16, %s4690_s22  ;;  %1323 = vrot.lane.b32.xlu1 %v4823_v20, %s4691_s27 }
  0xda   : > { %v568_v18 = vpop.permute.xlu0 %567  ;;  %v570_v17 = vpop.permute.xlu1 %569 }
  0xdb   : > { %654 = vst.msk [vmem:[#allocation3 + $0xa0] sm:$0xff] %vm643_vm2, %v568_v18  ;;  %655 = vst.msk [vmem:[#allocation3 + $0xb0] sm:$0xff] %vm643_vm2, %v570_v17  ;;  %v4451_v17 = vld [vmem:[%s4738_s23 + $0xc1] sm:$0xff] }
  0xdc   : > { %1516 = vrot.lane.b32.xlu0 %v4758_v5, %s4692_s28  ;;  %938 = vrot.lane.b32.xlu1 %v4755_v4, %s4689_s21  ;;  %v4475_v4 = vld [vmem:[%s4738_s23 + $0x62] sm:$0xff] }
  0xdd   : > { %1679 = vst.msk [vmem:[#allocation3 + $0x48] sm:$0xff] %vm257_vm0, %v4475_v4  ;;  %v4452_v4 = vld [vmem:[%s4738_s23 + $0xc9] sm:$0xff] }
  0xde   : > { %v572_v60 = vpop.permute.xlu0 %571  ;;  %v574_v59 = vpop.permute.xlu1 %573 }
  0xdf   : > { %656 = vst.msk [vmem:[#allocation3 + $0xc0] sm:$0xff] %vm643_vm2, %v572_v60  ;;  %657 = vst.msk [vmem:[#allocation3 + $0xd0] sm:$0xff] %vm643_vm2, %v574_v59 }
  0xe0   : > { %1131 = vrot.lane.b32.xlu0 %v5012_v29, %s4690_s22  ;;  %1325 = vrot.lane.b32.xlu1 %v4835_v22, %s4691_s27 }
  0xe2   : > { %v576_v20 = vpop.permute.xlu0 %575  ;;  %v578_v16 = vpop.permute.xlu1 %577 }
  0xe3   : > { %658 = vst.msk [vmem:[#allocation3 + $0xe0] sm:$0xff] %vm643_vm2, %v576_v20  ;;  %659 = vst.msk [vmem:[#allocation3 + $0xf0] sm:$0xff] %vm643_vm2, %v578_v16  ;;  %v5465_v16 = vld [vmem:[%s4738_s23 + $0xf2] sm:$0xff] }
  0xe4   : > { %1518 = vrot.lane.b32.xlu0 %v4765_v6, %s4692_s28  ;;  %940 = vrot.lane.b32.xlu1 %v4758_v5, %s4689_s21  ;;  %v4476_v5 = vld [vmem:[%s4738_s23 + $0x6a] sm:$0xff]  ;;  %1691 = vst.msk [vmem:[#allocation3 + $0x108] sm:$0xff] %vm257_vm0, %v5465_v16 }
  0xe5   : > { %1680 = vst.msk [vmem:[#allocation3 + $0x58] sm:$0xff] %vm257_vm0, %v4476_v5  ;;  %v5481_v5 = vld [vmem:[%s4738_s23 + $0xfa] sm:$0xff] }
  0xe6   : > { %v580_v44 = vpop.permute.xlu0 %579  ;;  %v582_v45 = vpop.permute.xlu1 %581  ;;  %1692 = vst.msk [vmem:[#allocation3 + $0x118] sm:$0xff] %vm257_vm0, %v5481_v5 }
  0xe7   : > { %660 = vst.msk [vmem:[#allocation3 + $0x100] sm:$0xff] %vm643_vm2, %v580_v44  ;;  %661 = vst.msk [vmem:[#allocation3 + $0x110] sm:$0xff] %vm643_vm2, %v582_v45 }
  0xe8   : > { %1133 = vrot.lane.b32.xlu0 %v5015_v30, %s4690_s22  ;;  %1327 = vrot.lane.b32.xlu1 %v4840_v23, %s4691_s27 }
  0xea   : > { %v584_v22 = vpop.permute.xlu0 %583  ;;  %v586_v29 = vpop.permute.xlu1 %585 }
  0xeb   : > { %662 = vst.msk [vmem:[#allocation3 + $0x120] sm:$0xff] %vm643_vm2, %v584_v22  ;;  %663 = vst.msk [vmem:[#allocation3 + $0x130] sm:$0xff] %vm643_vm2, %v586_v29 }
  0xec   : > { %1520 = vrot.lane.b32.xlu0 %v4768_v7, %s4692_s28  ;;  %942 = vrot.lane.b32.xlu1 %v4765_v6, %s4689_s21  ;;  %v4477_v6 = vld [vmem:[%s4738_s23 + $0x7a] sm:$0xff] }
  0xed   : > { %1681 = vst.msk [vmem:[#allocation3 + $0x68] sm:$0xff] %vm257_vm0, %v4477_v6 }
  0xee   : > { %v588_v63 = vpop.permute.xlu0 %587  ;;  %v590_v0 = vpop.permute.xlu1 %589 }
  0xef   : > { %664 = vst.msk [vmem:[#allocation3 + $0x140] sm:$0xff] %vm643_vm2, %v588_v63  ;;  %665 = vst.msk [vmem:[#allocation3 + $0x150] sm:$0xff] %vm643_vm2, %v590_v0  ;;  %v5492_v63 = vld [vmem:[%s4738_s23 + $0x10a] sm:$0xff]  ;;  %v4453_v0 = vld [vmem:[%s4738_s23 + $0xd9] sm:$0xff] }
  0xf0   : > { %1135 = vrot.lane.b32.xlu0 %v5022_v42, %s4690_s22  ;;  %1329 = vrot.lane.b32.xlu1 %v4843_v24, %s4691_s27  ;;  %1693 = vst.msk [vmem:[#allocation3 + $0x128] sm:$0xff] %vm257_vm0, %v5492_v63 }
  0xf2   : > { %v592_v23 = vpop.permute.xlu0 %591  ;;  %v594_v30 = vpop.permute.xlu1 %593 }
  0xf3   : > { %666 = vst.msk [vmem:[#allocation3 + $0x160] sm:$0xff] %vm643_vm2, %v592_v23  ;;  %667 = vst.msk [vmem:[#allocation3 + $0x170] sm:$0xff] %vm643_vm2, %v594_v30 }
  0xf4   : > { %1522 = vrot.lane.b32.xlu0 %v4775_v8, %s4692_s28  ;;  %944 = vrot.lane.b32.xlu1 %v4768_v7, %s4689_s21  ;;  %v4478_v7 = vld [vmem:[%s4738_s23 + $0x82] sm:$0xff] }
  0xf5   : > { %1682 = vst.msk [vmem:[#allocation3 + $0x78] sm:$0xff] %vm257_vm0, %v4478_v7 }
  0xf6   : > { %v596_v61 = vpop.permute.xlu0 %595  ;;  %v598_v62 = vpop.permute.xlu1 %597 }
  0xf7   : > { %668 = vst.msk [vmem:[#allocation3 + $0x180] sm:$0xff] %vm643_vm2, %v596_v61  ;;  %669 = vst.msk [vmem:[#allocation3 + $0x190] sm:$0xff] %vm643_vm2, %v598_v62  ;;  %v5504_v61 = vld [vmem:[%s4738_s23 + $0x112] sm:$0xff]  ;;  %v4454_v62 = vld [vmem:[%s4738_s23 + $0xe1] sm:$0xff] }
  0xf8   : > { %1137 = vrot.lane.b32.xlu0 %v5025_v43, %s4690_s22  ;;  %1331 = vrot.lane.b32.xlu1 %v4846_v25, %s4691_s27  ;;  %1694 = vst.msk [vmem:[#allocation3 + $0x138] sm:$0xff] %vm257_vm0, %v5504_v61 }
  0xfa   : > { %v600_v24 = vpop.permute.xlu0 %599  ;;  %v602_v42 = vpop.permute.xlu1 %601 }
  0xfb   : > { %670 = vst.msk [vmem:[#allocation3 + $0x1a0] sm:$0xff] %vm643_vm2, %v600_v24  ;;  %671 = vst.msk [vmem:[#allocation3 + $0x1b0] sm:$0xff] %vm643_vm2, %v602_v42  ;;  %v5514_v24 = vld [vmem:[%s4738_s23 + $0x122] sm:$0xff] }
  0xfc   : > { %1524 = vrot.lane.b32.xlu0 %v4778_v9, %s4692_s28  ;;  %946 = vrot.lane.b32.xlu1 %v4775_v8, %s4689_s21  ;;  %v4479_v8 = vld [vmem:[%s4738_s23 + $0x92] sm:$0xff]  ;;  %1695 = vst.msk [vmem:[#allocation3 + $0x148] sm:$0xff] %vm257_vm0, %v5514_v24 }
  0xfd   : > { %1683 = vst.msk [vmem:[#allocation3 + $0x88] sm:$0xff] %vm257_vm0, %v4479_v8 }
  0xfe   : > { %v604_v49 = vpop.permute.xlu0 %603  ;;  %v606_v21 = vpop.permute.xlu1 %605 }
  0xff   : > { %672 = vst.msk [vmem:[#allocation3 + $0x1c0] sm:$0xff] %vm643_vm2, %v604_v49  ;;  %673 = vst.msk [vmem:[#allocation3 + $0x1d0] sm:$0xff] %vm643_vm2, %v606_v21  ;;  %v5517_v49 = vld [vmem:[%s4738_s23 + $0x12a] sm:$0xff] }
 0x100   : > { %1139 = vrot.lane.b32.xlu0 %v5032_v46, %s4690_s22  ;;  %1333 = vrot.lane.b32.xlu1 %v4855_v26, %s4691_s27  ;;  %1696 = vst.msk [vmem:[#allocation3 + $0x158] sm:$0xff] %vm257_vm0, %v5517_v49  ;;  %v1710_v21 = vld [vmem:[#allocation3 + $0x18] sm:$0xff] }
 0x102   : > { %v608_v25 = vpop.permute.xlu0 %607  ;;  %v610_v43 = vpop.permute.xlu1 %609 }
 0x103   : > { %674 = vst.msk [vmem:[#allocation3 + $0x1e0] sm:$0xff] %vm643_vm2, %v608_v25  ;;  %675 = vst.msk [vmem:[#allocation3 + $0x1f0] sm:$0xff] %vm643_vm2, %v610_v43  ;;  %v5536_v25 = vld [vmem:[%s4738_s23 + $0x152] sm:$0xff] }
 0x104   : > { %1526 = vrot.lane.b32.xlu0 %v4785_v10, %s4692_s28  ;;  %948 = vrot.lane.b32.xlu1 %v4778_v9, %s4689_s21  ;;  %v4480_v9 = vld [vmem:[%s4738_s23 + $0x9a] sm:$0xff]  ;;  %1699 = vst.msk [vmem:[#allocation3 + $0x188] sm:$0xff] %vm257_vm0, %v5536_v25 }
 0x105   : > { %1684 = vst.msk [vmem:[#allocation3 + $0x98] sm:$0xff] %vm257_vm0, %v4480_v9  ;;  %v4455_v9 = vld [vmem:[%s4738_s23 + $0xf1] sm:$0xff] }
 0x106   : > { %v742_v38 = vpop.permute.xlu0 %741  ;;  %v744_v46 = vpop.permute.xlu1 %743 }
 0x107   : > { %838 = vst.msk [vmem:[#allocation3] sm:$0xff] %vm837_vm3, %v742_v38  ;;  %839 = vst.msk [vmem:[#allocation3 + $0x10] sm:$0xff] %vm837_vm3, %v744_v46  ;;  %v4423_v46 = vld [vmem:[%s4738_s23 + $0xf0] sm:$0xff] }
 0x108   : > { %1141 = vrot.lane.b32.xlu0 %v5035_v47, %s4690_s22  ;;  %1335 = vrot.lane.b32.xlu1 %v4858_v27, %s4691_s27 }
 0x10a   : > { %v746_v26 = vpop.permute.xlu0 %745  ;;  %v748_v39 = vpop.permute.xlu1 %747 }
 0x10b   : > { %840 = vst.msk [vmem:[#allocation3 + $0x20] sm:$0xff] %vm837_vm3, %v746_v26  ;;  %841 = vst.msk [vmem:[#allocation3 + $0x30] sm:$0xff] %vm837_vm3, %v748_v39  ;;  %v5542_v26 = vld [vmem:[%s4738_s23 + $0x15a] sm:$0xff]  ;;  %v5549_v39 = vld [vmem:[%s4738_s23 + $0x16a] sm:$0xff] }
 0x10c   : > { %1528 = vrot.lane.b32.xlu0 %v4788_v11, %s4692_s28  ;;  %950 = vrot.lane.b32.xlu1 %v4785_v10, %s4689_s21  ;;  %v4481_v10 = vld [vmem:[%s4738_s23 + $0xaa] sm:$0xff]  ;;  %1700 = vst.msk [vmem:[#allocation3 + $0x198] sm:$0xff] %vm257_vm0, %v5542_v26  ;;  %1701 = vst.msk [vmem:[#allocation3 + $0x1a8] sm:$0xff] %vm257_vm0, %v5549_v39 }
 0x10d   : > { %1685 = vst.msk [vmem:[#allocation3 + $0xa8] sm:$0xff] %vm257_vm0, %v4481_v10  ;;  %v1712_v10 = vld [vmem:[#allocation3 + $0x28] sm:$0xff] }
 0x10e   : > { %v750_v52 = vpop.permute.xlu0 %749  ;;  %v752_v53 = vpop.permute.xlu1 %751 }
 0x10f   : > { %842 = vst.msk [vmem:[#allocation3 + $0x40] sm:$0xff] %vm837_vm3, %v750_v52  ;;  %843 = vst.msk [vmem:[#allocation3 + $0x50] sm:$0xff] %vm837_vm3, %v752_v53  ;;  %v5561_v52 = vld [vmem:[%s4738_s23 + $0x172] sm:$0xff]  ;;  %v5564_v53 = vld [vmem:[%s4738_s23 + $0x182] sm:$0xff] }
 0x110   : > { %1143 = vrot.lane.b32.xlu0 %v5042_v50, %s4690_s22  ;;  %1337 = vrot.lane.b32.xlu1 %v4861_v28, %s4691_s27  ;;  %1702 = vst.msk [vmem:[#allocation3 + $0x1b8] sm:$0xff] %vm257_vm0, %v5561_v52  ;;  %1703 = vst.msk [vmem:[#allocation3 + $0x1c8] sm:$0xff] %vm257_vm0, %v5564_v53 }
 0x112   : > { %v754_v27 = vpop.permute.xlu0 %753  ;;  %v756_v47 = vpop.permute.xlu1 %755 }
 0x113   : > { %844 = vst.msk [vmem:[#allocation3 + $0x60] sm:$0xff] %vm837_vm3, %v754_v27  ;;  %845 = vst.msk [vmem:[#allocation3 + $0x70] sm:$0xff] %vm837_vm3, %v756_v47 }
 0x114   : > { %1530 = vrot.lane.b32.xlu0 %v4796_v13, %s4692_s28  ;;  %952 = vrot.lane.b32.xlu1 %v4788_v11, %s4689_s21  ;;  %v4482_v11 = vld [vmem:[%s4738_s23 + $0xb2] sm:$0xff] }
 0x115   : > { %1686 = vst.msk [vmem:[#allocation3 + $0xb8] sm:$0xff] %vm257_vm0, %v4482_v11  ;;  %v4456_v11 = vld [vmem:[%s4738_s23 + $0xf9] sm:$0xff] }
 0x116   : > { %v758_v57 = vpop.permute.xlu0 %757  ;;  %v760_v58 = vpop.permute.xlu1 %759 }
 0x117   : > { %846 = vst.msk [vmem:[#allocation3 + $0x80] sm:$0xff] %vm837_vm3, %v758_v57  ;;  %847 = vst.msk [vmem:[#allocation3 + $0x90] sm:$0xff] %vm837_vm3, %v760_v58 }
 0x118   : > { %1145 = vrot.lane.b32.xlu0 %v5045_v51, %s4690_s22  ;;  %1339 = vrot.lane.b32.xlu1 %v4872_v31, %s4691_s27 }
 0x11a   : > { %v762_v28 = vpop.permute.xlu0 %761  ;;  %v764_v50 = vpop.permute.xlu1 %763 }
 0x11b   : > { %848 = vst.msk [vmem:[#allocation3 + $0xa0] sm:$0xff] %vm837_vm3, %v762_v28  ;;  %849 = vst.msk [vmem:[#allocation3 + $0xb0] sm:$0xff] %vm837_vm3, %v764_v50  ;;  %v4424_v50 = vld [vmem:[%s4738_s23 + $0xf8] sm:$0xff] }
 0x11c   : > { %1532 = vrot.lane.b32.xlu0 %v4800_v14, %s4692_s28  ;;  %954 = vrot.lane.b32.xlu1 %v4796_v13, %s4689_s21  ;;  %v4483_v13 = vld [vmem:[%s4738_s23 + $0xc2] sm:$0xff] }
 0x11d   : > { %1687 = vst.msk [vmem:[#allocation3 + $0xc8] sm:$0xff] %vm257_vm0, %v4483_v13 }
 0x11e   : > { %v766_v15 = vpop.permute.xlu0 %765  ;;  %v768_v51 = vpop.permute.xlu1 %767 }
 0x11f   : > { %850 = vst.msk [vmem:[#allocation3 + $0xc0] sm:$0xff] %vm837_vm3, %v766_v15  ;;  %851 = vst.msk [vmem:[#allocation3 + $0xd0] sm:$0xff] %vm837_vm3, %v768_v51 }
 0x120   : > { %1147 = vrot.lane.b32.xlu0 %v5052_v54, %s4690_s22  ;;  %1341 = vrot.lane.b32.xlu1 %v4875_v32, %s4691_s27  ;;  %v5430_v54 = vld [vmem:[%s4738_s23 + $0xda] sm:$0xff] }
 0x121   : > { %1689 = vst.msk [vmem:[#allocation3 + $0xe8] sm:$0xff] %vm257_vm0, %v5430_v54 }
 0x122   : > { %v770_v31 = vpop.permute.xlu0 %769  ;;  %v772_v1 = vpop.permute.xlu1 %771 }
 0x123   : > { %852 = vst.msk [vmem:[#allocation3 + $0xe0] sm:$0xff] %vm837_vm3, %v770_v31  ;;  %853 = vst.msk [vmem:[#allocation3 + $0xf0] sm:$0xff] %vm837_vm3, %v772_v1  ;;  %v1714_v31 = vld [vmem:[#allocation3 + $0x38] sm:$0xff] }
 0x124   : > { %1534 = vrot.lane.b32.xlu0 %v4816_v19, %s4692_s28  ;;  %956 = vrot.lane.b32.xlu1 %v4800_v14, %s4689_s21 }
 0x126   : > { %v774_v56 = vpop.permute.xlu0 %773  ;;  %v776_v40 = vpop.permute.xlu1 %775 }
 0x127   : > { %854 = vst.msk [vmem:[#allocation3 + $0x100] sm:$0xff] %vm837_vm3, %v774_v56  ;;  %855 = vst.msk [vmem:[#allocation3 + $0x110] sm:$0xff] %vm837_vm3, %v776_v40  ;;  %v4425_v40 = vld [vmem:[%s4738_s23 + $0x108] sm:$0xff] }
 0x128   : > { %1149 = vrot.lane.b32.xlu0 %v5055_v55, %s4690_s22  ;;  %1343 = vrot.lane.b32.xlu1 %v4878_v33, %s4691_s27  ;;  %v5448_v55 = vld [vmem:[%s4738_s23 + $0xe2] sm:$0xff]  ;;  %v7198_v33 = vld [vmem:[#allocation5_spill] sm:$0xff] }
 0x129   : > { %1690 = vst.msk [vmem:[#allocation3 + $0xf8] sm:$0xff] %vm257_vm0, %v5448_v55 }
 0x12a   : > { %v778_v14 = vpop.permute.xlu0 %777  ;;  %v780_v32 = vpop.permute.xlu1 %779 }
 0x12b   : > { %856 = vst.msk [vmem:[#allocation3 + $0x120] sm:$0xff] %vm837_vm3, %v778_v14  ;;  %857 = vst.msk [vmem:[#allocation3 + $0x130] sm:$0xff] %vm837_vm3, %v780_v32 }
 0x12c   : > { %1536 = vrot.lane.b32.xlu0 %v7197_v12, %s4692_s28  ;;  %958 = vrot.lane.b32.xlu1 %v4816_v19, %s4689_s21  ;;  %v4356_v19 = vld [vmem:[%s4738_s23 + $0xb1] sm:$0xff] }
 0x12d   : > { %v1716_v12 = vld [vmem:[#allocation3 + $0x48] sm:$0xff] }
 0x12e   : > { %v782_v41 = vpop.permute.xlu0 %781  ;;  %v784_v18 = vpop.permute.xlu1 %783 }
 0x12f   : > { %858 = vst.msk [vmem:[#allocation3 + $0x140] sm:$0xff] %vm837_vm3, %v782_v41  ;;  %859 = vst.msk [vmem:[#allocation3 + $0x150] sm:$0xff] %vm837_vm3, %v784_v18 }
 0x130   : > { %1151 = vrot.lane.b32.xlu0 %v7198_v33, %s4690_s22  ;;  %1345 = vrot.lane.b32.xlu1 %v4891_v34, %s4691_s27  ;;  %v7199_v34 = vld [vmem:[#allocation6_spill] sm:$0xff]  ;;  %v4426_v33 = vld [vmem:[%s4738_s23 + $0x110] sm:$0xff] }
 0x132   : > { %v786_v3 = vpop.permute.xlu0 %785  ;;  %v788_v60 = vpop.permute.xlu1 %787 }
 0x133   : > { %860 = vst.msk [vmem:[#allocation3 + $0x160] sm:$0xff] %vm837_vm3, %v786_v3  ;;  %861 = vst.msk [vmem:[#allocation3 + $0x170] sm:$0xff] %vm837_vm3, %v788_v60  ;;  %v1718_v60 = vld [vmem:[#allocation3 + $0x58] sm:$0xff] }
 0x134   : > { %1538 = vrot.lane.b32.xlu0 %v4451_v17, %s4692_s28  ;;  %960 = vrot.lane.b32.xlu1 %v4356_v19, %s4689_s21 }
 0x136   : > { %v790_v59 = vpop.permute.xlu0 %789  ;;  %v792_v20 = vpop.permute.xlu1 %791 }
 0x137   : > { %862 = vst.msk [vmem:[#allocation3 + $0x180] sm:$0xff] %vm837_vm3, %v790_v59  ;;  %863 = vst.msk [vmem:[#allocation3 + $0x190] sm:$0xff] %vm837_vm3, %v792_v20 }
 0x138   : > { %1153 = vrot.lane.b32.xlu0 %v7199_v34, %s4690_s22  ;;  %1347 = vrot.lane.b32.xlu1 %v4894_v35, %s4691_s27  ;;  %v7200_v35 = vld [vmem:[#allocation7_spill] sm:$0xff]  ;;  %v4427_v34 = vld [vmem:[%s4738_s23 + $0x120] sm:$0xff] }
 0x13a   : > { %v794_v44 = vpop.permute.xlu0 %793  ;;  %v796_v45 = vpop.permute.xlu1 %795 }
 0x13b   : > { %864 = vst.msk [vmem:[#allocation3 + $0x1a0] sm:$0xff] %vm837_vm3, %v794_v44  ;;  %865 = vst.msk [vmem:[#allocation3 + $0x1b0] sm:$0xff] %vm837_vm3, %v796_v45 }
 0x13c   : > { %1540 = vrot.lane.b32.xlu0 %v4452_v4, %s4692_s28  ;;  %962 = vrot.lane.b32.xlu1 %v4451_v17, %s4689_s21  ;;  %v4458_v17 = vld [vmem:[%s4738_s23 + $0x111] sm:$0xff] }
 0x13e   : > { %v798_v22 = vpop.permute.xlu0 %797  ;;  %v935_v29 = vpop.permute.xlu1 %934 }
 0x13f   : > { %866 = vst.msk [vmem:[#allocation3 + $0x1c0] sm:$0xff] %vm837_vm3, %v798_v22  ;;  %v1720_v22 = vld [vmem:[#allocation3 + $0x68] sm:$0xff] }
 0x140   : > { %1031 = vst.msk [vmem:[#allocation3] sm:$0xff] %vm1030_vm4, %v935_v29  ;;  %1155 = vrot.lane.b32.xlu0 %v7200_v35, %s4690_s22  ;;  %1349 = vrot.lane.b32.xlu1 %v4901_v36, %s4691_s27 }
 0x142   : > { %v1128_v23 = vpop.permute.xlu0 %1127  ;;  %v1322_v30 = vpop.permute.xlu1 %1321 }
 0x143   : > { %1224 = vst.msk [vmem:[#allocation3] sm:$0xff] %vm1223_vm5, %v1128_v23 }
 0x144   : > { %1542 = vrot.lane.b32.xlu0 %v4453_v0, %s4692_s28  ;;  %1418 = vst.msk [vmem:[#allocation3] sm:$0xff] %vm1417_vm6, %v1322_v30  ;;  %964 = vrot.lane.b32.xlu1 %v4452_v4, %s4689_s21  ;;  %v4459_v4 = vld [vmem:[%s4738_s23 + $0x121] sm:$0xff] }
 0x146   : > { %v1515_v36 = vpop.permute.xlu0 %1514  ;;  %v937_v6 = vpop.permute.xlu1 %936 }
 0x147   : > { %1611 = vst.msk [vmem:[#allocation3] sm:$0xff] %vm1610_vm7, %v1515_v36  ;;  %v1722_v36 = vld [vmem:[#allocation3 + $0x78] sm:$0xff] }
 0x148   : > { %1032 = vst.msk [vmem:[#allocation3 + $0x10] sm:$0xff] %vm1030_vm4, %v937_v6  ;;  %1157 = vrot.lane.b32.xlu0 %v5252_v48, %s4690_s22  ;;  %1351 = vrot.lane.b32.xlu1 %v4904_v37, %s4691_s27  ;;  %v5523_v48 = vld [vmem:[%s4738_s23 + $0x13a] sm:$0xff]  ;;  %v5531_v37 = vld [vmem:[%s4738_s23 + $0x142] sm:$0xff] }
 0x149   : > { %1697 = vst.msk [vmem:[#allocation3 + $0x168] sm:$0xff] %vm257_vm0, %v5523_v48  ;;  %1698 = vst.msk [vmem:[#allocation3 + $0x178] sm:$0xff] %vm257_vm0, %v5531_v37 }
 0x14a   : > { %v1130_v42 = vpop.permute.xlu0 %1129  ;;  %v1324_v7 = vpop.permute.xlu1 %1323 }
 0x14b   : > { %1225 = vst.msk [vmem:[#allocation3 + $0x10] sm:$0xff] %vm1223_vm5, %v1130_v42 }
 0x14c   : > { %1544 = vrot.lane.b32.xlu0 %v4454_v62, %s4692_s28  ;;  %1419 = vst.msk [vmem:[#allocation3 + $0x10] sm:$0xff] %vm1417_vm6, %v1324_v7  ;;  %966 = vrot.lane.b32.xlu1 %v4453_v0, %s4689_s21  ;;  %v4428_v0 = vld [vmem:[%s4738_s23 + $0x128] sm:$0xff]  ;;  %v4429_v7 = vld [vmem:[%s4738_s23 + $0x138] sm:$0xff] }
 0x14e   : > { %v1517_v43 = vpop.permute.xlu0 %1516  ;;  %v1707_v8 = vld [vmem:[#allocation3] sm:$0xff]  ;;  %v939_v38 = vpop.permute.xlu1 %938 }
 0x14f   : > { %1612 = vst.msk [vmem:[#allocation3 + $0x10] sm:$0xff] %vm1610_vm7, %v1517_v43  ;;  %1957 = vmatmul.mubr.f32.vlgmr.msra.gmra.mrb[0].mxu0 %v1707_v8  ;;  %v1724_v8 = vld [vmem:[#allocation3 + $0x88] sm:$0xff] }
 0x150   : > { %1033 = vst.msk [vmem:[#allocation3 + $0x20] sm:$0xff] %vm1030_vm4, %v939_v38  ;;  %4505 = vmatprep.mubr.msk.f32.mxu0 %vm257_vm0, %v1710_v21  ;;  %1159 = vrot.lane.b32.xlu0 %v5430_v54, %s4690_s22  ;;  %v4457_v54 = vld [vmem:[%s4738_s23 + $0x109] sm:$0xff] }
 0x151   : > { %1353 = vrot.lane.b32.xlu1 %v4423_v46, %s4691_s27 }
 0x152   : > { %v1132_v27 = vpop.permute.xlu0 %1131  ;;  %v1326_v47 = vpop.permute.xlu1 %1325 }
 0x153   : > { %1226 = vst.msk [vmem:[#allocation3 + $0x20] sm:$0xff] %vm1223_vm5, %v1132_v27  ;;  %v4430_v27 = vld [vmem:[%s4738_s23 + $0x140] sm:$0xff] }
 0x154   : > { %1420 = vst.msk [vmem:[#allocation3 + $0x20] sm:$0xff] %vm1417_vm6, %v1326_v47  ;;  %1546 = vrot.lane.b32.xlu0 %v4455_v9, %s4692_s28 }
 0x155   : > { %968 = vrot.lane.b32.xlu1 %v4454_v62, %s4689_s21 }
 0x156   : > { %v1519_v57 = vpop.permute.xlu0 %1518  ;;  %v1709_v58 = vld [vmem:[#allocation3 + $0x10] sm:$0xff]  ;;  %v941_v28 = vpop.permute.xlu1 %940 }
 0x157   : > { %1613 = vst.msk [vmem:[#allocation3 + $0x20] sm:$0xff] %vm1610_vm7, %v1519_v57  ;;  %1962 = vmatmul.mubr.f32.gmra.mrb[2].mxu0 %v1709_v58  ;;  %v1726_v57 = vld [vmem:[#allocation3 + $0x98] sm:$0xff] }
 0x158   : > { %1034 = vst.msk [vmem:[#allocation3 + $0x30] sm:$0xff] %vm1030_vm4, %v941_v28  ;;  %4506 = vmatprep.mubr.msk.f32.mxu0 %vm257_vm0, %v1712_v10  ;;  %1161 = vrot.lane.b32.xlu0 %v5448_v55, %s4690_s22 }
 0x159   : > { %1355 = vrot.lane.b32.xlu1 %v4424_v50, %s4691_s27 }
 0x15a   : > { %v1134_v15 = vpop.permute.xlu0 %1133  ;;  %v1328_v51 = vpop.permute.xlu1 %1327 }
 0x15b   : > { %1227 = vst.msk [vmem:[#allocation3 + $0x30] sm:$0xff] %vm1223_vm5, %v1134_v15 }
 0x15c   : > { %1421 = vst.msk [vmem:[#allocation3 + $0x30] sm:$0xff] %vm1417_vm6, %v1328_v51  ;;  %1548 = vrot.lane.b32.xlu0 %v4456_v11, %s4692_s28 }
 0x15d   : > { %970 = vrot.lane.b32.xlu1 %v4455_v9, %s4689_s21 }
 0x15e   : > { %v1521_v1 = vpop.permute.xlu0 %1520  ;;  %v1711_v13 = vld [vmem:[#allocation3 + $0x20] sm:$0xff]  ;;  %v943_v56 = vpop.permute.xlu1 %942 }
 0x15f   : > { %1614 = vst.msk [vmem:[#allocation3 + $0x30] sm:$0xff] %vm1610_vm7, %v1521_v1  ;;  %1967 = vmatmul.mubr.f32.gmra.mrb[4].mxu0 %v1711_v13 }
 0x160   : > { %1035 = vst.msk [vmem:[#allocation3 + $0x40] sm:$0xff] %vm1030_vm4, %v943_v56  ;;  %4507 = vmatprep.mubr.msk.f32.mxu0 %vm257_vm0, %v1714_v31  ;;  %1163 = vrot.lane.b32.xlu0 %v5465_v16, %s4690_s22  ;;  %v1728_v31 = vld [vmem:[#allocation3 + $0xa8] sm:$0xff] }
 0x161   : > { %1357 = vrot.lane.b32.xlu1 %v4425_v40, %s4691_s27  ;;  %v4432_v40 = vld [vmem:[%s4738_s23 + $0x158] sm:$0xff] }
 0x162   : > { %v1136_v14 = vpop.permute.xlu0 %1135  ;;  %v1330_v32 = vpop.permute.xlu1 %1329 }
 0x163   : > { %1228 = vst.msk [vmem:[#allocation3 + $0x40] sm:$0xff] %vm1223_vm5, %v1136_v14 }
 0x164   : > { %1422 = vst.msk [vmem:[#allocation3 + $0x40] sm:$0xff] %vm1417_vm6, %v1330_v32  ;;  %1550 = vrot.lane.b32.xlu0 %v4457_v54, %s4692_s28  ;;  %v1730_v32 = vld [vmem:[#allocation3 + $0xb8] sm:$0xff] }
 0x165   : > { %972 = vrot.lane.b32.xlu1 %v4456_v11, %s4689_s21  ;;  %v4431_v11 = vld [vmem:[%s4738_s23 + $0x150] sm:$0xff] }
 0x166   : > { %v1523_v41 = vpop.permute.xlu0 %1522  ;;  %v1713_v18 = vld [vmem:[#allocation3 + $0x30] sm:$0xff]  ;;  %v945_v55 = vpop.permute.xlu1 %944 }
 0x167   : > { %1615 = vst.msk [vmem:[#allocation3 + $0x40] sm:$0xff] %vm1610_vm7, %v1523_v41  ;;  %1972 = vmatmul.mubr.f32.gmra.mrb[6].mxu0 %v1713_v18 }
 0x168   : > { %1036 = vst.msk [vmem:[#allocation3 + $0x50] sm:$0xff] %vm1030_vm4, %v945_v55  ;;  %4508 = vmatprep.mubr.msk.f32.mxu0 %vm257_vm0, %v1716_v12  ;;  %1165 = vrot.lane.b32.xlu0 %v5481_v5, %s4690_s22  ;;  %v4433_v55 = vld [vmem:[%s4738_s23 + $0x168] sm:$0xff] }
 0x169   : > { %1359 = vrot.lane.b32.xlu1 %v4426_v33, %s4691_s27 }
 0x16a   : > { %v1138_v19 = vpop.permute.xlu0 %1137  ;;  %v1332_v3 = vpop.permute.xlu1 %1331 }
 0x16b   : > { %1229 = vst.msk [vmem:[#allocation3 + $0x50] sm:$0xff] %vm1223_vm5, %v1138_v19  ;;  %v4693_v19 = vmov 0.0  }
 0x16c   : > { %1423 = vst.msk [vmem:[#allocation3 + $0x50] sm:$0xff] %vm1417_vm6, %v1332_v3  ;;  %1552 = vrot.lane.b32.xlu0 %v4458_v17, %s4692_s28 }
 0x16d   : > { %974 = vrot.lane.b32.xlu1 %v4457_v54, %s4689_s21  ;;  %2153 = vst.msk [vmem:[#allocation2 + $0x18] sm:$0xff] %vm257_vm0, %v4693_v19  ;;  %2154 = vst.msk [vmem:[#allocation2 + $0x20] sm:$0xff] %vm257_vm0, %v4693_v19 }
 0x16e   : > { %v1525_v59 = vpop.permute.xlu0 %1524  ;;  %v1715_v20 = vld [vmem:[#allocation3 + $0x40] sm:$0xff]  ;;  %v947_v16 = vpop.permute.xlu1 %946  ;;  %2149 = vst.msk [vmem:[#allocation2] sm:$0xff] %vm257_vm0, %v4693_v19  ;;  %2150 = vst.msk [vmem:[#allocation2 + $0x8] sm:$0xff] %vm257_vm0, %v4693_v19 }
 0x16f   : > { %1616 = vst.msk [vmem:[#allocation3 + $0x50] sm:$0xff] %vm1610_vm7, %v1525_v59  ;;  %1977 = vmatmul.mubr.f32.gmra.mrb[8].mxu0 %v1715_v20  ;;  %v4434_v20 = vld [vmem:[%s4738_s23 + $0x170] sm:$0xff] }
 0x170   : > { %1037 = vst.msk [vmem:[#allocation3 + $0x60] sm:$0xff] %vm1030_vm4, %v947_v16  ;;  %4509 = vmatprep.mubr.msk.f32.mxu0 %vm257_vm0, %v1718_v60  ;;  %1167 = vrot.lane.b32.xlu0 %v5492_v63, %s4690_s22  ;;  %v4460_v63 = vld [vmem:[%s4738_s23 + $0x129] sm:$0xff]  ;;  %v4466_v16 = vld [vmem:[%s4738_s23 + $0x171] sm:$0xff] }
 0x171   : > { %1361 = vrot.lane.b32.xlu1 %v4427_v34, %s4691_s27  ;;  %2156 = vst.msk [vmem:[#allocation2 + $0x30] sm:$0xff] %vm257_vm0, %v4693_v19  ;;  %2157 = vst.msk [vmem:[#allocation2 + $0x38] sm:$0xff] %vm257_vm0, %v4693_v19 }
 0x172   : > { %v1140_v44 = vpop.permute.xlu0 %1139  ;;  %v1334_v45 = vpop.permute.xlu1 %1333  ;;  %2159 = vst.msk [vmem:[#allocation2 + $0x48] sm:$0xff] %vm257_vm0, %v4693_v19  ;;  %2160 = vst.msk [vmem:[#allocation2 + $0x50] sm:$0xff] %vm257_vm0, %v4693_v19 }
 0x173   : > { %1230 = vst.msk [vmem:[#allocation3 + $0x60] sm:$0xff] %vm1223_vm5, %v1140_v44  ;;  %v5778_v44 = vld [vmem:[%s4738_s23 + $0x18a] sm:$0xff] }
 0x174   : > { %1424 = vst.msk [vmem:[#allocation3 + $0x60] sm:$0xff] %vm1417_vm6, %v1334_v45  ;;  %1554 = vrot.lane.b32.xlu0 %v4459_v4, %s4692_s28 }
 0x175   : > { %976 = vrot.lane.b32.xlu1 %v4458_v17, %s4689_s21  ;;  %2162 = vst.msk [vmem:[#allocation2 + $0x60] sm:$0xff] %vm257_vm0, %v4693_v19  ;;  %2163 = vst.msk [vmem:[#allocation2 + $0x68] sm:$0xff] %vm257_vm0, %v4693_v19 }
 0x176   : > { %v1527_v29 = vpop.permute.xlu0 %1526  ;;  %v1717_v5 = vld [vmem:[#allocation3 + $0x50] sm:$0xff]  ;;  %v949_v35 = vpop.permute.xlu1 %948  ;;  %2165 = vst.msk [vmem:[#allocation2 + $0x78] sm:$0xff] %vm257_vm0, %v4693_v19  ;;  %2166 = vst.msk [vmem:[#allocation2 + $0x80] sm:$0xff] %vm257_vm0, %v4693_v19 }
 0x177   : > { %1617 = vst.msk [vmem:[#allocation3 + $0x60] sm:$0xff] %vm1610_vm7, %v1527_v29  ;;  %1982 = vmatmul.mubr.f32.gmra.mrb[10].mxu0 %v1717_v5  ;;  %v4435_v5 = vld [vmem:[%s4738_s23 + $0x180] sm:$0xff] }
 0x178   : > { %1038 = vst.msk [vmem:[#allocation3 + $0x70] sm:$0xff] %vm1030_vm4, %v949_v35  ;;  %4510 = vmatprep.mubr.msk.f32.mxu0 %vm257_vm0, %v1720_v22  ;;  %1169 = vrot.lane.b32.xlu0 %v5504_v61, %s4690_s22  ;;  %v4461_v61 = vld [vmem:[%s4738_s23 + $0x139] sm:$0xff] }
 0x179   : > { %1363 = vrot.lane.b32.xlu1 %v4428_v0, %s4691_s27  ;;  %2168 = vst.msk [vmem:[#allocation2 + $0x90] sm:$0xff] %vm257_vm0, %v4693_v19  ;;  %2169 = vst.msk [vmem:[#allocation2 + $0x98] sm:$0xff] %vm257_vm0, %v4693_v19 }
 0x17a   : > { %v1142_v23 = vpop.permute.xlu0 %1141  ;;  %v1336_v30 = vpop.permute.xlu1 %1335  ;;  %2171 = vst.msk [vmem:[#allocation2 + $0xa8] sm:$0xff] %vm257_vm0, %v4693_v19  ;;  %2172 = vst.msk [vmem:[#allocation2 + $0xb0] sm:$0xff] %vm257_vm0, %v4693_v19 }
 0x17b   : > { %1231 = vst.msk [vmem:[#allocation3 + $0x70] sm:$0xff] %vm1223_vm5, %v1142_v23  ;;  %v1736_v23 = vld [vmem:[#allocation3 + $0xe8] sm:$0xff] }
 0x17c   : > { %1425 = vst.msk [vmem:[#allocation3 + $0x70] sm:$0xff] %vm1417_vm6, %v1336_v30  ;;  %1556 = vrot.lane.b32.xlu0 %v4460_v63, %s4692_s28 }
 0x17d   : > { %978 = vrot.lane.b32.xlu1 %v4459_v4, %s4689_s21  ;;  %2174 = vst.msk [vmem:[#allocation2 + $0xc0] sm:$0xff] %vm257_vm0, %v4693_v19  ;;  %2175 = vst.msk [vmem:[#allocation2 + $0xc8] sm:$0xff] %vm257_vm0, %v4693_v19 }
 0x17e   : > { %v1529_v6 = vpop.permute.xlu0 %1528  ;;  %v1719_v62 = vld [vmem:[#allocation3 + $0x60] sm:$0xff]  ;;  %v951_v42 = vpop.permute.xlu1 %950  ;;  %2177 = vst.msk [vmem:[#allocation2 + $0xd8] sm:$0xff] %vm257_vm0, %v4693_v19  ;;  %2178 = vst.msk [vmem:[#allocation2 + $0xe0] sm:$0xff] %vm257_vm0, %v4693_v19 }
 0x17f   : > { %1618 = vst.msk [vmem:[#allocation3 + $0x70] sm:$0xff] %vm1610_vm7, %v1529_v6  ;;  %1987 = vmatmul.mubr.f32.gmra.mrb[12].mxu0 %v1719_v62 }
 0x180   : > { %1039 = vst.msk [vmem:[#allocation3 + $0x80] sm:$0xff] %vm1030_vm4, %v951_v42  ;;  %4511 = vmatprep.mubr.msk.f32.mxu0 %vm257_vm0, %v1722_v36  ;;  %1171 = vrot.lane.b32.xlu0 %v5514_v24, %s4690_s22  ;;  %v4462_v24 = vld [vmem:[%s4738_s23 + $0x141] sm:$0xff] }
 0x181   : > { %1365 = vrot.lane.b32.xlu1 %v4429_v7, %s4691_s27  ;;  %2180 = vst.msk [vmem:[#allocation2 + $0xf0] sm:$0xff] %vm257_vm0, %v4693_v19  ;;  %2181 = vst.msk [vmem:[#allocation2 + $0xf8] sm:$0xff] %vm257_vm0, %v4693_v19  ;;  %v1738_v7 = vld [vmem:[#allocation3 + $0xf8] sm:$0xff] }
 0x182   : > { %v1144_v21 = vpop.permute.xlu0 %1143  ;;  %v1338_v43 = vpop.permute.xlu1 %1337  ;;  %2183 = vst.msk [vmem:[#allocation2 + $0x108] sm:$0xff] %vm257_vm0, %v4693_v19  ;;  %2184 = vst.msk [vmem:[#allocation2 + $0x110] sm:$0xff] %vm257_vm0, %v4693_v19 }
 0x183   : > { %1232 = vst.msk [vmem:[#allocation3 + $0x80] sm:$0xff] %vm1223_vm5, %v1144_v21 }
 0x184   : > { %1426 = vst.msk [vmem:[#allocation3 + $0x80] sm:$0xff] %vm1417_vm6, %v1338_v43  ;;  %1558 = vrot.lane.b32.xlu0 %v4461_v61, %s4692_s28 }
 0x185   : > { %980 = vrot.lane.b32.xlu1 %v4460_v63, %s4689_s21  ;;  %2186 = vst.msk [vmem:[#allocation2 + $0x120] sm:$0xff] %vm257_vm0, %v4693_v19  ;;  %2187 = vst.msk [vmem:[#allocation2 + $0x128] sm:$0xff] %vm257_vm0, %v4693_v19  ;;  %v4467_v63 = vld [vmem:[%s4738_s23 + $0x181] sm:$0xff] }
 0x186   : > { %v1531_v38 = vpop.permute.xlu0 %1530  ;;  %v1721_v46 = vld [vmem:[#allocation3 + $0x70] sm:$0xff]  ;;  %v953_v9 = vpop.permute.xlu1 %952  ;;  %2189 = vst.msk [vmem:[#allocation2 + $0x138] sm:$0xff] %vm257_vm0, %v4693_v19  ;;  %2190 = vst.msk [vmem:[#allocation2 + $0x140] sm:$0xff] %vm257_vm0, %v4693_v19 }
 0x187   : > { %1619 = vst.msk [vmem:[#allocation3 + $0x80] sm:$0xff] %vm1610_vm7, %v1531_v38  ;;  %1992 = vmatmul.mubr.f32.gmra.mrb[14].mxu0 %v1721_v46  ;;  %v4437_v38 = vld [vmem:[%s4738_s23 + $0x198] sm:$0xff] }
 0x188   : > { %1040 = vst.msk [vmem:[#allocation3 + $0x90] sm:$0xff] %vm1030_vm4, %v953_v9  ;;  %4512 = vmatprep.mubr.msk.f32.mxu0 %vm257_vm0, %v1724_v8  ;;  %1173 = vrot.lane.b32.xlu0 %v5517_v49, %s4690_s22  ;;  %v4463_v49 = vld [vmem:[%s4738_s23 + $0x151] sm:$0xff] }
 0x189   : > { %1367 = vrot.lane.b32.xlu1 %v4430_v27, %s4691_s27  ;;  %2192 = vst.msk [vmem:[#allocation2 + $0x150] sm:$0xff] %vm257_vm0, %v4693_v19  ;;  %2193 = vst.msk [vmem:[#allocation2 + $0x158] sm:$0xff] %vm257_vm0, %v4693_v19 }
 0x18a   : > { %v1146_v47 = vpop.permute.xlu0 %1145  ;;  %v1340_v10 = vpop.permute.xlu1 %1339  ;;  %2195 = vst.msk [vmem:[#allocation2 + $0x168] sm:$0xff] %vm257_vm0, %v4693_v19  ;;  %2196 = vst.msk [vmem:[#allocation2 + $0x170] sm:$0xff] %vm257_vm0, %v4693_v19 }
 0x18b   : > { %1233 = vst.msk [vmem:[#allocation3 + $0x90] sm:$0xff] %vm1223_vm5, %v1146_v47 }
 0x18c   : > { %1427 = vst.msk [vmem:[#allocation3 + $0x90] sm:$0xff] %vm1417_vm6, %v1340_v10  ;;  %1560 = vrot.lane.b32.xlu0 %v4462_v24, %s4692_s28 }
 0x18d   : > { %982 = vrot.lane.b32.xlu1 %v4461_v61, %s4689_s21  ;;  %2198 = vst.msk [vmem:[#allocation2 + $0x180] sm:$0xff] %vm257_vm0, %v4693_v19  ;;  %2199 = vst.msk [vmem:[#allocation2 + $0x188] sm:$0xff] %vm257_vm0, %v4693_v19  ;;  %v4468_v61 = vld [vmem:[%s4738_s23 + $0x189] sm:$0xff] }
 0x18e   : > { %v1533_v58 = vpop.permute.xlu0 %1532  ;;  %v1723_v28 = vld [vmem:[#allocation3 + $0x80] sm:$0xff]  ;;  %v955_v50 = vpop.permute.xlu1 %954  ;;  %2201 = vst.msk [vmem:[#allocation2 + $0x198] sm:$0xff] %vm257_vm0, %v4693_v19  ;;  %2202 = vst.msk [vmem:[#allocation2 + $0x1a0] sm:$0xff] %vm257_vm0, %v4693_v19 }
 0x18f   : > { %1620 = vst.msk [vmem:[#allocation3 + $0x90] sm:$0xff] %vm1610_vm7, %v1533_v58  ;;  %1997 = vmatmul.mubr.f32.gmra.mrb[16].mxu0 %v1723_v28  ;;  %v4470_v28 = vld [vmem:[%s4738_s23 + $0x1a1] sm:$0xff] }
 0x190   : > { %1041 = vst.msk [vmem:[#allocation3 + $0xa0] sm:$0xff] %vm1030_vm4, %v955_v50  ;;  %4513 = vmatprep.mubr.msk.f32.mxu0 %vm257_vm0, %v1726_v57  ;;  %1175 = vrot.lane.b32.xlu0 %v5523_v48, %s4690_s22  ;;  %v4464_v48 = vld [vmem:[%s4738_s23 + $0x159] sm:$0xff] }
 0x191   : > { %1369 = vrot.lane.b32.xlu1 %v4431_v11, %s4691_s27  ;;  %2155 = vst.msk [vmem:[#allocation2 + $0x28] sm:$0x3] %vm2151_vm8, %v4693_v19  ;;  %2152 = vst.msk [vmem:[#allocation2 + $0x10] sm:$0x3] %vm2151_vm8, %v4693_v19  ;;  %v4438_v57 = vld [vmem:[%s4738_s23 + $0x1a0] sm:$0xff] }
 0x192   : > { %v1148_v15 = vpop.permute.xlu0 %1147  ;;  %v1342_v51 = vpop.permute.xlu1 %1341  ;;  %2158 = vst.msk [vmem:[#allocation2 + $0x40] sm:$0x3] %vm2151_vm8, %v4693_v19  ;;  %2161 = vst.msk [vmem:[#allocation2 + $0x58] sm:$0x3] %vm2151_vm8, %v4693_v19  ;;  %v2301_v11 = vld [vmem:[#allocation2 + $0x1] sm:$0xff] }
 0x193   : > { %1234 = vst.msk [vmem:[#allocation3 + $0xa0] sm:$0xff] %vm1223_vm5, %v1148_v15 }
 0x194   : > { %1428 = vst.msk [vmem:[#allocation3 + $0xa0] sm:$0xff] %vm1417_vm6, %v1342_v51  ;;  %1562 = vrot.lane.b32.xlu0 %v4463_v49, %s4692_s28 }
 0x195   : > { %984 = vrot.lane.b32.xlu1 %v4462_v24, %s4689_s21  ;;  %2164 = vst.msk [vmem:[#allocation2 + $0x70] sm:$0x3] %vm2151_vm8, %v4693_v19  ;;  %2167 = vst.msk [vmem:[#allocation2 + $0x88] sm:$0x3] %vm2151_vm8, %v4693_v19  ;;  %v4469_v24 = vld [vmem:[%s4738_s23 + $0x199] sm:$0xff] }
 0x196   : > { %v1535_v1 = vpop.permute.xlu0 %1534  ;;  %v1725_v13 = vld [vmem:[#allocation3 + $0x90] sm:$0xff]  ;;  %v957_v56 = vpop.permute.xlu1 %956  ;;  %2170 = vst.msk [vmem:[#allocation2 + $0xa0] sm:$0x3] %vm2151_vm8, %v4693_v19  ;;  %2173 = vst.msk [vmem:[#allocation2 + $0xb8] sm:$0x3] %vm2151_vm8, %v4693_v19 }
 0x197   : > { %1621 = vst.msk [vmem:[#allocation3 + $0xa0] sm:$0xff] %vm1610_vm7, %v1535_v1  ;;  %2002 = vmatmul.mubr.f32.gmra.mrb[18].mxu0 %v1725_v13 }
 0x198   : > { %1042 = vst.msk [vmem:[#allocation3 + $0xb0] sm:$0xff] %vm1030_vm4, %v957_v56  ;;  %4514 = vmatprep.mubr.msk.f32.mxu0 %vm257_vm0, %v1728_v31  ;;  %1177 = vrot.lane.b32.xlu0 %v5531_v37, %s4690_s22  ;;  %v5689_v37 = vld [vmem:[%s4738_s23 + $0x169] sm:$0xff] }
 0x199   : > { %1371 = vrot.lane.b32.xlu1 %v4432_v40, %s4691_s27  ;;  %2176 = vst.msk [vmem:[#allocation2 + $0xd0] sm:$0x3] %vm2151_vm8, %v4693_v19  ;;  %2179 = vst.msk [vmem:[#allocation2 + $0xe8] sm:$0x3] %vm2151_vm8, %v4693_v19  ;;  %v2302_v15 = vld [vmem:[#allocation2 + $0x9] sm:$0xff] }
 0x19a   : > { %v1150_v54 = vpop.permute.xlu0 %1149  ;;  %v1344_v14 = vpop.permute.xlu1 %1343  ;;  %2182 = vst.msk [vmem:[#allocation2 + $0x100] sm:$0x3] %vm2151_vm8, %v4693_v19  ;;  %2185 = vst.msk [vmem:[#allocation2 + $0x118] sm:$0x3] %vm2151_vm8, %v4693_v19 }
 0x19b   : > { %1235 = vst.msk [vmem:[#allocation3 + $0xb0] sm:$0xff] %vm1223_vm5, %v1150_v54 }
 0x19c   : > { %1429 = vst.msk [vmem:[#allocation3 + $0xb0] sm:$0xff] %vm1417_vm6, %v1344_v14  ;;  %1564 = vrot.lane.b32.xlu0 %v4464_v48, %s4692_s28 }
 0x19d   : > { %986 = vrot.lane.b32.xlu1 %v4463_v49, %s4689_s21  ;;  %2188 = vst.msk [vmem:[#allocation2 + $0x130] sm:$0x3] %vm2151_vm8, %v4693_v19  ;;  %2191 = vst.msk [vmem:[#allocation2 + $0x148] sm:$0x3] %vm2151_vm8, %v4693_v19 }
 0x19e   : > { %v1537_v12 = vpop.permute.xlu0 %1536  ;;  %v1727_v41 = vld [vmem:[#allocation3 + $0xa0] sm:$0xff]  ;;  %v959_v18 = vpop.permute.xlu1 %958  ;;  %2194 = vst.msk [vmem:[#allocation2 + $0x160] sm:$0x3] %vm2151_vm8, %v4693_v19  ;;  %2197 = vst.msk [vmem:[#allocation2 + $0x178] sm:$0x3] %vm2151_vm8, %v4693_v19 }
 0x19f   : > { %1622 = vst.msk [vmem:[#allocation3 + $0xb0] sm:$0xff] %vm1610_vm7, %v1537_v12  ;;  %2007 = vmatmul.mubr.f32.gmra.mrb[20].mxu0 %v1727_v41 }
 0x1a0   : > { %1043 = vst.msk [vmem:[#allocation3 + $0xc0] sm:$0xff] %vm1030_vm4, %v959_v18  ;;  %4515 = vmatprep.mubr.msk.f32.mxu0 %vm257_vm0, %v1730_v32  ;;  %1179 = vrot.lane.b32.xlu0 %v5536_v25, %s4690_s22  ;;  %v1732_v25 = vld [vmem:[#allocation3 + $0xc8] sm:$0xff] }
 0x1a1   : > { %1373 = vrot.lane.b32.xlu1 %v4433_v55, %s4691_s27  ;;  %2200 = vst.msk [vmem:[#allocation2 + $0x190] sm:$0x3] %vm2151_vm8, %v4693_v19  ;;  %2203 = vst.msk [vmem:[#allocation2 + $0x1a8] sm:$0x3] %vm2151_vm8, %v4693_v19  ;;  %v1740_v19 = vld [vmem:[#allocation3 + $0x108] sm:$0xff] }
 0x1a2   : > { %v1152_v33 = vpop.permute.xlu0 %1151  ;;  %v1346_v17 = vpop.permute.xlu1 %1345  ;;  %1704 = vst.msk [vmem:[#allocation3 + $0x1d8] sm:$0xff] %vm257_vm0, %v5778_v44 }
 0x1a3   : > { %1236 = vst.msk [vmem:[#allocation3 + $0xc0] sm:$0xff] %vm1223_vm5, %v1152_v33 }
 0x1a4   : > { %1430 = vst.msk [vmem:[#allocation3 + $0xc0] sm:$0xff] %vm1417_vm6, %v1346_v17  ;;  %1566 = vrot.lane.b32.xlu0 %v5689_v37, %s4692_s28 }
 0x1a5   : > { %988 = vrot.lane.b32.xlu1 %v4464_v48, %s4689_s21 }
 0x1a6   : > { %v1539_v3 = vpop.permute.xlu0 %1538  ;;  %v1729_v60 = vld [vmem:[#allocation3 + $0xb0] sm:$0xff]  ;;  %v961_v59 = vpop.permute.xlu1 %960 }
 0x1a7   : > { %1623 = vst.msk [vmem:[#allocation3 + $0xc0] sm:$0xff] %vm1610_vm7, %v1539_v3  ;;  %2012 = vmatmul.mubr.f32.gmra.mrb[22].mxu0 %v1729_v60 }
 0x1a8   : > { %1044 = vst.msk [vmem:[#allocation3 + $0xd0] sm:$0xff] %vm1030_vm4, %v961_v59  ;;  %4516 = vmatprep.mubr.msk.f32.mxu0 %vm257_vm0, %v1732_v25  ;;  %1181 = vrot.lane.b32.xlu0 %v5542_v26, %s4690_s22  ;;  %v1734_v26 = vld [vmem:[#allocation3 + $0xd8] sm:$0xff] }
 0x1a9   : > { %1375 = vrot.lane.b32.xlu1 %v4434_v20, %s4691_s27  ;;  %v1742_v59 = vld [vmem:[#allocation3 + $0x118] sm:$0xff] }
 0x1aa   : > { %v1154_v34 = vpop.permute.xlu0 %1153  ;;  %v1348_v4 = vpop.permute.xlu1 %1347 }
 0x1ab   : > { %1237 = vst.msk [vmem:[#allocation3 + $0xd0] sm:$0xff] %vm1223_vm5, %v1154_v34 }
 0x1ac   : > { %1431 = vst.msk [vmem:[#allocation3 + $0xd0] sm:$0xff] %vm1417_vm6, %v1348_v4  ;;  %1568 = vrot.lane.b32.xlu0 %v4466_v16, %s4692_s28 }
 0x1ad   : > { %990 = vrot.lane.b32.xlu1 %v5689_v37, %s4689_s21 }
 0x1ae   : > { %v1541_v45 = vpop.permute.xlu0 %1540  ;;  %v1731_v22 = vld [vmem:[#allocation3 + $0xc0] sm:$0xff]  ;;  %v963_v29 = vpop.permute.xlu1 %962 }
 0x1af   : > { %1624 = vst.msk [vmem:[#allocation3 + $0xd0] sm:$0xff] %vm1610_vm7, %v1541_v45  ;;  %2017 = vmatmul.mubr.f32.gmra.mrb[24].mxu0 %v1731_v22 }
 0x1b0   : > { %1045 = vst.msk [vmem:[#allocation3 + $0xe0] sm:$0xff] %vm1030_vm4, %v963_v29  ;;  %4517 = vmatprep.mubr.msk.f32.mxu0 %vm257_vm0, %v1734_v26  ;;  %1183 = vrot.lane.b32.xlu0 %v5549_v39, %s4690_s22  ;;  %v4436_v39 = vld [vmem:[%s4738_s23 + $0x188] sm:$0xff] }
 0x1b1   : > { %1377 = vrot.lane.b32.xlu1 %v4435_v5, %s4691_s27 }
 0x1b2   : > { %v1156_v35 = vpop.permute.xlu0 %1155  ;;  %v1350_v0 = vpop.permute.xlu1 %1349 }
 0x1b3   : > { %1238 = vst.msk [vmem:[#allocation3 + $0xe0] sm:$0xff] %vm1223_vm5, %v1156_v35 }
 0x1b4   : > { %1432 = vst.msk [vmem:[#allocation3 + $0xe0] sm:$0xff] %vm1417_vm6, %v1350_v0  ;;  %799 = vrot.lane.b32.xlu0 %v4434_v20, %s4687_s26  ;;  %v1744_v0 = vld [vmem:[#allocation3 + $0x128] sm:$0xff] }
 0x1b5   : > { %1570 = vrot.lane.b32.xlu1 %v4467_v63, %s4692_s28 }
 0x1b6   : > { %v1543_v30 = vpop.permute.xlu0 %1542  ;;  %v1733_v36 = vld [vmem:[#allocation3 + $0xd0] sm:$0xff]  ;;  %v965_v6 = vpop.permute.xlu1 %964 }
 0x1b7   : > { %1625 = vst.msk [vmem:[#allocation3 + $0xe0] sm:$0xff] %vm1610_vm7, %v1543_v30  ;;  %2022 = vmatmul.mubr.f32.gmra.mrb[26].mxu0 %v1733_v36  ;;  %v1746_v36 = vld [vmem:[#allocation3 + $0x138] sm:$0xff] }
 0x1b8   : > { %1046 = vst.msk [vmem:[#allocation3 + $0xf0] sm:$0xff] %vm1030_vm4, %v965_v6  ;;  %4518 = vmatprep.mubr.msk.f32.mxu0 %vm257_vm0, %v1736_v23  ;;  %992 = vrot.lane.b32.xlu0 %v4466_v16, %s4689_s21 }
 0x1b9   : > { %1185 = vrot.lane.b32.xlu1 %v5561_v52, %s4690_s22 }
 0x1ba   : > { %v1158_v62 = vpop.permute.xlu0 %1157  ;;  %v1352_v42 = vpop.permute.xlu1 %1351 }
 0x1bb   : > { %1239 = vst.msk [vmem:[#allocation3 + $0xf0] sm:$0xff] %vm1223_vm5, %v1158_v62 }
 0x1bc   : > { %1433 = vst.msk [vmem:[#allocation3 + $0xf0] sm:$0xff] %vm1417_vm6, %v1352_v42  ;;  %1379 = vrot.lane.b32.xlu0 %v4436_v39, %s4691_s27 }
 0x1bd   : > { %801 = vrot.lane.b32.xlu1 %v4435_v5, %s4687_s26 }
 0x1be   : > { %v1545_v21 = vpop.permute.xlu0 %1544  ;;  %v1735_v43 = vld [vmem:[#allocation3 + $0xe0] sm:$0xff]  ;;  %v967_v8 = vpop.permute.xlu1 %966 }
 0x1bf   : > { %1626 = vst.msk [vmem:[#allocation3 + $0xf0] sm:$0xff] %vm1610_vm7, %v1545_v21  ;;  %2027 = vmatmul.mubr.f32.gmra.mrb[28].mxu0 %v1735_v43  ;;  %v1748_v43 = vld [vmem:[#allocation3 + $0x148] sm:$0xff] }
 0x1c0   : > { %1047 = vst.msk [vmem:[#allocation3 + $0x100] sm:$0xff] %vm1030_vm4, %v967_v8  ;;  %4519 = vmatprep.mubr.msk.f32.mxu0 %vm257_vm0, %v1738_v7  ;;  %1572 = vrot.lane.b32.xlu0 %v4468_v61, %s4692_s28 }
 0x1c1   : > { %994 = vrot.lane.b32.xlu1 %v4467_v63, %s4689_s21 }
 0x1c2   : > { %v1160_v52 = vpop.permute.xlu0 %1159 }
 0x1c3   : > { %1240 = vst.msk [vmem:[#allocation3 + $0x100] sm:$0xff] %vm1223_vm5, %v1160_v52  ;;  %v1354_v46 = vpop.permute.xlu1 %1353 }
 0x1c4   : > { %1187 = vrot.lane.b32.xlu0 %v5564_v53, %s4690_s22  ;;  %1434 = vst.msk [vmem:[#allocation3 + $0x100] sm:$0xff] %vm1417_vm6, %v1354_v46  ;;  %v2237_v46 = vld [vmem:[#allocation2] sm:$0xff] }
 0x1c5   : > { %1381 = vrot.lane.b32.xlu1 %v4437_v38, %s4691_s27  ;;  %2269 = vst.msk [vmem:[#allocation3] sm:$0xff] %vm257_vm0, %v2237_v46 }
 0x1c6   : > { %v1737_v9 = vld [vmem:[#allocation3 + $0xf0] sm:$0xff]  ;;  %v1547_v27 = vpop.permute.xlu0 %1546 }
 0x1c7   : > { %2032 = vmatmul.mubr.f32.gmra.mrb[30].mxu0 %v1737_v9  ;;  %1627 = vst.msk [vmem:[#allocation3 + $0x100] sm:$0xff] %vm1610_vm7, %v1547_v27  ;;  %v969_v47 = vpop.permute.xlu1 %968  ;;  %v1750_v9 = vld [vmem:[#allocation3 + $0x158] sm:$0xff] }
 0x1c8   : > { %803 = vrot.lane.b32.xlu0 %v4436_v39, %s4687_s26  ;;  %1048 = vst.msk [vmem:[#allocation3 + $0x110] sm:$0xff] %vm1030_vm4, %v969_v47  ;;  %4520 = vmatprep.mubr.msk.f32.mxu0 %vm257_vm0, %v1740_v19 }
 0x1c9   : > { %1574 = vrot.lane.b32.xlu1 %v4469_v24, %s4692_s28  ;;  %v5923_v24 = vld [vmem:[%s7185_s2] ss:$0 sm:$0xff] }
 0x1ca   : > { %v1162_v53 = vpop.permute.xlu0 %1161 }
 0x1cb   : > { %1241 = vst.msk [vmem:[#allocation3 + $0x110] sm:$0xff] %vm1223_vm5, %v1162_v53  ;;  %v1356_v10 = vpop.permute.xlu1 %1355 }
 0x1cc   : > { %996 = vrot.lane.b32.xlu0 %v4468_v61, %s4689_s21  ;;  %1435 = vst.msk [vmem:[#allocation3 + $0x110] sm:$0xff] %vm1417_vm6, %v1356_v10 }
 0x1cd   : > { %1189 = vrot.lane.b32.xlu1 %v5778_v44, %s4690_s22 }
 0x1ce   : > { %v1549_v58 = vpop.permute.xlu0 %1548  ;;  %v1739_v3 = vld [vmem:[#allocation3 + $0x100] sm:$0xff] }
 0x1cf   : > { %1628 = vst.msk [vmem:[#allocation3 + $0x110] sm:$0xff] %vm1610_vm7, %v1549_v58  ;;  %v971_v50 = vpop.permute.xlu1 %970  ;;  %2037 = vmatmul.mubr.f32.gmra.mrb[32].mxu0 %v1739_v3 }
 0x1d0   : > { %1383 = vrot.lane.b32.xlu0 %v4438_v57, %s4691_s27  ;;  %1049 = vst.msk [vmem:[#allocation3 + $0x120] sm:$0xff] %vm1030_vm4, %v971_v50  ;;  %4521 = vmatprep.mubr.msk.f32.mxu0 %vm257_vm0, %v1742_v59 }
 0x1d1   : > { %1576 = vrot.lane.b32.xlu1 %v4470_v28, %s4692_s28  ;;  %v2238_v28 = vld [vmem:[#allocation2 + $0x8] sm:$0xff] }
 0x1d2   : > { %v1164_v49 = vpop.permute.xlu0 %1163  ;;  %2270 = vst.msk [vmem:[#allocation3 + $0x10] sm:$0xff] %vm257_vm0, %v2238_v28 }
 0x1d3   : > { %1242 = vst.msk [vmem:[#allocation3 + $0x120] sm:$0xff] %vm1223_vm5, %v1164_v49  ;;  %v1358_v51 = vpop.permute.xlu1 %1357 }
 0x1d4   : > { %2365 = vrot.lane.b32.xlu0 %v2301_v11, %s4685_s24  ;;  %1436 = vst.msk [vmem:[#allocation3 + $0x120] sm:$0xff] %vm1417_vm6, %v1358_v51 }
 0x1d5   : > { %2367 = vrot.lane.b32.xlu1 %v2302_v15, %s4685_s24 }
 0x1d6   : > { %v1551_v31 = vpop.permute.xlu0 %1550  ;;  %v1741_v16 = vld [vmem:[#allocation3 + $0x110] sm:$0xff] }
 0x1d7   : > { %1629 = vst.msk [vmem:[#allocation3 + $0x120] sm:$0xff] %vm1610_vm7, %v1551_v31  ;;  %v973_v1 = vpop.permute.xlu1 %972  ;;  %2042 = vmatmul.mubr.f32.gmra.mrb[34].mxu0 %v1741_v16 }
 0x1d8   : > { %1050 = vst.msk [vmem:[#allocation3 + $0x130] sm:$0xff] %vm1030_vm4, %v973_v1  ;;  %4522 = vmatprep.mubr.msk.f32.mxu0 %vm257_vm0, %v1744_v0 }
 0x1da   : > { %v1166_v13 = vpop.permute.xlu0 %1165 }
 0x1db   : > { %1243 = vst.msk [vmem:[#allocation3 + $0x130] sm:$0xff] %vm1223_vm5, %v1166_v13  ;;  %v1360_v56 = vpop.permute.xlu1 %1359 }
 0x1dc   : > { %1437 = vst.msk [vmem:[#allocation3 + $0x130] sm:$0xff] %vm1417_vm6, %v1360_v56  ;;  %v1752_v56 = vld [vmem:[#allocation3 + $0x168] sm:$0xff] }
 0x1de   : > { %v1553_v40 = vpop.permute.xlu0 %1552  ;;  %v1743_v63 = vld [vmem:[#allocation3 + $0x120] sm:$0xff] }
 0x1df   : > { %1630 = vst.msk [vmem:[#allocation3 + $0x130] sm:$0xff] %vm1610_vm7, %v1553_v40  ;;  %v975_v48 = vpop.permute.xlu1 %974  ;;  %2047 = vmatmul.mubr.f32.gmra.mrb[36].mxu0 %v1743_v63 }
 0x1e0   : > { %1051 = vst.msk [vmem:[#allocation3 + $0x140] sm:$0xff] %vm1030_vm4, %v975_v48  ;;  %4523 = vmatprep.mubr.msk.f32.mxu0 %vm257_vm0, %v1746_v36 }
 0x1e2   : > { %v1168_v54 = vpop.permute.xlu0 %1167 }
 0x1e3   : > { %1244 = vst.msk [vmem:[#allocation3 + $0x140] sm:$0xff] %vm1223_vm5, %v1168_v54  ;;  %v1362_v14 = vpop.permute.xlu1 %1361 }
 0x1e4   : > { %1438 = vst.msk [vmem:[#allocation3 + $0x140] sm:$0xff] %vm1417_vm6, %v1362_v14 }
 0x1e6   : > { %v1555_v32 = vpop.permute.xlu0 %1554  ;;  %v1745_v6 = vld [vmem:[#allocation3 + $0x130] sm:$0xff] }
 0x1e7   : > { %1631 = vst.msk [vmem:[#allocation3 + $0x140] sm:$0xff] %vm1610_vm7, %v1555_v32  ;;  %v977_v12 = vpop.permute.xlu1 %976  ;;  %2052 = vmatmul.mubr.f32.gmra.mrb[38].mxu0 %v1745_v6 }
 0x1e8   : > { %1052 = vst.msk [vmem:[#allocation3 + $0x150] sm:$0xff] %vm1030_vm4, %v977_v12  ;;  %4524 = vmatprep.mubr.msk.f32.mxu0 %vm257_vm0, %v1748_v43 }
 0x1ea   : > { %v1170_v41 = vpop.permute.xlu0 %1169 }
 0x1eb   : > { %1245 = vst.msk [vmem:[#allocation3 + $0x150] sm:$0xff] %vm1223_vm5, %v1170_v41  ;;  %v1364_v18 = vpop.permute.xlu1 %1363  ;;  %v1754_v41 = vld [vmem:[#allocation3 + $0x178] sm:$0xff] }
 0x1ec   : > { %1439 = vst.msk [vmem:[#allocation3 + $0x150] sm:$0xff] %vm1417_vm6, %v1364_v18 }
 0x1ee   : > { %v1557_v55 = vpop.permute.xlu0 %1556  ;;  %v1747_v8 = vld [vmem:[#allocation3 + $0x140] sm:$0xff] }
 0x1ef   : > { %1632 = vst.msk [vmem:[#allocation3 + $0x150] sm:$0xff] %vm1610_vm7, %v1557_v55  ;;  %v979_v37 = vpop.permute.xlu1 %978  ;;  %2057 = vmatmul.mubr.f32.gmra.mrb[40].mxu0 %v1747_v8 }
 0x1f0   : > { %1053 = vst.msk [vmem:[#allocation3 + $0x160] sm:$0xff] %vm1030_vm4, %v979_v37  ;;  %4525 = vmatprep.mubr.msk.f32.mxu0 %vm257_vm0, %v1750_v9 }
 0x1f2   : > { %v1172_v33 = vpop.permute.xlu0 %1171 }
 0x1f3   : > { %1246 = vst.msk [vmem:[#allocation3 + $0x160] sm:$0xff] %vm1223_vm5, %v1172_v33  ;;  %v1366_v17 = vpop.permute.xlu1 %1365 }
 0x1f4   : > { %1440 = vst.msk [vmem:[#allocation3 + $0x160] sm:$0xff] %vm1417_vm6, %v1366_v17 }
 0x1f6   : > { %v1559_v25 = vpop.permute.xlu0 %1558  ;;  %v1749_v27 = vld [vmem:[#allocation3 + $0x150] sm:$0xff] }
 0x1f7   : > { %1633 = vst.msk [vmem:[#allocation3 + $0x160] sm:$0xff] %vm1610_vm7, %v1559_v25  ;;  %v981_v60 = vpop.permute.xlu1 %980  ;;  %2062 = vmatmul.mubr.f32.gmra.mrb[42].mxu0 %v1749_v27 }
 0x1f8   : > { %1054 = vst.msk [vmem:[#allocation3 + $0x170] sm:$0xff] %vm1030_vm4, %v981_v60  ;;  %4526 = vmatprep.mubr.msk.f32.mxu0 %vm257_vm0, %v1752_v56 }
 0x1fa   : > { %v1174_v20 = vpop.permute.xlu0 %1173 }
 0x1fb   : > { %1247 = vst.msk [vmem:[#allocation3 + $0x170] sm:$0xff] %vm1223_vm5, %v1174_v20  ;;  %v1368_v34 = vpop.permute.xlu1 %1367 }
 0x1fc   : > { %1441 = vst.msk [vmem:[#allocation3 + $0x170] sm:$0xff] %vm1417_vm6, %v1368_v34 }
 0x1fe   : > { %v1561_v4 = vpop.permute.xlu0 %1560  ;;  %v1751_v40 = vld [vmem:[#allocation3 + $0x160] sm:$0xff] }
 0x1ff   : > { %1634 = vst.msk [vmem:[#allocation3 + $0x170] sm:$0xff] %vm1610_vm7, %v1561_v4  ;;  %v983_v44 = vpop.permute.xlu1 %982  ;;  %2067 = vmatmul.mubr.f32.gmra.mrb[44].mxu0 %v1751_v40 }
 0x200   : > { %1055 = vst.msk [vmem:[#allocation3 + $0x180] sm:$0xff] %vm1030_vm4, %v983_v44  ;;  %4527 = vmatprep.mubr.msk.f32.mxu0 %vm257_vm0, %v1754_v41  ;;  %v1764_v41 = vld [vmem:[#allocation3 + $0x1c8] sm:$0xff] }
 0x202   : > { %v1176_v26 = vpop.permute.xlu0 %1175 }
 0x203   : > { %1248 = vst.msk [vmem:[#allocation3 + $0x180] sm:$0xff] %vm1223_vm5, %v1176_v26  ;;  %v1370_v45 = vpop.permute.xlu1 %1369 }
 0x204   : > { %1442 = vst.msk [vmem:[#allocation3 + $0x180] sm:$0xff] %vm1417_vm6, %v1370_v45  ;;  %v1756_v45 = vld [vmem:[#allocation3 + $0x188] sm:$0xff] }
 0x206   : > { %v1563_v22 = vpop.permute.xlu0 %1562  ;;  %v1753_v18 = vld [vmem:[#allocation3 + $0x170] sm:$0xff] }
 0x207   : > { %1635 = vst.msk [vmem:[#allocation3 + $0x180] sm:$0xff] %vm1610_vm7, %v1563_v22  ;;  %v985_v29 = vpop.permute.xlu1 %984  ;;  %2072 = vmatmul.mubr.f32.gmra.mrb[46].mxu0 %v1753_v18 }
 0x208   : > { %1056 = vst.msk [vmem:[#allocation3 + $0x190] sm:$0xff] %vm1030_vm4, %v985_v29  ;;  %4528 = vmatprep.mubr.msk.f32.mxu0 %vm257_vm0, %v1756_v45  ;;  %v4501_v45 = vld [vmem:[%s4738_s23 + $0x19a] sm:$0xff] }
 0x209   : > { %1705 = vst.msk [vmem:[#allocation3 + $0x1e8] sm:$0xff] %vm257_vm0, %v4501_v45  ;;  %v3775_v45 = vld [vmem:[%s7186_s3 + $0x8] sm:$0xff] }
 0x20a   : > { %v1178_v5 = vpop.permute.xlu0 %1177 }
 0x20b   : > { %1249 = vst.msk [vmem:[#allocation3 + $0x190] sm:$0xff] %vm1223_vm5, %v1178_v5  ;;  %v1372_v35 = vpop.permute.xlu1 %1371 }
 0x20c   : > { %1443 = vst.msk [vmem:[#allocation3 + $0x190] sm:$0xff] %vm1417_vm6, %v1372_v35 }
 0x20e   : > { %v1565_v23 = vpop.permute.xlu0 %1564  ;;  %v1755_v22 = vld [vmem:[#allocation3 + $0x180] sm:$0xff] }
 0x20f   : > { %1636 = vst.msk [vmem:[#allocation3 + $0x190] sm:$0xff] %vm1610_vm7, %v1565_v23  ;;  %v987_v30 = vpop.permute.xlu1 %986  ;;  %2077 = vmatmul.mubr.f32.gmra.mrb[48].mxu0 %v1755_v22  ;;  %v1758_v23 = vld [vmem:[#allocation3 + $0x198] sm:$0xff] }
 0x210   : > { %1057 = vst.msk [vmem:[#allocation3 + $0x1a0] sm:$0xff] %vm1030_vm4, %v987_v30  ;;  %4529 = vmatprep.mubr.msk.f32.mxu0 %vm257_vm0, %v1758_v23  ;;  %v4502_v23 = vld [vmem:[%s4738_s23 + $0x1a2] sm:$0xff] }
 0x211   : > { %1706 = vst.msk [vmem:[#allocation3 + $0x1f8] sm:$0xff] %vm257_vm0, %v4502_v23  ;;  %v3776_v23 = vld [vmem:[%s7186_s3 + $0x10] sm:$0xff] }
 0x212   : > { %v1180_v39 = vpop.permute.xlu0 %1179 }
 0x213   : > { %1250 = vst.msk [vmem:[#allocation3 + $0x1a0] sm:$0xff] %vm1223_vm5, %v1180_v39  ;;  %v1374_v62 = vpop.permute.xlu1 %1373 }
 0x214   : > { %1444 = vst.msk [vmem:[#allocation3 + $0x1a0] sm:$0xff] %vm1417_vm6, %v1374_v62 }
 0x216   : > { %v1567_v42 = vpop.permute.xlu0 %1566  ;;  %v1757_v30 = vld [vmem:[#allocation3 + $0x190] sm:$0xff] }
 0x217   : > { %1637 = vst.msk [vmem:[#allocation3 + $0x1a0] sm:$0xff] %vm1610_vm7, %v1567_v42  ;;  %v989_v7 = vpop.permute.xlu1 %988  ;;  %2082 = vmatmul.mubr.f32.gmra.mrb[50].mxu0 %v1757_v30 }
 0x218   : > { %1058 = vst.msk [vmem:[#allocation3 + $0x1b0] sm:$0xff] %vm1030_vm4, %v989_v7 }
 0x21a   : > { %v1182_v61 = vpop.permute.xlu0 %1181 }
 0x21b   : > { %1251 = vst.msk [vmem:[#allocation3 + $0x1b0] sm:$0xff] %vm1223_vm5, %v1182_v61  ;;  %v1376_v21 = vpop.permute.xlu1 %1375 }
 0x21c   : > { %1445 = vst.msk [vmem:[#allocation3 + $0x1b0] sm:$0xff] %vm1417_vm6, %v1376_v21 }
 0x21e   : > { %v1569_v52 = vpop.permute.xlu0 %1568 }
 0x21f   : > { %1638 = vst.msk [vmem:[#allocation3 + $0x1b0] sm:$0xff] %vm1610_vm7, %v1569_v52  ;;  %v991_v38 = vpop.permute.xlu1 %990 }
 0x220   : > { %1059 = vst.msk [vmem:[#allocation3 + $0x1c0] sm:$0xff] %vm1030_vm4, %v991_v38 }
 0x222   : > { %v1958_v47 = vpop.f32.mrb[0].mxu0  ;;  %v1184_v53 = vpop.permute.xlu0 %1183 }
 0x223   : > { %v1959_v10 = vadd.f32 %v5923_v24, %v1958_v47  ;;  %v1960_v57 = vpop.f32.mrb[1].mxu0  ;;  %1252 = vst.msk [vmem:[#allocation3 + $0x1c0] sm:$0xff] %vm1223_vm5, %v1184_v53  ;;  %v1378_v58 = vpop.permute.xlu1 %1377  ;;  %v1760_v47 = vld [vmem:[#allocation3 + $0x1a8] sm:$0xff]  ;;  %v1759_v53 = vld [vmem:[#allocation3 + $0x1a0] sm:$0xff] }
 0x224   : > { %1446 = vst.msk [vmem:[#allocation3 + $0x1c0] sm:$0xff] %vm1417_vm6, %v1378_v58  ;;  %4530 = vmatprep.mubr.msk.f32.mxu0 %vm257_vm0, %v1760_v47 }
 0x225   : > { %v2117_v50 = vmax.f32 %v1959_v10, 0.0  ;;  %2087 = vmatmul.mubr.f32.gmra.mrb[52].mxu0 %v1759_v53 }
 0x226   : > { %v800_v11 = vpop.permute.xlu0 %799 }
 0x227   : > { %2205 = vst.msk [vmem:[#allocation2 + $0x19] sm:$0xff] %vm257_vm0, %v2117_v50  ;;  %v1571_v49 = vpop.permute.xlu1 %1570  ;;  %v1762_v50 = vld [vmem:[#allocation3 + $0x1b8] sm:$0xff] }
 0x228   : > { %867 = vst.msk [vmem:[#allocation3 + $0x1d0] sm:$0xff] %vm837_vm3, %v800_v11  ;;  %v1761_v11 = vld [vmem:[#allocation3 + $0x1b0] sm:$0xff]  ;;  %4531 = vmatprep.mubr.msk.f32.mxu0 %vm257_vm0, %v1762_v50 }
 0x229   : > { %1639 = vst.msk [vmem:[#allocation3 + $0x1c0] sm:$0xff] %vm1610_vm7, %v1571_v49  ;;  %2092 = vmatmul.mubr.f32.gmra.mrb[54].mxu0 %v1761_v11 }
 0x22a   : > { %v1963_v15 = vpop.f32.mrb[2].mxu0  ;;  %v993_v51 = vpop.permute.xlu0 %992  ;;  %4532 = vmatprep.mubr.msk.f32.mxu0 %vm257_vm0, %v1764_v41 }
 0x22b   : > { %v1964_v31 = vadd.f32 %v5923_v24, %v1963_v15  ;;  %v1965_v1 = vpop.f32.mrb[3].mxu0  ;;  %1060 = vst.msk [vmem:[#allocation3 + $0x1d0] sm:$0xff] %vm1030_vm4, %v993_v51  ;;  %v1186_v13 = vpop.permute.xlu1 %1185 }
 0x22c   : > { %1253 = vst.msk [vmem:[#allocation3 + $0x1d0] sm:$0xff] %vm1223_vm5, %v1186_v13 }
 0x22d   : > { %v2118_v48 = vmax.f32 %v1964_v31, 0.0 }
 0x22e   : > { %v5939_v54 = vld [vmem:[#allocation2 + $0x19] sm:$0xff]  ;;  %v1380_v14 = vpop.permute.xlu0 %1379 }
 0x22f   : > { %v5941_v32 = vld [vmem:[#allocation2 + $0x18] sm:$0xff]  ;;  %2206 = vst.msk [vmem:[#allocation2 + $0x21] sm:$0xff] %vm257_vm0, %v2118_v48  ;;  %2369 = vrot.lane.b32.xlu0 %v5939_v54, %s4685_s24  ;;  %v802_v12 = vpop.permute.xlu1 %801 }
 0x230   : > { %1447 = vst.msk [vmem:[#allocation3 + $0x1d0] sm:$0xff] %vm1417_vm6, %v1380_v14  ;;  %v1763_v18 = vld [vmem:[#allocation3 + $0x1c0] sm:$0xff] }
 0x231   : > { %2271 = vst.msk [vmem:[#allocation3 + $0x20] sm:$0xff] %vm257_vm0, %v5941_v32  ;;  %2097 = vmatmul.mubr.f32.gmra.mrb[56].mxu0 %v1763_v18 }
 0x232   : > { %868 = vst.msk [vmem:[#allocation3 + $0x1e0] sm:$0xff] %vm837_vm3, %v802_v12  ;;  %v1968_v55 = vpop.f32.mrb[4].mxu0  ;;  %v1573_v37 = vpop.permute.xlu0 %1572 }
 0x233   : > { %v1969_v33 = vadd.f32 %v5923_v24, %v1968_v55  ;;  %v1970_v17 = vpop.f32.mrb[5].mxu0  ;;  %1640 = vst.msk [vmem:[#allocation3 + $0x1d0] sm:$0xff] %vm1610_vm7, %v1573_v37  ;;  %v995_v19 = vpop.permute.xlu1 %994 }
 0x234   : > { %1061 = vst.msk [vmem:[#allocation3 + $0x1e0] sm:$0xff] %vm1030_vm4, %v995_v19  ;;  %v1766_v17 = vld [vmem:[#allocation3 + $0x1d8] sm:$0xff] }
 0x235   : > { %v2119_v25 = vmax.f32 %v1969_v33, 0.0  ;;  %4533 = vmatprep.mubr.msk.f32.mxu0 %vm257_vm0, %v1766_v17 }
 0x236   : > { %v5954_v3 = vld [vmem:[#allocation2 + $0x21] sm:$0xff]  ;;  %v1188_v60 = vpop.permute.xlu0 %1187 }
 0x237   : > { %v5956_v59 = vld [vmem:[#allocation2 + $0x20] sm:$0xff]  ;;  %2207 = vst.msk [vmem:[#allocation2 + $0x31] sm:$0xff] %vm257_vm0, %v2119_v25  ;;  %2371 = vrot.lane.b32.xlu1 %v5954_v3, %s4685_s24  ;;  %v1382_v20 = vpop.permute.xlu1 %1381 }
 0x238   : > { %1254 = vst.msk [vmem:[#allocation3 + $0x1e0] sm:$0xff] %vm1223_vm5, %v1188_v60 }
 0x239   : > { %2272 = vst.msk [vmem:[#allocation3 + $0x30] sm:$0xff] %vm257_vm0, %v5956_v59 }
 0x23a   : > { %1448 = vst.msk [vmem:[#allocation3 + $0x1e0] sm:$0xff] %vm1417_vm6, %v1382_v20  ;;  %v1973_v16 = vpop.f32.mrb[6].mxu0  ;;  %v804_v34 = vpop.permute.xlu0 %803  ;;  %v1765_v25 = vld [vmem:[#allocation3 + $0x1d0] sm:$0xff] }
 0x23b   : > { %v1974_v4 = vadd.f32 %v5923_v24, %v1973_v16  ;;  %v1975_v44 = vpop.f32.mrb[7].mxu0  ;;  %869 = vst.msk [vmem:[#allocation3 + $0x1f0] sm:$0xff] %vm837_vm3, %v804_v34  ;;  %v1575_v26 = vpop.permute.xlu1 %1574  ;;  %2102 = vmatmul.mubr.f32.gmra.mrb[58].mxu0 %v1765_v25 }
 0x23c   : > { %1641 = vst.msk [vmem:[#allocation3 + $0x1e0] sm:$0xff] %vm1610_vm7, %v1575_v26 }
 0x23d   : > { %v2120_v29 = vmax.f32 %v1974_v4, 0.0 }
 0x23e   : > { %v5969_v5 = vld [vmem:[#allocation2 + $0x31] sm:$0xff]  ;;  %v997_v35 = vpop.permute.xlu0 %996 }
 0x23f   : > { %v5971_v0 = vld [vmem:[#allocation2 + $0x30] sm:$0xff]  ;;  %2208 = vst.msk [vmem:[#allocation2 + $0x39] sm:$0xff] %vm257_vm0, %v2120_v29  ;;  %2373 = vrot.lane.b32.xlu0 %v5969_v5, %s4685_s24  ;;  %v1190_v63 = vpop.permute.xlu1 %1189 }
 0x240   : > { %1062 = vst.msk [vmem:[#allocation3 + $0x1f0] sm:$0xff] %vm1030_vm4, %v997_v35 }
 0x241   : > { %2273 = vst.msk [vmem:[#allocation3 + $0x40] sm:$0xff] %vm257_vm0, %v5971_v0 }
 0x242   : > { %1255 = vst.msk [vmem:[#allocation3 + $0x1f0] sm:$0xff] %vm1223_vm5, %v1190_v63  ;;  %v1978_v36 = vpop.f32.mrb[8].mxu0  ;;  %v1384_v6 = vpop.permute.xlu0 %1383 }
 0x243   : > { %v1979_v39 = vadd.f32 %v5923_v24, %v1978_v36  ;;  %v1980_v62 = vpop.f32.mrb[9].mxu0  ;;  %1449 = vst.msk [vmem:[#allocation3 + $0x1f0] sm:$0xff] %vm1417_vm6, %v1384_v6  ;;  %v1577_v42 = vpop.permute.xlu1 %1576  ;;  %v3676_v6 = vld [vmem:[#allocation2 + $0x19a] sm:$0xff] }
 0x244   : > { %1642 = vst.msk [vmem:[#allocation3 + $0x1f0] sm:$0xff] %vm1610_vm7, %v1577_v42  ;;  %v1767_v42 = vld [vmem:[#allocation3 + $0x1e0] sm:$0xff] }
 0x245   : > { %v2121_v7 = vmax.f32 %v1979_v39, 0.0  ;;  %v1768_v39 = vld [vmem:[#allocation3 + $0x1e8] sm:$0xff] }
 0x246   : > { %v5984_v61 = vld [vmem:[#allocation2 + $0x39] sm:$0xff]  ;;  %v2366_v43 = vpop.permute.xlu0 %2365  ;;  %4534 = vmatprep.mubr.msk.f32.mxu0 %vm257_vm0, %v1768_v39  ;;  %3708 = vst.msk [vmem:[#allocation3 + $0x1e8] sm:$0xff] %vm257_vm0, %v3676_v6 }
 0x247   : > { %v5986_v21 = vld [vmem:[#allocation2 + $0x32] sm:$0xff]  ;;  %2209 = vst.msk [vmem:[#allocation2 + $0x49] sm:$0xff] %vm257_vm0, %v2121_v7  ;;  %2375 = vrot.lane.b32.xlu1 %v5984_v61, %s4685_s24  ;;  %v2368_v52 = vpop.permute.xlu1 %2367  ;;  %v5998_v38 = vld [vmem:[#allocation2 + $0x3a] sm:$0xff]  ;;  %2107 = vmatmul.mubr.f32.gmra.mrb[60].mxu0 %v1767_v42 }
 0x248   : > { %v5988_v8 = vld [vmem:[#allocation2 + $0x38] sm:$0xff]  ;;  %3678 = vst.msk [vmem:[#allocation3 + $0x8] sm:$0xff] %vm257_vm0, %v5986_v21  ;;  %3679 = vst.msk [vmem:[#allocation3 + $0x18] sm:$0xff] %vm257_vm0, %v5998_v38 }
 0x249   : > { %2461 = vst.msk [vmem:[#allocation3] sm:$0xff] %vm450_vm1, %v2366_v43  ;;  %2462 = vst.msk [vmem:[#allocation3 + $0x10] sm:$0xff] %vm450_vm1, %v2368_v52  ;;  %v3677_v52 = vld [vmem:[#allocation2 + $0x1a2] sm:$0xff]  ;;  %v3777_v6 = vld [vmem:[%s7186_s3 + $0x18] sm:$0xff] }
 0x24a   : > { %2274 = vst.msk [vmem:[#allocation3 + $0x50] sm:$0xff] %vm257_vm0, %v5988_v8  ;;  %v1983_v46 = vpop.f32.mrb[10].mxu0 }
 0x24b   : > { %v1984_v9 = vadd.f32 %v5923_v24, %v1983_v46  ;;  %v1985_v27 = vpop.f32.mrb[11].mxu0  ;;  %v1769_v46 = vld [vmem:[#allocation3 + $0x1f0] sm:$0xff] }
 0x24c   : > { %v1770_v27 = vld [vmem:[#allocation3 + $0x1f8] sm:$0xff] }
 0x24d   : > { %v2122_v10 = vmax.f32 %v1984_v9, 0.0  ;;  %4535 = vmatprep.mubr.msk.f32.mxu0 %vm257_vm0, %v1770_v27  ;;  %3709 = vst.msk [vmem:[#allocation3 + $0x1f8] sm:$0xff] %vm257_vm0, %v3677_v52  ;;  %v3778_v52 = vld [vmem:[%s7186_s3 + $0x20] sm:$0xff] }
 0x24e   : > { %v6005_v58 = vld [vmem:[#allocation2 + $0x49] sm:$0xff]  ;;  %2112 = vmatmul.mubr.f32.gmra.mrb[62].mxu0 %v1769_v46 }
 0x24f   : > { %v3711_v57 = vld [vmem:[#allocation3 + $0x8] sm:$0xff]  ;;  %v6007_v28 = vld [vmem:[#allocation2 + $0x48] sm:$0xff]  ;;  %2210 = vst.msk [vmem:[#allocation2 + $0x51] sm:$0xff] %vm257_vm0, %v2122_v10  ;;  %2377 = vrot.lane.b32.xlu0 %v6005_v58, %s4685_s24 }
 0x250   : > { %4537 = vmatprep.mubr.msk.f32.mxu1 %vm257_vm0, %v3711_v57  ;;  %2275 = vst.msk [vmem:[#allocation3 + $0x60] sm:$0xff] %vm257_vm0, %v6007_v28  ;;  %v3779_v46 = vld [vmem:[%s7186_s3 + $0x28] sm:$0xff] }
 0x252   : > { %v1988_v49 = vpop.f32.mrb[12].mxu0 }
 0x253   : > { %v1989_v15 = vadd.f32 %v5923_v24, %v1988_v49  ;;  %v1990_v51 = vpop.f32.mrb[13].mxu0 }
 0x255   : > { %v2123_v31 = vmax.f32 %v1989_v15, 0.0 }
 0x256   : > { %v6017_v1 = vld [vmem:[#allocation2 + $0x51] sm:$0xff] }
 0x257   : > { %v6019_v13 = vld [vmem:[#allocation2 + $0x50] sm:$0xff]  ;;  %2211 = vst.msk [vmem:[#allocation2 + $0x61] sm:$0xff] %vm257_vm0, %v2123_v31  ;;  %2379 = vrot.lane.b32.xlu1 %v6017_v1, %s4685_s24 }
 0x258   : > { %v6021_v56 = vld [vmem:[#allocation2 + $0x4a] sm:$0xff]  ;;  %2276 = vst.msk [vmem:[#allocation3 + $0x70] sm:$0xff] %vm257_vm0, %v6019_v13  ;;  %v6028_v40 = vld [vmem:[#allocation2 + $0x52] sm:$0xff] }
 0x259   : > { %3680 = vst.msk [vmem:[#allocation3 + $0x28] sm:$0xff] %vm257_vm0, %v6021_v56  ;;  %3681 = vst.msk [vmem:[#allocation3 + $0x38] sm:$0xff] %vm257_vm0, %v6028_v40 }
 0x25a   : > { %v1993_v48 = vpop.f32.mrb[14].mxu0 }
 0x25b   : > { %v1994_v14 = vadd.f32 %v5923_v24, %v1993_v48  ;;  %v1995_v12 = vpop.f32.mrb[15].mxu0 }
 0x25d   : > { %v2124_v55 = vmax.f32 %v1994_v14, 0.0 }
 0x25e   : > { %v6036_v37 = vld [vmem:[#allocation2 + $0x61] sm:$0xff] }
 0x25f   : > { %v6038_v33 = vld [vmem:[#allocation2 + $0x60] sm:$0xff]  ;;  %2212 = vst.msk [vmem:[#allocation2 + $0x69] sm:$0xff] %vm257_vm0, %v2124_v55  ;;  %2381 = vrot.lane.b32.xlu0 %v6036_v37, %s4685_s24 }
 0x260   : > { %2277 = vst.msk [vmem:[#allocation3 + $0x80] sm:$0xff] %vm257_vm0, %v6038_v33 }
 0x262   : > { %v1998_v19 = vpop.f32.mrb[16].mxu0 }
 0x263   : > { %v1999_v60 = vadd.f32 %v5923_v24, %v1998_v19  ;;  %v2000_v20 = vpop.f32.mrb[17].mxu0 }
 0x265   : > { %v2125_v16 = vmax.f32 %v1999_v60, 0.0 }
 0x266   : > { %v6047_v34 = vld [vmem:[#allocation2 + $0x69] sm:$0xff] }
 0x267   : > { %v6049_v4 = vld [vmem:[#allocation2 + $0x68] sm:$0xff]  ;;  %2213 = vst.msk [vmem:[#allocation2 + $0x79] sm:$0xff] %vm257_vm0, %v2125_v16  ;;  %2383 = vrot.lane.b32.xlu1 %v6047_v34, %s4685_s24  ;;  %v3774_v16 = vld [vmem:[%s7186_s3] sm:$0xff] }
 0x268   : > { %v6051_v44 = vld [vmem:[#allocation2 + $0x62] sm:$0xff]  ;;  %2278 = vst.msk [vmem:[#allocation3 + $0x90] sm:$0xff] %vm257_vm0, %v6049_v4  ;;  %v6058_v26 = vld [vmem:[#allocation2 + $0x6a] sm:$0xff] }
 0x269   : > { %3682 = vst.msk [vmem:[#allocation3 + $0x48] sm:$0xff] %vm257_vm0, %v6051_v44  ;;  %3683 = vst.msk [vmem:[#allocation3 + $0x58] sm:$0xff] %vm257_vm0, %v6058_v26 }
 0x26a   : > { %v2003_v22 = vpop.f32.mrb[18].mxu0 }
 0x26b   : > { %v2004_v29 = vadd.f32 %v5923_v24, %v2003_v22  ;;  %v2005_v35 = vpop.f32.mrb[19].mxu0  ;;  %v4632_v22 = vpack.c.bf16 %v3775_v45, %v3774_v16  ;;  %v3783_v16 = vld [vmem:[%s7186_s3 + $0x48] sm:$0xff] }
 0x26d   : > { %v2126_v63 = vmax.f32 %v2004_v29, 0.0  ;;  %4633 = vmatpush1.bf16.msra.mxu1 %v4632_v22 }
 0x26e   : > { %v6068_v30 = vld [vmem:[#allocation2 + $0x79] sm:$0xff]  ;;  %4634 = vmatprep.subr.bf16.mxu1 %v4688_v2 }
 0x26f   : > { %v6070_v36 = vld [vmem:[#allocation2 + $0x78] sm:$0xff]  ;;  %2214 = vst.msk [vmem:[#allocation2 + $0x81] sm:$0xff] %vm257_vm0, %v2126_v63  ;;  %2385 = vrot.lane.b32.xlu0 %v6068_v30, %s4685_s24 }
 0x270   : > { %2279 = vst.msk [vmem:[#allocation3 + $0xa0] sm:$0xff] %vm257_vm0, %v6070_v36 }
 0x272   : > { %v2008_v62 = vpop.f32.mrb[20].mxu0 }
 0x273   : > { %v2009_v7 = vadd.f32 %v5923_v24, %v2008_v62  ;;  %v2010_v43 = vpop.f32.mrb[21].mxu0  ;;  %v4635_v62 = vpack.c.bf16 %v3777_v6, %v3776_v23  ;;  %v2493_v23 = vld [vmem:[#allocation2 + $0x2] sm:$0xff] }
 0x275   : > { %v2127_v9 = vmax.f32 %v2009_v7, 0.0  ;;  %4636 = vmatpush1.bf16.msra.mxu1 %v4635_v62  ;;  %v3785_v62 = vld [vmem:[%s7186_s3 + $0x58] sm:$0xff] }
 0x276   : > { %v6081_v47 = vld [vmem:[#allocation2 + $0x81] sm:$0xff]  ;;  %4637 = vmatprep.subr.bf16.mxu1 %v4688_v2 }
 0x277   : > { %v6083_v53 = vld [vmem:[#allocation2 + $0x80] sm:$0xff]  ;;  %2215 = vst.msk [vmem:[#allocation2 + $0x91] sm:$0xff] %vm257_vm0, %v2127_v9  ;;  %2387 = vrot.lane.b32.xlu1 %v6081_v47, %s4685_s24 }
 0x278   : > { %v6087_v10 = vld [vmem:[#allocation2 + $0x7a] sm:$0xff]  ;;  %2280 = vst.msk [vmem:[#allocation3 + $0xb0] sm:$0xff] %vm257_vm0, %v6083_v53  ;;  %v6094_v57 = vld [vmem:[#allocation2 + $0x82] sm:$0xff] }
 0x279   : > { %3684 = vst.msk [vmem:[#allocation3 + $0x68] sm:$0xff] %vm257_vm0, %v6087_v10  ;;  %3685 = vst.msk [vmem:[#allocation3 + $0x78] sm:$0xff] %vm257_vm0, %v6094_v57 }
 0x27a   : > { %v2013_v50 = vpop.f32.mrb[22].mxu0 }
 0x27b   : > { %v2014_v11 = vadd.f32 %v5923_v24, %v2013_v50  ;;  %v2015_v49 = vpop.f32.mrb[23].mxu0  ;;  %v4638_v50 = vpack.c.bf16 %v3779_v46, %v3778_v52 }
 0x27d   : > { %v2128_v15 = vmax.f32 %v2014_v11, 0.0  ;;  %4639 = vmatpush1.bf16.msra.mxu1 %v4638_v50 }
 0x27e   : > { %v6101_v51 = vld [vmem:[#allocation2 + $0x91] sm:$0xff]  ;;  %4640 = vmatprep.subr.bf16.mxu1 %v4688_v2 }
 0x27f   : > { %v6103_v31 = vld [vmem:[#allocation2 + $0x90] sm:$0xff]  ;;  %2216 = vst.msk [vmem:[#allocation2 + $0x99] sm:$0xff] %vm257_vm0, %v2128_v15  ;;  %2389 = vrot.lane.b32.xlu0 %v6101_v51, %s4685_s24 }
 0x280   : > { %2281 = vst.msk [vmem:[#allocation3 + $0xc0] sm:$0xff] %vm257_vm0, %v6103_v31  ;;  %v3780_v15 = vld [vmem:[%s7186_s3 + $0x30] sm:$0xff] }
 0x282   : > { %v2018_v48 = vpop.f32.mrb[24].mxu0 }
 0x283   : > { %v2019_v14 = vadd.f32 %v5923_v24, %v2018_v48  ;;  %v2020_v12 = vpop.f32.mrb[25].mxu0  ;;  %v3781_v48 = vld [vmem:[%s7186_s3 + $0x38] sm:$0xff] }
 0x284   : > { %v4641_v12 = vpack.c.bf16 %v3781_v48, %v3780_v15 }
 0x285   : > { %v2129_v41 = vmax.f32 %v2019_v14, 0.0 }
 0x286   : > { %v6111_v18 = vld [vmem:[#allocation2 + $0x99] sm:$0xff]  ;;  %4642 = vmatpush1.bf16.msra.mxu1 %v4641_v12 }
 0x287   : > { %v6113_v55 = vld [vmem:[#allocation2 + $0x98] sm:$0xff]  ;;  %2217 = vst.msk [vmem:[#allocation2 + $0xa9] sm:$0xff] %vm257_vm0, %v2129_v41  ;;  %2391 = vrot.lane.b32.xlu1 %v6111_v18, %s4685_s24  ;;  %4643 = vmatprep.subr.bf16.mxu1 %v4688_v2 }
 0x288   : > { %v6115_v17 = vld [vmem:[#allocation2 + $0x92] sm:$0xff]  ;;  %2282 = vst.msk [vmem:[#allocation3 + $0xd0] sm:$0xff] %vm257_vm0, %v6113_v55  ;;  %v6122_v19 = vld [vmem:[#allocation2 + $0x9a] sm:$0xff] }
 0x289   : > { %3686 = vst.msk [vmem:[#allocation3 + $0x88] sm:$0xff] %vm257_vm0, %v6115_v17  ;;  %3687 = vst.msk [vmem:[#allocation3 + $0x98] sm:$0xff] %vm257_vm0, %v6122_v19 }
 0x28a   : > { %v2023_v25 = vpop.f32.mrb[26].mxu0 }
 0x28b   : > { %v2024_v60 = vadd.f32 %v5923_v24, %v2023_v25  ;;  %v2025_v20 = vpop.f32.mrb[27].mxu0 }
 0x28c   : > { %v3782_v20 = vld [vmem:[%s7186_s3 + $0x40] sm:$0xff] }
 0x28d   : > { %v2130_v29 = vmax.f32 %v2024_v60, 0.0 }
 0x28e   : > { %v6135_v35 = vld [vmem:[#allocation2 + $0xa9] sm:$0xff] }
 0x28f   : > { %v6137_v63 = vld [vmem:[#allocation2 + $0xa8] sm:$0xff]  ;;  %2218 = vst.msk [vmem:[#allocation2 + $0xb1] sm:$0xff] %vm257_vm0, %v2130_v29  ;;  %2393 = vrot.lane.b32.xlu0 %v6135_v35, %s4685_s24  ;;  %v4644_v29 = vpack.c.bf16 %v3783_v16, %v3782_v20  ;;  %v3069_v16 = vld [vmem:[#allocation2 + $0x1a] sm:$0xff] }
 0x290   : > { %2283 = vst.msk [vmem:[#allocation3 + $0xe0] sm:$0xff] %vm257_vm0, %v6137_v63  ;;  %v3791_v20 = vld [vmem:[%s7186_s3 + $0x88] sm:$0xff] }
 0x291   : > { %4645 = vmatpush1.bf16.msra.mxu1 %v4644_v29 }
 0x292   : > { %v2028_v39 = vpop.f32.mrb[28].mxu0  ;;  %4646 = vmatprep.subr.bf16.mxu1 %v4688_v2 }
 0x293   : > { %v2029_v42 = vadd.f32 %v5923_v24, %v2028_v39  ;;  %v2030_v7 = vpop.f32.mrb[29].mxu0  ;;  %v3784_v39 = vld [vmem:[%s7186_s3 + $0x50] sm:$0xff] }
 0x294   : > { %v3786_v7 = vld [vmem:[%s7186_s3 + $0x60] sm:$0xff] }
 0x295   : > { %v2131_v43 = vmax.f32 %v2029_v42, 0.0  ;;  %v4647_v42 = vpack.c.bf16 %v3785_v62, %v3784_v39 }
 0x296   : > { %v6159_v9 = vld [vmem:[#allocation2 + $0xb1] sm:$0xff] }
 0x297   : > { %v6161_v27 = vld [vmem:[#allocation2 + $0xb0] sm:$0xff]  ;;  %2219 = vst.msk [vmem:[#allocation2 + $0xc1] sm:$0xff] %vm257_vm0, %v2131_v43  ;;  %2395 = vrot.lane.b32.xlu1 %v6159_v9, %s4685_s24  ;;  %4648 = vmatpush1.bf16.msra.mxu1 %v4647_v42  ;;  %v3787_v43 = vld [vmem:[%s7186_s3 + $0x68] sm:$0xff] }
 0x298   : > { %v6163_v11 = vld [vmem:[#allocation2 + $0xaa] sm:$0xff]  ;;  %2284 = vst.msk [vmem:[#allocation3 + $0xf0] sm:$0xff] %vm257_vm0, %v6161_v27  ;;  %v6170_v49 = vld [vmem:[#allocation2 + $0xb2] sm:$0xff]  ;;  %4649 = vmatprep.subr.bf16.mxu1 %v4688_v2  ;;  %v4650_v50 = vpack.c.bf16 %v3787_v43, %v3786_v7 }
 0x299   : > { %3688 = vst.msk [vmem:[#allocation3 + $0xa8] sm:$0xff] %vm257_vm0, %v6163_v11  ;;  %3689 = vst.msk [vmem:[#allocation3 + $0xb8] sm:$0xff] %vm257_vm0, %v6170_v49 }
 0x29a   : > { %v2033_v14 = vpop.f32.mrb[30].mxu0 }
 0x29b   : > { %v2034_v41 = vadd.f32 %v5923_v24, %v2033_v14  ;;  %v2035_v25 = vpop.f32.mrb[31].mxu0  ;;  %v2494_v14 = vld [vmem:[#allocation2 + $0xa] sm:$0xff]  ;;  %4651 = vmatpush1.bf16.msra.mxu1 %v4650_v50 }
 0x29c   : > { %4652 = vmatprep.subr.bf16.mxu1 %v4688_v2 }
 0x29d   : > { %v2132_v60 = vmax.f32 %v2034_v41, 0.0  ;;  %v3789_v41 = vld [vmem:[%s7186_s3 + $0x78] sm:$0xff] }
 0x29e   : > { %v6191_v45 = vld [vmem:[#allocation2 + $0xc1] sm:$0xff] }
 0x29f   : > { %v6193_v22 = vld [vmem:[#allocation2 + $0xc0] sm:$0xff]  ;;  %2220 = vst.msk [vmem:[#allocation2 + $0xc9] sm:$0xff] %vm257_vm0, %v2132_v60  ;;  %2397 = vrot.lane.b32.xlu0 %v6191_v45, %s4685_s24 }
 0x2a0   : > { %2285 = vst.msk [vmem:[#allocation3 + $0x100] sm:$0xff] %vm257_vm0, %v6193_v22  ;;  %v3790_v60 = vld [vmem:[%s7186_s3 + $0x80] sm:$0xff] }
 0x2a1   : > { %v2370_v6 = vpop.permute.xlu0 %2369  ;;  %v4656_v29 = vpack.c.bf16 %v3791_v20, %v3790_v60 }
 0x2a2   : > { %2463 = vst.msk [vmem:[#allocation3 + $0x20] sm:$0xff] %vm450_vm1, %v2370_v6 }
 0x2a3   : > { %2557 = vrot.lane.b32.xlu0 %v2493_v23, %s4686_s25  ;;  %v3070_v23 = vld [vmem:[#allocation2 + $0x22] sm:$0xff] }
 0x2a6   : > { %v6216_v52 = vld [vmem:[#allocation2 + $0xc9] sm:$0xff] }
 0x2a7   : > { %v6218_v46 = vld [vmem:[#allocation2 + $0xc8] sm:$0xff]  ;;  %2399 = vrot.lane.b32.xlu1 %v6216_v52, %s4685_s24  ;;  %2941 = vrot.lane.b32.xlu0 %v5939_v54, %s4689_s21  ;;  %v3788_v54 = vld [vmem:[%s7186_s3 + $0x70] sm:$0xff] }
 0x2a8   : > { %v6220_v15 = vld [vmem:[#allocation2 + $0xc2] sm:$0xff]  ;;  %2286 = vst.msk [vmem:[#allocation3 + $0x110] sm:$0xff] %vm257_vm0, %v6218_v46  ;;  %v6228_v48 = vld [vmem:[#allocation2 + $0xca] sm:$0xff]  ;;  %v4653_v25 = vpack.c.bf16 %v3789_v41, %v3788_v54 }
 0x2a9   : > { %3690 = vst.msk [vmem:[#allocation3 + $0xc8] sm:$0xff] %vm257_vm0, %v6220_v15  ;;  %3691 = vst.msk [vmem:[#allocation3 + $0xd8] sm:$0xff] %vm257_vm0, %v6228_v48  ;;  %v2372_v12 = vpop.permute.xlu1 %2371 }
 0x2aa   : > { %2464 = vst.msk [vmem:[#allocation3 + $0x30] sm:$0xff] %vm450_vm1, %v2372_v12  ;;  %4654 = vmatpush1.bf16.msra.mxu1 %v4653_v25 }
 0x2ab   : > { %2749 = vrot.lane.b32.xlu1 %v5941_v32, %s4687_s26  ;;  %2559 = vrot.lane.b32.xlu0 %v2494_v14, %s4686_s25 }
 0x2ac   : > { %4655 = vmatprep.subr.bf16.mxu1 %v4688_v2 }
 0x2ae   : > { %4657 = vmatpush1.bf16.msra.mxu1 %v4656_v29 }
 0x2af   : > { %3133 = vrot.lane.b32.xlu1 %v3069_v16, %s4690_s22  ;;  %2751 = vrot.lane.b32.xlu0 %v5956_v59, %s4687_s26 }
 0x2b1   : > { %v2374_v32 = vpop.permute.xlu0 %2373 }
 0x2b2   : > { %2465 = vst.msk [vmem:[#allocation3 + $0x40] sm:$0xff] %vm450_vm1, %v2374_v32 }
 0x2b3   : > { %3326 = vrot.lane.b32.xlu1 %v5971_v0, %s4691_s27  ;;  %2943 = vrot.lane.b32.xlu0 %v5954_v3, %s4689_s21 }
 0x2b7   : > { %3518 = vrot.lane.b32.xlu1 %v5969_v5, %s4692_s28  ;;  %2561 = vrot.lane.b32.xlu0 %v3069_v16, %s4686_s25 }
 0x2b9   : > { %v2376_v2 = vpop.permute.xlu1 %2375 }
 0x2ba   : > { %2466 = vst.msk [vmem:[#allocation3 + $0x50] sm:$0xff] %vm450_vm1, %v2376_v2 }
 0x2bb   : > { %3135 = vrot.lane.b32.xlu1 %v3070_v23, %s4690_s22  ;;  %2753 = vrot.lane.b32.xlu0 %v5971_v0, %s4687_s26 }
 0x2bf   : > { %3328 = vrot.lane.b32.xlu1 %v5988_v8, %s4691_s27  ;;  %2945 = vrot.lane.b32.xlu0 %v5969_v5, %s4689_s21  ;;  %v2038_v5 = vpop.f32.mrb[32].mxu0 }
 0x2c0   : > { %v2039_v0 = vadd.f32 %v5923_v24, %v2038_v5  ;;  %v2040_v6 = vpop.f32.mrb[33].mxu0 }
 0x2c1   : > { %v2378_v3 = vpop.permute.xlu0 %2377  ;;  %v2043_v39 = vpop.f32.mrb[34].mxu0 }
 0x2c2   : > { %2467 = vst.msk [vmem:[#allocation3 + $0x60] sm:$0xff] %vm450_vm1, %v2378_v3  ;;  %v2044_v62 = vadd.f32 %v5923_v24, %v2043_v39  ;;  %v2045_v42 = vpop.f32.mrb[35].mxu0 }
 0x2c3   : > { %3520 = vrot.lane.b32.xlu1 %v5984_v61, %s4692_s28  ;;  %2563 = vrot.lane.b32.xlu0 %v3070_v23, %s4686_s25 }
 0x2c4   : > { %v2134_v43 = vmax.f32 %v2044_v62, 0.0 }
 0x2c6   : > { %2222 = vst.msk [vmem:[#allocation2 + $0xe1] sm:$0xff] %vm257_vm0, %v2134_v43 }
 0x2c7   : > { %3137 = vrot.lane.b32.xlu1 %v5986_v21, %s4690_s22  ;;  %2755 = vrot.lane.b32.xlu0 %v5988_v8, %s4687_s26  ;;  %v2133_v8 = vmax.f32 %v2039_v0, 0.0 }
 0x2c9   : > { %v2380_v59 = vpop.permute.xlu1 %2379  ;;  %2221 = vst.msk [vmem:[#allocation2 + $0xd9] sm:$0xff] %vm257_vm0, %v2133_v8 }
 0x2ca   : > { %2468 = vst.msk [vmem:[#allocation3 + $0x70] sm:$0xff] %vm450_vm1, %v2380_v59 }
 0x2cb   : > { %3330 = vrot.lane.b32.xlu1 %v6007_v28, %s4691_s27  ;;  %2947 = vrot.lane.b32.xlu0 %v5984_v61, %s4689_s21 }
 0x2cd   : > { %v6334_v20 = vld [vmem:[#allocation2 + $0xe2] sm:$0xff] }
 0x2ce   : > { %3693 = vst.msk [vmem:[#allocation3 + $0xf8] sm:$0xff] %vm257_vm0, %v6334_v20 }
 0x2cf   : > { %3522 = vrot.lane.b32.xlu1 %v6005_v58, %s4692_s28  ;;  %2565 = vrot.lane.b32.xlu0 %v5986_v21, %s4686_s25 }
 0x2d0   : > { %v6302_v21 = vld [vmem:[#allocation2 + $0xd8] sm:$0xff] }
 0x2d1   : > { %v2382_v7 = vpop.permute.xlu0 %2381  ;;  %v6310_v50 = vld [vmem:[#allocation2 + $0xda] sm:$0xff]  ;;  %2287 = vst.msk [vmem:[#allocation3 + $0x120] sm:$0xff] %vm257_vm0, %v6302_v21 }
 0x2d2   : > { %2469 = vst.msk [vmem:[#allocation3 + $0x80] sm:$0xff] %vm450_vm1, %v2382_v7 }
 0x2d3   : > { %3139 = vrot.lane.b32.xlu1 %v5998_v38, %s4690_s22  ;;  %2757 = vrot.lane.b32.xlu0 %v6007_v28, %s4687_s26  ;;  %v6308_v28 = vld [vmem:[#allocation2 + $0xe0] sm:$0xff]  ;;  %3692 = vst.msk [vmem:[#allocation3 + $0xe8] sm:$0xff] %vm257_vm0, %v6310_v50 }
 0x2d4   : > { %2288 = vst.msk [vmem:[#allocation3 + $0x130] sm:$0xff] %vm257_vm0, %v6308_v28 }
 0x2d7   : > { %3332 = vrot.lane.b32.xlu1 %v6019_v13, %s4691_s27  ;;  %2949 = vrot.lane.b32.xlu0 %v6005_v58, %s4689_s21  ;;  %v2048_v58 = vpop.f32.mrb[36].mxu0 }
 0x2d8   : > { %v2049_v14 = vadd.f32 %v5923_v24, %v2048_v58  ;;  %v2050_v12 = vpop.f32.mrb[37].mxu0 }
 0x2d9   : > { %v2384_v61 = vpop.permute.xlu1 %2383  ;;  %v2053_v54 = vpop.f32.mrb[38].mxu0 }
 0x2da   : > { %2470 = vst.msk [vmem:[#allocation3 + $0x90] sm:$0xff] %vm450_vm1, %v2384_v61  ;;  %v2135_v41 = vmax.f32 %v2049_v14, 0.0  ;;  %v2054_v25 = vadd.f32 %v5923_v24, %v2053_v54  ;;  %v2055_v60 = vpop.f32.mrb[39].mxu0 }
 0x2db   : > { %3524 = vrot.lane.b32.xlu1 %v6017_v1, %s4692_s28  ;;  %2567 = vrot.lane.b32.xlu0 %v5998_v38, %s4686_s25  ;;  %v2058_v32 = vpop.f32.mrb[40].mxu0 }
 0x2dc   : > { %2223 = vst.msk [vmem:[#allocation2 + $0xf1] sm:$0xff] %vm257_vm0, %v2135_v41 }
 0x2df   : > { %3141 = vrot.lane.b32.xlu1 %v6021_v56, %s4690_s22  ;;  %2759 = vrot.lane.b32.xlu0 %v6019_v13, %s4687_s26  ;;  %v2136_v13 = vmax.f32 %v2054_v25, 0.0 }
 0x2e1   : > { %v2386_v38 = vpop.permute.xlu0 %2385  ;;  %2224 = vst.msk [vmem:[#allocation2 + $0xf9] sm:$0xff] %vm257_vm0, %v2136_v13 }
 0x2e2   : > { %2471 = vst.msk [vmem:[#allocation3 + $0xa0] sm:$0xff] %vm450_vm1, %v2386_v38 }
 0x2e3   : > { %3334 = vrot.lane.b32.xlu1 %v6038_v33, %s4691_s27  ;;  %2951 = vrot.lane.b32.xlu0 %v6017_v1, %s4689_s21  ;;  %v6348_v16 = vld [vmem:[#allocation2 + $0xf0] sm:$0xff] }
 0x2e4   : > { %2289 = vst.msk [vmem:[#allocation3 + $0x140] sm:$0xff] %vm257_vm0, %v6348_v16 }
 0x2e7   : > { %3526 = vrot.lane.b32.xlu1 %v6036_v37, %s4692_s28  ;;  %2569 = vrot.lane.b32.xlu0 %v6021_v56, %s4686_s25 }
 0x2e8   : > { %v6350_v29 = vld [vmem:[#allocation2 + $0xf8] sm:$0xff] }
 0x2e9   : > { %v2388_v1 = vpop.permute.xlu1 %2387  ;;  %v6353_v2 = vld [vmem:[#allocation2 + $0xf2] sm:$0xff]  ;;  %2290 = vst.msk [vmem:[#allocation3 + $0x150] sm:$0xff] %vm257_vm0, %v6350_v29  ;;  %v6373_v6 = vld [vmem:[#allocation2 + $0xfa] sm:$0xff] }
 0x2ea   : > { %2472 = vst.msk [vmem:[#allocation3 + $0xb0] sm:$0xff] %vm450_vm1, %v2388_v1 }
 0x2eb   : > { %3143 = vrot.lane.b32.xlu1 %v6028_v40, %s4690_s22  ;;  %2761 = vrot.lane.b32.xlu0 %v6038_v33, %s4687_s26  ;;  %v2060_v33 = vpop.f32.mrb[41].mxu0  ;;  %3694 = vst.msk [vmem:[#allocation3 + $0x108] sm:$0xff] %vm257_vm0, %v6353_v2  ;;  %3695 = vst.msk [vmem:[#allocation3 + $0x118] sm:$0xff] %vm257_vm0, %v6373_v6 }
 0x2ec   : > { %v2063_v23 = vpop.f32.mrb[42].mxu0 }
 0x2ed   : > { %v2064_v59 = vadd.f32 %v5923_v24, %v2063_v23  ;;  %v2065_v5 = vpop.f32.mrb[43].mxu0 }
 0x2ee   : > { %v2068_v62 = vpop.f32.mrb[44].mxu0 }
 0x2ef   : > { %3336 = vrot.lane.b32.xlu1 %v6049_v4, %s4691_s27  ;;  %2953 = vrot.lane.b32.xlu0 %v6036_v37, %s4689_s21  ;;  %v2059_v37 = vadd.f32 %v5923_v24, %v2058_v32 }
 0x2f1   : > { %v2390_v56 = vpop.permute.xlu0 %2389  ;;  %v2137_v3 = vmax.f32 %v2059_v37, 0.0 }
 0x2f2   : > { %2473 = vst.msk [vmem:[#allocation3 + $0xc0] sm:$0xff] %vm450_vm1, %v2390_v56 }
 0x2f3   : > { %3528 = vrot.lane.b32.xlu1 %v6047_v34, %s4692_s28  ;;  %2571 = vrot.lane.b32.xlu0 %v6028_v40, %s4686_s25  ;;  %2225 = vst.msk [vmem:[#allocation2 + $0x109] sm:$0xff] %vm257_vm0, %v2137_v3  ;;  %v2138_v40 = vmax.f32 %v2064_v59, 0.0 }
 0x2f5   : > { %2226 = vst.msk [vmem:[#allocation2 + $0x111] sm:$0xff] %vm257_vm0, %v2138_v40 }
 0x2f7   : > { %3145 = vrot.lane.b32.xlu1 %v6051_v44, %s4690_s22  ;;  %2763 = vrot.lane.b32.xlu0 %v6049_v4, %s4687_s26 }
 0x2f9   : > { %v2392_v0 = vpop.permute.xlu1 %2391 }
 0x2fa   : > { %2474 = vst.msk [vmem:[#allocation3 + $0xd0] sm:$0xff] %vm450_vm1, %v2392_v0  ;;  %v6386_v39 = vld [vmem:[#allocation2 + $0x108] sm:$0xff] }
 0x2fb   : > { %3338 = vrot.lane.b32.xlu1 %v6070_v36, %s4691_s27  ;;  %2955 = vrot.lane.b32.xlu0 %v6047_v34, %s4689_s21  ;;  %2291 = vst.msk [vmem:[#allocation3 + $0x160] sm:$0xff] %vm257_vm0, %v6386_v39  ;;  %v2069_v34 = vadd.f32 %v5923_v24, %v2068_v62 }
 0x2fc   : > { %v6388_v8 = vld [vmem:[#allocation2 + $0x110] sm:$0xff] }
 0x2fd   : > { %v6391_v42 = vld [vmem:[#allocation2 + $0x10a] sm:$0xff]  ;;  %2292 = vst.msk [vmem:[#allocation3 + $0x170] sm:$0xff] %vm257_vm0, %v6388_v8  ;;  %v2139_v43 = vmax.f32 %v2069_v34, 0.0  ;;  %v6411_v14 = vld [vmem:[#allocation2 + $0x112] sm:$0xff] }
 0x2fe   : > { %3696 = vst.msk [vmem:[#allocation3 + $0x128] sm:$0xff] %vm257_vm0, %v6391_v42  ;;  %3697 = vst.msk [vmem:[#allocation3 + $0x138] sm:$0xff] %vm257_vm0, %v6411_v14 }
 0x2ff   : > { %3530 = vrot.lane.b32.xlu1 %v6068_v30, %s4692_s28  ;;  %2573 = vrot.lane.b32.xlu0 %v6051_v44, %s4686_s25  ;;  %v2070_v44 = vpop.f32.mrb[45].mxu0  ;;  %2227 = vst.msk [vmem:[#allocation2 + $0x121] sm:$0xff] %vm257_vm0, %v2139_v43 }
 0x300   : > { %v2073_v7 = vpop.f32.mrb[46].mxu0 }
 0x301   : > { %v2394_v4 = vpop.permute.xlu0 %2393  ;;  %v2074_v61 = vadd.f32 %v5923_v24, %v2073_v7  ;;  %v2075_v38 = vpop.f32.mrb[47].mxu0 }
 0x302   : > { %2475 = vst.msk [vmem:[#allocation3 + $0xe0] sm:$0xff] %vm450_vm1, %v2394_v4  ;;  %v2078_v41 = vpop.f32.mrb[48].mxu0 }
 0x303   : > { %3147 = vrot.lane.b32.xlu1 %v6058_v26, %s4690_s22  ;;  %2765 = vrot.lane.b32.xlu0 %v6070_v36, %s4687_s26  ;;  %v2140_v36 = vmax.f32 %v2074_v61, 0.0 }
 0x305   : > { %2228 = vst.msk [vmem:[#allocation2 + $0x129] sm:$0xff] %vm257_vm0, %v2140_v36 }
 0x306   : > { %v6424_v12 = vld [vmem:[#allocation2 + $0x120] sm:$0xff] }
 0x307   : > { %3340 = vrot.lane.b32.xlu1 %v6083_v53, %s4691_s27  ;;  %2957 = vrot.lane.b32.xlu0 %v6068_v30, %s4689_s21  ;;  %2293 = vst.msk [vmem:[#allocation3 + $0x180] sm:$0xff] %vm257_vm0, %v6424_v12 }
 0x309   : > { %v2396_v58 = vpop.permute.xlu1 %2395 }
 0x30a   : > { %2476 = vst.msk [vmem:[#allocation3 + $0xf0] sm:$0xff] %vm450_vm1, %v2396_v58 }
 0x30b   : > { %3532 = vrot.lane.b32.xlu1 %v6081_v47, %s4692_s28  ;;  %2575 = vrot.lane.b32.xlu0 %v6058_v26, %s4686_s25  ;;  %v2079_v26 = vadd.f32 %v5923_v24, %v2078_v41 }
 0x30c   : > { %v6426_v54 = vld [vmem:[#allocation2 + $0x128] sm:$0xff] }
 0x30d   : > { %v6429_v25 = vld [vmem:[#allocation2 + $0x122] sm:$0xff]  ;;  %2294 = vst.msk [vmem:[#allocation3 + $0x190] sm:$0xff] %vm257_vm0, %v6426_v54  ;;  %v2141_v1 = vmax.f32 %v2079_v26, 0.0  ;;  %v6450_v23 = vld [vmem:[#allocation2 + $0x12a] sm:$0xff] }
 0x30e   : > { %3698 = vst.msk [vmem:[#allocation3 + $0x148] sm:$0xff] %vm257_vm0, %v6429_v25  ;;  %3699 = vst.msk [vmem:[#allocation3 + $0x158] sm:$0xff] %vm257_vm0, %v6450_v23 }
 0x30f   : > { %3149 = vrot.lane.b32.xlu1 %v6087_v10, %s4690_s22  ;;  %2767 = vrot.lane.b32.xlu0 %v6083_v53, %s4687_s26  ;;  %v2080_v53 = vpop.f32.mrb[49].mxu0  ;;  %2229 = vst.msk [vmem:[#allocation2 + $0x139] sm:$0xff] %vm257_vm0, %v2141_v1 }
 0x310   : > { %v2083_v60 = vpop.f32.mrb[50].mxu0 }
 0x311   : > { %v2398_v30 = vpop.permute.xlu0 %2397  ;;  %v2084_v56 = vadd.f32 %v5923_v24, %v2083_v60  ;;  %v2085_v32 = vpop.f32.mrb[51].mxu0 }
 0x312   : > { %2477 = vst.msk [vmem:[#allocation3 + $0x100] sm:$0xff] %vm450_vm1, %v2398_v30 }
 0x313   : > { %3342 = vrot.lane.b32.xlu1 %v6103_v31, %s4691_s27  ;;  %2959 = vrot.lane.b32.xlu0 %v6081_v47, %s4689_s21  ;;  %v2142_v47 = vmax.f32 %v2084_v56, 0.0 }
 0x315   : > { %v2558_v13 = vpop.permute.xlu0 %2557  ;;  %2230 = vst.msk [vmem:[#allocation2 + $0x141] sm:$0xff] %vm257_vm0, %v2142_v47 }
 0x316   : > { %2653 = vst.msk [vmem:[#allocation3] sm:$0xff] %vm643_vm2, %v2558_v13  ;;  %v6466_v5 = vld [vmem:[#allocation2 + $0x138] sm:$0xff] }
 0x317   : > { %3534 = vrot.lane.b32.xlu1 %v6101_v51, %s4692_s28  ;;  %2577 = vrot.lane.b32.xlu0 %v6087_v10, %s4686_s25  ;;  %2295 = vst.msk [vmem:[#allocation3 + $0x1a0] sm:$0xff] %vm257_vm0, %v6466_v5 }
 0x319   : > { %v2400_v37 = vpop.permute.xlu1 %2399  ;;  %v2942_v33 = vpop.permute.xlu0 %2941 }
 0x31a   : > { %2478 = vst.msk [vmem:[#allocation3 + $0x110] sm:$0xff] %vm450_vm1, %v2400_v37 }
 0x31b   : > { %3151 = vrot.lane.b32.xlu1 %v6094_v57, %s4690_s22  ;;  %2769 = vrot.lane.b32.xlu0 %v6103_v31, %s4687_s26  ;;  %v2088_v31 = vpop.f32.mrb[52].mxu0 }
 0x31c   : > { %v6468_v40 = vld [vmem:[#allocation2 + $0x140] sm:$0xff]  ;;  %v2090_v62 = vpop.f32.mrb[53].mxu0 }
 0x31d   : > { %v2750_v24 = vpop.permute.xlu1 %2749  ;;  %v2560_v10 = vpop.permute.xlu0 %2559  ;;  %v6472_v0 = vld [vmem:[#allocation2 + $0x13a] sm:$0xff]  ;;  %2296 = vst.msk [vmem:[#allocation3 + $0x1b0] sm:$0xff] %vm257_vm0, %v6468_v40  ;;  %v6499_v30 = vld [vmem:[#allocation2 + $0x142] sm:$0xff] }
 0x31e   : > { %2845 = vst.msk [vmem:[#allocation3] sm:$0xff] %vm837_vm3, %v2750_v24  ;;  %v2093_v34 = vpop.f32.mrb[54].mxu0 }
 0x31f   : > { %2654 = vst.msk [vmem:[#allocation3 + $0x10] sm:$0xff] %vm643_vm2, %v2560_v10  ;;  %3344 = vrot.lane.b32.xlu1 %v6113_v55, %s4691_s27  ;;  %2961 = vrot.lane.b32.xlu0 %v6101_v51, %s4689_s21  ;;  %v6485_v51 = vld [vmem:[%s7185_s2] ss:$0 sm:$0xff] }
 0x320   : > { %3037 = vst.msk [vmem:[#allocation3] sm:$0xff] %vm1030_vm4, %v2942_v33  ;;  %v2089_v4 = vadd.f32 %v6485_v51, %v2088_v31  ;;  %v2094_v61 = vadd.f32 %v6485_v51, %v2093_v34 }
 0x321   : > { %v3134_v3 = vpop.permute.xlu1 %3133  ;;  %v2752_v59 = vpop.permute.xlu0 %2751  ;;  %3700 = vst.msk [vmem:[#allocation3 + $0x168] sm:$0xff] %vm257_vm0, %v6472_v0  ;;  %3701 = vst.msk [vmem:[#allocation3 + $0x178] sm:$0xff] %vm257_vm0, %v6499_v30 }
 0x322   : > { %3229 = vst.msk [vmem:[#allocation3] sm:$0xff] %vm1223_vm5, %v3134_v3  ;;  %v2143_v43 = vmax.f32 %v2089_v4, 0.0  ;;  %v2144_v38 = vmax.f32 %v2094_v61, 0.0 }
 0x323   : > { %2846 = vst.msk [vmem:[#allocation3 + $0x10] sm:$0xff] %vm837_vm3, %v2752_v59  ;;  %3536 = vrot.lane.b32.xlu1 %v6111_v18, %s4692_s28  ;;  %2579 = vrot.lane.b32.xlu0 %v6094_v57, %s4686_s25  ;;  %v2095_v57 = vpop.f32.mrb[55].mxu0 }
 0x324   : > { %2231 = vst.msk [vmem:[#allocation2 + $0x151] sm:$0xff] %vm257_vm0, %v2143_v43  ;;  %2232 = vst.msk [vmem:[#allocation2 + $0x159] sm:$0xff] %vm257_vm0, %v2144_v38 }
 0x325   : > { %v3327_v44 = vpop.permute.xlu1 %3326  ;;  %v2944_v7 = vpop.permute.xlu0 %2943 }
 0x326   : > { %3422 = vst.msk [vmem:[#allocation3] sm:$0xff] %vm1417_vm6, %v3327_v44 }
 0x327   : > { %3038 = vst.msk [vmem:[#allocation3 + $0x10] sm:$0xff] %vm1030_vm4, %v2944_v7  ;;  %3153 = vrot.lane.b32.xlu1 %v6115_v17, %s4690_s22  ;;  %2771 = vrot.lane.b32.xlu0 %v6113_v55, %s4687_s26  ;;  %v3715_v7 = vld [vmem:[#allocation3 + $0x28] sm:$0xff] }
 0x329   : > { %v3519_v36 = vpop.permute.xlu1 %3518  ;;  %v2562_v58 = vpop.permute.xlu0 %2561 }
 0x32a   : > { %3614 = vst.msk [vmem:[#allocation3] sm:$0xff] %vm1610_vm7, %v3519_v36 }
 0x32b   : > { %2655 = vst.msk [vmem:[#allocation3 + $0x20] sm:$0xff] %vm643_vm2, %v2562_v58  ;;  %3346 = vrot.lane.b32.xlu1 %v6137_v63, %s4691_s27  ;;  %2963 = vrot.lane.b32.xlu0 %v6111_v18, %s4689_s21  ;;  %v6515_v13 = vld [vmem:[#allocation2 + $0x150] sm:$0xff]  ;;  %v2098_v18 = vpop.f32.mrb[56].mxu0  ;;  %v6519_v1 = vld [vmem:[#allocation2 + $0x158] sm:$0xff] }
 0x32c   : > { %v6521_v56 = vld [vmem:[#allocation2 + $0x152] sm:$0xff]  ;;  %2297 = vst.msk [vmem:[#allocation3 + $0x1c0] sm:$0xff] %vm257_vm0, %v6515_v13  ;;  %v2099_v32 = vadd.f32 %v6485_v51, %v2098_v18  ;;  %v2100_v47 = vpop.f32.mrb[57].mxu0  ;;  %2298 = vst.msk [vmem:[#allocation3 + $0x1d0] sm:$0xff] %vm257_vm0, %v6519_v1  ;;  %v6543_v62 = vld [vmem:[#allocation2 + $0x15a] sm:$0xff] }
 0x32d   : > { %v3136_v55 = vpop.permute.xlu1 %3135  ;;  %v2754_v41 = vpop.permute.xlu0 %2753  ;;  %3702 = vst.msk [vmem:[#allocation3 + $0x188] sm:$0xff] %vm257_vm0, %v6521_v56  ;;  %3703 = vst.msk [vmem:[#allocation3 + $0x198] sm:$0xff] %vm257_vm0, %v6543_v62 }
 0x32e   : > { %3230 = vst.msk [vmem:[#allocation3 + $0x10] sm:$0xff] %vm1223_vm5, %v3136_v55  ;;  %v2145_v24 = vmax.f32 %v2099_v32, 0.0 }
 0x32f   : > { %2847 = vst.msk [vmem:[#allocation3 + $0x20] sm:$0xff] %vm837_vm3, %v2754_v41  ;;  %3538 = vrot.lane.b32.xlu1 %v6135_v35, %s4692_s28  ;;  %2581 = vrot.lane.b32.xlu0 %v6115_v17, %s4686_s25  ;;  %v3713_v17 = vld [vmem:[#allocation3 + $0x18] sm:$0xff] }
 0x330   : > { %2233 = vst.msk [vmem:[#allocation2 + $0x169] sm:$0xff] %vm257_vm0, %v2145_v24 }
 0x331   : > { %v3329_v26 = vpop.permute.xlu1 %3328  ;;  %v2946_v53 = vpop.permute.xlu0 %2945  ;;  %v3710_v60 = vld [vmem:[#allocation3] sm:$0xff] }
 0x332   : > { %3423 = vst.msk [vmem:[#allocation3 + $0x10] sm:$0xff] %vm1417_vm6, %v3329_v26  ;;  %3960 = vmatmul.mubr.f32.vlgmr.msra.gmra.mrb[0].mxu1 %v3710_v60 }
 0x333   : > { %3039 = vst.msk [vmem:[#allocation3 + $0x20] sm:$0xff] %vm1030_vm4, %v2946_v53  ;;  %3155 = vrot.lane.b32.xlu1 %v6122_v19, %s4690_s22  ;;  %2773 = vrot.lane.b32.xlu0 %v6137_v63, %s4687_s26  ;;  %v2103_v63 = vpop.f32.mrb[58].mxu0 }
 0x334   : > { %4538 = vmatprep.mubr.msk.f32.mxu1 %vm257_vm0, %v3713_v17  ;;  %v2104_v10 = vadd.f32 %v6485_v51, %v2103_v63  ;;  %v2105_v3 = vpop.f32.mrb[59].mxu0 }
 0x335   : > { %v3521_v37 = vpop.permute.xlu1 %3520  ;;  %v2564_v33 = vpop.permute.xlu0 %2563 }
 0x336   : > { %3615 = vst.msk [vmem:[#allocation3 + $0x10] sm:$0xff] %vm1610_vm7, %v3521_v37  ;;  %v2146_v4 = vmax.f32 %v2104_v10, 0.0  ;;  %v2108_v58 = vpop.f32.mrb[60].mxu0 }
 0x337   : > { %2656 = vst.msk [vmem:[#allocation3 + $0x30] sm:$0xff] %vm643_vm2, %v2564_v33  ;;  %3348 = vrot.lane.b32.xlu1 %v6161_v27, %s4691_s27  ;;  %2965 = vrot.lane.b32.xlu0 %v6135_v35, %s4689_s21  ;;  %v6563_v61 = vld [vmem:[#allocation2 + $0x168] sm:$0xff]  ;;  %v2110_v55 = vpop.f32.mrb[61].mxu0 }
 0x338   : > { %2234 = vst.msk [vmem:[#allocation2 + $0x171] sm:$0xff] %vm257_vm0, %v2146_v4  ;;  %2299 = vst.msk [vmem:[#allocation3 + $0x1e0] sm:$0xff] %vm257_vm0, %v6563_v61  ;;  %v2113_v18 = vpop.f32.mrb[62].mxu0 }
 0x339   : > { %v3138_v59 = vpop.permute.xlu1 %3137  ;;  %v2756_v31 = vpop.permute.xlu0 %2755  ;;  %v2114_v17 = vadd.f32 %v6485_v51, %v2113_v18 }
 0x33a   : > { %3231 = vst.msk [vmem:[#allocation3 + $0x20] sm:$0xff] %vm1223_vm5, %v3138_v59  ;;  %v2115_v32 = vpop.f32.mrb[63].mxu0 }
 0x33b   : > { %2848 = vst.msk [vmem:[#allocation3 + $0x30] sm:$0xff] %vm837_vm3, %v2756_v31  ;;  %3540 = vrot.lane.b32.xlu1 %v6159_v9, %s4692_s28  ;;  %2583 = vrot.lane.b32.xlu0 %v6122_v19, %s4686_s25  ;;  %v2148_v33 = vmax.f32 %v2114_v17, 0.0  ;;  %v3725_v32 = vld [vmem:[#allocation3 + $0x78] sm:$0xff] }
 0x33d   : > { %v3331_v35 = vpop.permute.xlu1 %3330  ;;  %v2948_v34 = vpop.permute.xlu0 %2947  ;;  %v3712_v44 = vld [vmem:[#allocation3 + $0x10] sm:$0xff]  ;;  %2236 = vst.msk [vmem:[#allocation2 + $0x189] sm:$0xff] %vm257_vm0, %v2148_v33 }
 0x33e   : > { %3424 = vst.msk [vmem:[#allocation3 + $0x20] sm:$0xff] %vm1417_vm6, %v3331_v35  ;;  %3965 = vmatmul.mubr.f32.gmra.mrb[2].mxu1 %v3712_v44  ;;  %v3468_v35 = vld [vmem:[#allocation2 + $0xd9] sm:$0xff] }
 0x33f   : > { %3040 = vst.msk [vmem:[#allocation3 + $0x30] sm:$0xff] %vm1030_vm4, %v2948_v34  ;;  %3157 = vrot.lane.b32.xlu1 %v6163_v11, %s4690_s22  ;;  %2775 = vrot.lane.b32.xlu0 %v6161_v27, %s4687_s26  ;;  %v6565_v57 = vld [vmem:[#allocation2 + $0x170] sm:$0xff]  ;;  %v3471_v33 = vld [vmem:[#allocation2 + $0xf9] sm:$0xff] }
 0x340   : > { %4539 = vmatprep.mubr.msk.f32.mxu1 %vm257_vm0, %v3715_v7  ;;  %v6571_v27 = vld [vmem:[#allocation2 + $0x16a] sm:$0xff]  ;;  %2300 = vst.msk [vmem:[#allocation3 + $0x1f0] sm:$0xff] %vm257_vm0, %v6565_v57  ;;  %v6595_v24 = vld [vmem:[#allocation2 + $0x172] sm:$0xff] }
 0x341   : > { %v3523_v19 = vpop.permute.xlu1 %3522  ;;  %v2566_v43 = vpop.permute.xlu0 %2565  ;;  %3704 = vst.msk [vmem:[#allocation3 + $0x1a8] sm:$0xff] %vm257_vm0, %v6571_v27  ;;  %3705 = vst.msk [vmem:[#allocation3 + $0x1b8] sm:$0xff] %vm257_vm0, %v6595_v24 }
 0x342   : > { %3616 = vst.msk [vmem:[#allocation3 + $0x20] sm:$0xff] %vm1610_vm7, %v3523_v19  ;;  %v3721_v19 = vld [vmem:[#allocation3 + $0x58] sm:$0xff] }
 0x343   : > { %2657 = vst.msk [vmem:[#allocation3 + $0x40] sm:$0xff] %vm643_vm2, %v2566_v43  ;;  %3350 = vrot.lane.b32.xlu1 %v6193_v22, %s4691_s27  ;;  %2967 = vrot.lane.b32.xlu0 %v6159_v9, %s4689_s21  ;;  %v2109_v9 = vadd.f32 %v6485_v51, %v2108_v58 }
 0x344   : > { %v6631_v34 = vld [vmem:[#allocation2 + $0x18a] sm:$0xff] }
 0x345   : > { %v3140_v38 = vpop.permute.xlu1 %3139  ;;  %v2758_v36 = vpop.permute.xlu0 %2757  ;;  %v2147_v60 = vmax.f32 %v2109_v9, 0.0  ;;  %3707 = vst.msk [vmem:[#allocation3 + $0x1d8] sm:$0xff] %vm257_vm0, %v6631_v34 }
 0x346   : > { %3232 = vst.msk [vmem:[#allocation3 + $0x30] sm:$0xff] %vm1223_vm5, %v3140_v38 }
 0x347   : > { %2849 = vst.msk [vmem:[#allocation3 + $0x40] sm:$0xff] %vm837_vm3, %v2758_v36  ;;  %3542 = vrot.lane.b32.xlu1 %v6191_v45, %s4692_s28  ;;  %2585 = vrot.lane.b32.xlu0 %v6163_v11, %s4686_s25  ;;  %v3717_v11 = vld [vmem:[#allocation3 + $0x38] sm:$0xff] }
 0x348   : > { %2235 = vst.msk [vmem:[#allocation2 + $0x181] sm:$0xff] %vm257_vm0, %v2147_v60 }
 0x349   : > { %v3333_v41 = vpop.permute.xlu1 %3332  ;;  %v2950_v26 = vpop.permute.xlu0 %2949  ;;  %v3714_v53 = vld [vmem:[#allocation3 + $0x20] sm:$0xff] }
 0x34a   : > { %3425 = vst.msk [vmem:[#allocation3 + $0x30] sm:$0xff] %vm1417_vm6, %v3333_v41  ;;  %3970 = vmatmul.mubr.f32.gmra.mrb[4].mxu1 %v3714_v53  ;;  %v3723_v41 = vld [vmem:[#allocation3 + $0x68] sm:$0xff] }
 0x34b   : > { %3041 = vst.msk [vmem:[#allocation3 + $0x40] sm:$0xff] %vm1030_vm4, %v2950_v26  ;;  %3159 = vrot.lane.b32.xlu1 %v6170_v49, %s4690_s22  ;;  %2777 = vrot.lane.b32.xlu0 %v6193_v22, %s4687_s26 }
 0x34c   : > { %4540 = vmatprep.mubr.msk.f32.mxu1 %vm257_vm0, %v3717_v11 }
 0x34d   : > { %v3525_v47 = vpop.permute.xlu1 %3524  ;;  %v2568_v37 = vpop.permute.xlu0 %2567 }
 0x34e   : > { %3617 = vst.msk [vmem:[#allocation3 + $0x30] sm:$0xff] %vm1610_vm7, %v3525_v47 }
 0x34f   : > { %2658 = vst.msk [vmem:[#allocation3 + $0x50] sm:$0xff] %vm643_vm2, %v2568_v37  ;;  %3352 = vrot.lane.b32.xlu1 %v6218_v46, %s4691_s27  ;;  %2969 = vrot.lane.b32.xlu0 %v6191_v45, %s4689_s21  ;;  %v3719_v45 = vld [vmem:[#allocation3 + $0x48] sm:$0xff]  ;;  %v6618_v59 = vld [vmem:[#allocation2 + $0x182] sm:$0xff] }
 0x350   : > { %3706 = vst.msk [vmem:[#allocation3 + $0x1c8] sm:$0xff] %vm257_vm0, %v6618_v59 }
 0x351   : > { %v3142_v22 = vpop.permute.xlu1 %3141  ;;  %v2760_v51 = vpop.permute.xlu0 %2759 }
 0x352   : > { %3233 = vst.msk [vmem:[#allocation3 + $0x40] sm:$0xff] %vm1223_vm5, %v3142_v22 }
 0x353   : > { %2850 = vst.msk [vmem:[#allocation3 + $0x50] sm:$0xff] %vm837_vm3, %v2760_v51  ;;  %3544 = vrot.lane.b32.xlu1 %v6216_v52, %s4692_s28  ;;  %2587 = vrot.lane.b32.xlu0 %v6170_v49, %s4686_s25 }
 0x355   : > { %v3335_v63 = vpop.permute.xlu1 %3334  ;;  %v2952_v10 = vpop.permute.xlu0 %2951  ;;  %v3716_v3 = vld [vmem:[#allocation3 + $0x30] sm:$0xff] }
 0x356   : > { %3426 = vst.msk [vmem:[#allocation3 + $0x40] sm:$0xff] %vm1417_vm6, %v3335_v63  ;;  %3975 = vmatmul.mubr.f32.gmra.mrb[6].mxu1 %v3716_v3 }
 0x357   : > { %3042 = vst.msk [vmem:[#allocation3 + $0x50] sm:$0xff] %vm1030_vm4, %v2952_v10  ;;  %3161 = vrot.lane.b32.xlu1 %v6220_v15, %s4690_s22  ;;  %2779 = vrot.lane.b32.xlu0 %v6218_v46, %s4687_s26 }
 0x358   : > { %4541 = vmatprep.mubr.msk.f32.mxu1 %vm257_vm0, %v3719_v45 }
 0x359   : > { %v3527_v49 = vpop.permute.xlu1 %3526  ;;  %v2570_v31 = vpop.permute.xlu0 %2569 }
 0x35a   : > { %3618 = vst.msk [vmem:[#allocation3 + $0x40] sm:$0xff] %vm1610_vm7, %v3527_v49 }
 0x35b   : > { %2659 = vst.msk [vmem:[#allocation3 + $0x60] sm:$0xff] %vm643_vm2, %v2570_v31  ;;  %3354 = vrot.lane.b32.xlu1 %v6302_v21, %s4691_s27  ;;  %2971 = vrot.lane.b32.xlu0 %v6216_v52, %s4689_s21 }
 0x35d   : > { %v3144_v46 = vpop.permute.xlu1 %3143  ;;  %v2762_v4 = vpop.permute.xlu0 %2761 }
 0x35e   : > { %3234 = vst.msk [vmem:[#allocation3 + $0x50] sm:$0xff] %vm1223_vm5, %v3144_v46 }
 0x35f   : > { %2851 = vst.msk [vmem:[#allocation3 + $0x60] sm:$0xff] %vm837_vm3, %v2762_v4  ;;  %3546 = vrot.lane.b32.xlu1 %v3468_v35, %s4692_s28  ;;  %2589 = vrot.lane.b32.xlu0 %v6220_v15, %s4686_s25 }
 0x361   : > { %v3337_v44 = vpop.permute.xlu1 %3336  ;;  %v2954_v7 = vpop.permute.xlu0 %2953  ;;  %v3718_v52 = vld [vmem:[#allocation3 + $0x40] sm:$0xff] }
 0x362   : > { %3427 = vst.msk [vmem:[#allocation3 + $0x50] sm:$0xff] %vm1417_vm6, %v3337_v44  ;;  %3980 = vmatmul.mubr.f32.gmra.mrb[8].mxu1 %v3718_v52 }
 0x363   : > { %3043 = vst.msk [vmem:[#allocation3 + $0x60] sm:$0xff] %vm1030_vm4, %v2954_v7  ;;  %3163 = vrot.lane.b32.xlu1 %v6228_v48, %s4690_s22  ;;  %2781 = vrot.lane.b32.xlu0 %v6302_v21, %s4687_s26  ;;  %v3469_v21 = vld [vmem:[#allocation2 + $0xe1] sm:$0xff] }
 0x364   : > { %4542 = vmatprep.mubr.msk.f32.mxu1 %vm257_vm0, %v3721_v19 }
 0x365   : > { %v3529_v15 = vpop.permute.xlu1 %3528  ;;  %v2572_v43 = vpop.permute.xlu0 %2571 }
 0x366   : > { %3619 = vst.msk [vmem:[#allocation3 + $0x50] sm:$0xff] %vm1610_vm7, %v3529_v15  ;;  %v6723_v15 = vld [vmem:[#allocation2 + $0x111] sm:$0xff] }
 0x367   : > { %2660 = vst.msk [vmem:[#allocation3 + $0x70] sm:$0xff] %vm643_vm2, %v2572_v43  ;;  %3356 = vrot.lane.b32.xlu1 %v6308_v28, %s4691_s27  ;;  %2973 = vrot.lane.b32.xlu0 %v3468_v35, %s4689_s21 }
 0x369   : > { %v3146_v38 = vpop.permute.xlu1 %3145  ;;  %v2764_v36 = vpop.permute.xlu0 %2763 }
 0x36a   : > { %3235 = vst.msk [vmem:[#allocation3 + $0x60] sm:$0xff] %vm1223_vm5, %v3146_v38 }
 0x36b   : > { %2852 = vst.msk [vmem:[#allocation3 + $0x70] sm:$0xff] %vm837_vm3, %v2764_v36  ;;  %3548 = vrot.lane.b32.xlu1 %v3469_v21, %s4692_s28  ;;  %2591 = vrot.lane.b32.xlu0 %v6228_v48, %s4686_s25 }
 0x36d   : > { %v3339_v58 = vpop.permute.xlu1 %3338  ;;  %v2956_v9 = vpop.permute.xlu0 %2955  ;;  %v3720_v55 = vld [vmem:[#allocation3 + $0x50] sm:$0xff] }
 0x36e   : > { %3428 = vst.msk [vmem:[#allocation3 + $0x60] sm:$0xff] %vm1417_vm6, %v3339_v58  ;;  %3985 = vmatmul.mubr.f32.gmra.mrb[10].mxu1 %v3720_v55 }
 0x36f   : > { %3044 = vst.msk [vmem:[#allocation3 + $0x70] sm:$0xff] %vm1030_vm4, %v2956_v9  ;;  %3165 = vrot.lane.b32.xlu1 %v6310_v50, %s4690_s22  ;;  %2783 = vrot.lane.b32.xlu0 %v6308_v28, %s4687_s26  ;;  %v6669_v28 = vld [vmem:[#allocation2 + $0xf1] sm:$0xff] }
 0x370   : > { %4543 = vmatprep.mubr.msk.f32.mxu1 %vm257_vm0, %v3723_v41 }
 0x371   : > { %v3531_v26 = vpop.permute.xlu1 %3530  ;;  %v2574_v53 = vpop.permute.xlu0 %2573 }
 0x372   : > { %3620 = vst.msk [vmem:[#allocation3 + $0x60] sm:$0xff] %vm1610_vm7, %v3531_v26 }
 0x373   : > { %2661 = vst.msk [vmem:[#allocation3 + $0x80] sm:$0xff] %vm643_vm2, %v2574_v53  ;;  %3358 = vrot.lane.b32.xlu1 %v6348_v16, %s4691_s27  ;;  %2975 = vrot.lane.b32.xlu0 %v3469_v21, %s4689_s21 }
 0x375   : > { %v3148_v48 = vpop.permute.xlu1 %3147  ;;  %v2766_v60 = vpop.permute.xlu0 %2765 }
 0x376   : > { %3236 = vst.msk [vmem:[#allocation3 + $0x70] sm:$0xff] %vm1223_vm5, %v3148_v48 }
 0x377   : > { %2853 = vst.msk [vmem:[#allocation3 + $0x80] sm:$0xff] %vm837_vm3, %v2766_v60  ;;  %3550 = vrot.lane.b32.xlu1 %v6669_v28, %s4692_s28  ;;  %3167 = vrot.lane.b32.xlu0 %v6334_v20, %s4690_s22 }
 0x379   : > { %v3341_v18 = vpop.permute.xlu1 %3340  ;;  %v2958_v11 = vpop.permute.xlu0 %2957  ;;  %v3722_v17 = vld [vmem:[#allocation3 + $0x60] sm:$0xff] }
 0x37a   : > { %3429 = vst.msk [vmem:[#allocation3 + $0x70] sm:$0xff] %vm1417_vm6, %v3341_v18  ;;  %3990 = vmatmul.mubr.f32.gmra.mrb[12].mxu1 %v3722_v17 }
 0x37b   : > { %3045 = vst.msk [vmem:[#allocation3 + $0x80] sm:$0xff] %vm1030_vm4, %v2958_v11  ;;  %2401 = vrot.lane.b32.xlu1 %v3468_v35, %s4685_s24  ;;  %3360 = vrot.lane.b32.xlu0 %v6350_v29, %s4691_s27  ;;  %v3729_v35 = vld [vmem:[#allocation3 + $0x98] sm:$0xff] }
 0x37c   : > { %4544 = vmatprep.mubr.msk.f32.mxu1 %vm257_vm0, %v3725_v32  ;;  %v3475_v32 = vld [vmem:[#allocation2 + $0x129] sm:$0xff] }
 0x37d   : > { %v3533_v47 = vpop.permute.xlu1 %3532  ;;  %v2576_v37 = vpop.permute.xlu0 %2575 }
 0x37e   : > { %3621 = vst.msk [vmem:[#allocation3 + $0x70] sm:$0xff] %vm1610_vm7, %v3533_v47  ;;  %v3735_v47 = vld [vmem:[#allocation3 + $0xc8] sm:$0xff] }
 0x37f   : > { %2662 = vst.msk [vmem:[#allocation3 + $0x90] sm:$0xff] %vm643_vm2, %v2576_v37  ;;  %2593 = vrot.lane.b32.xlu1 %v6310_v50, %s4686_s25  ;;  %3552 = vrot.lane.b32.xlu0 %v3471_v33, %s4692_s28  ;;  %v3727_v50 = vld [vmem:[#allocation3 + $0x88] sm:$0xff] }
 0x381   : > { %v3150_v22 = vpop.permute.xlu1 %3149  ;;  %v2768_v51 = vpop.permute.xlu0 %2767 }
 0x382   : > { %3237 = vst.msk [vmem:[#allocation3 + $0x80] sm:$0xff] %vm1223_vm5, %v3150_v22 }
 0x383   : > { %2854 = vst.msk [vmem:[#allocation3 + $0x90] sm:$0xff] %vm837_vm3, %v2768_v51  ;;  %2785 = vrot.lane.b32.xlu1 %v6348_v16, %s4687_s26  ;;  %2403 = vrot.lane.b32.xlu0 %v3469_v21, %s4685_s24  ;;  %v3731_v21 = vld [vmem:[#allocation3 + $0xa8] sm:$0xff] }
 0x385   : > { %v3343_v63 = vpop.permute.xlu1 %3342  ;;  %v2960_v10 = vpop.permute.xlu0 %2959  ;;  %v3724_v3 = vld [vmem:[#allocation3 + $0x70] sm:$0xff] }
 0x386   : > { %3430 = vst.msk [vmem:[#allocation3 + $0x80] sm:$0xff] %vm1417_vm6, %v3343_v63  ;;  %3995 = vmatmul.mubr.f32.gmra.mrb[14].mxu1 %v3724_v3 }
 0x387   : > { %3046 = vst.msk [vmem:[#allocation3 + $0x90] sm:$0xff] %vm1030_vm4, %v2960_v10  ;;  %2977 = vrot.lane.b32.xlu1 %v6669_v28, %s4689_s21  ;;  %2595 = vrot.lane.b32.xlu0 %v6334_v20, %s4686_s25 }
 0x388   : > { %4545 = vmatprep.mubr.msk.f32.mxu1 %vm257_vm0, %v3727_v50 }
 0x389   : > { %v3535_v16 = vpop.permute.xlu1 %3534  ;;  %v2578_v45 = vpop.permute.xlu0 %2577 }
 0x38a   : > { %3622 = vst.msk [vmem:[#allocation3 + $0x80] sm:$0xff] %vm1610_vm7, %v3535_v16 }
 0x38b   : > { %2663 = vst.msk [vmem:[#allocation3 + $0xa0] sm:$0xff] %vm643_vm2, %v2578_v45  ;;  %3169 = vrot.lane.b32.xlu1 %v6353_v2, %s4690_s22  ;;  %2787 = vrot.lane.b32.xlu0 %v6350_v29, %s4687_s26  ;;  %v3472_v29 = vld [vmem:[#allocation2 + $0x109] sm:$0xff] }
 0x38d   : > { %v3152_v49 = vpop.permute.xlu1 %3151  ;;  %v2770_v31 = vpop.permute.xlu0 %2769 }
 0x38e   : > { %3238 = vst.msk [vmem:[#allocation3 + $0x90] sm:$0xff] %vm1223_vm5, %v3152_v49 }
 0x38f   : > { %2855 = vst.msk [vmem:[#allocation3 + $0xa0] sm:$0xff] %vm837_vm3, %v2770_v31  ;;  %3362 = vrot.lane.b32.xlu1 %v6386_v39, %s4691_s27  ;;  %2979 = vrot.lane.b32.xlu0 %v3471_v33, %s4689_s21 }
 0x391   : > { %v3345_v20 = vpop.permute.xlu1 %3344  ;;  %v2962_v46 = vpop.permute.xlu0 %2961  ;;  %v3726_v4 = vld [vmem:[#allocation3 + $0x80] sm:$0xff] }
 0x392   : > { %3431 = vst.msk [vmem:[#allocation3 + $0x90] sm:$0xff] %vm1417_vm6, %v3345_v20  ;;  %4000 = vmatmul.mubr.f32.gmra.mrb[16].mxu1 %v3726_v4  ;;  %v3739_v20 = vld [vmem:[#allocation3 + $0xe8] sm:$0xff] }
 0x393   : > { %3047 = vst.msk [vmem:[#allocation3 + $0xa0] sm:$0xff] %vm1030_vm4, %v2962_v46  ;;  %3554 = vrot.lane.b32.xlu1 %v3472_v29, %s4692_s28  ;;  %3171 = vrot.lane.b32.xlu0 %v6373_v6, %s4690_s22 }
 0x394   : > { %4546 = vmatprep.mubr.msk.f32.mxu1 %vm257_vm0, %v3729_v35 }
 0x395   : > { %v3537_v44 = vpop.permute.xlu1 %3536  ;;  %v2580_v7 = vpop.permute.xlu0 %2579 }
 0x396   : > { %3623 = vst.msk [vmem:[#allocation3 + $0x90] sm:$0xff] %vm1610_vm7, %v3537_v44 }
 0x397   : > { %2664 = vst.msk [vmem:[#allocation3 + $0xb0] sm:$0xff] %vm643_vm2, %v2580_v7  ;;  %2405 = vrot.lane.b32.xlu1 %v6669_v28, %s4685_s24  ;;  %3364 = vrot.lane.b32.xlu0 %v6388_v8, %s4691_s27 }
 0x399   : > { %v3154_v52 = vpop.permute.xlu1 %3153  ;;  %v2772_v19 = vpop.permute.xlu0 %2771 }
 0x39a   : > { %3239 = vst.msk [vmem:[#allocation3 + $0xa0] sm:$0xff] %vm1223_vm5, %v3154_v52 }
 0x39b   : > { %2856 = vst.msk [vmem:[#allocation3 + $0xb0] sm:$0xff] %vm837_vm3, %v2772_v19  ;;  %2597 = vrot.lane.b32.xlu1 %v6353_v2, %s4686_s25  ;;  %3556 = vrot.lane.b32.xlu0 %v6723_v15, %s4692_s28 }
 0x39d   : > { %v3347_v43 = vpop.permute.xlu1 %3346  ;;  %v2964_v38 = vpop.permute.xlu0 %2963  ;;  %v3728_v36 = vld [vmem:[#allocation3 + $0x90] sm:$0xff] }
 0x39e   : > { %3432 = vst.msk [vmem:[#allocation3 + $0xa0] sm:$0xff] %vm1417_vm6, %v3347_v43  ;;  %4005 = vmatmul.mubr.f32.gmra.mrb[18].mxu1 %v3728_v36 }
 0x39f   : > { %3048 = vst.msk [vmem:[#allocation3 + $0xb0] sm:$0xff] %vm1030_vm4, %v2964_v38  ;;  %2789 = vrot.lane.b32.xlu1 %v6386_v39, %s4687_s26  ;;  %2407 = vrot.lane.b32.xlu0 %v3471_v33, %s4685_s24 }
 0x3a0   : > { %4547 = vmatprep.mubr.msk.f32.mxu1 %vm257_vm0, %v3731_v21 }
 0x3a1   : > { %v3539_v2 = vpop.permute.xlu1 %3538  ;;  %v2582_v58 = vpop.permute.xlu0 %2581 }
 0x3a2   : > { %3624 = vst.msk [vmem:[#allocation3 + $0xa0] sm:$0xff] %vm1610_vm7, %v3539_v2  ;;  %v3743_v2 = vld [vmem:[#allocation3 + $0x108] sm:$0xff] }
 0x3a3   : > { %2665 = vst.msk [vmem:[#allocation3 + $0xc0] sm:$0xff] %vm643_vm2, %v2582_v58  ;;  %2981 = vrot.lane.b32.xlu1 %v3472_v29, %s4689_s21  ;;  %2599 = vrot.lane.b32.xlu0 %v6373_v6, %s4686_s25  ;;  %v3733_v6 = vld [vmem:[#allocation3 + $0xb8] sm:$0xff] }
 0x3a5   : > { %v3156_v9 = vpop.permute.xlu1 %3155  ;;  %v2774_v55 = vpop.permute.xlu0 %2773 }
 0x3a6   : > { %3240 = vst.msk [vmem:[#allocation3 + $0xb0] sm:$0xff] %vm1223_vm5, %v3156_v9 }
 0x3a7   : > { %2857 = vst.msk [vmem:[#allocation3 + $0xc0] sm:$0xff] %vm837_vm3, %v2774_v55  ;;  %3173 = vrot.lane.b32.xlu1 %v6391_v42, %s4690_s22  ;;  %2791 = vrot.lane.b32.xlu0 %v6388_v8, %s4687_s26  ;;  %v3474_v8 = vld [vmem:[#allocation2 + $0x121] sm:$0xff] }
 0x3a9   : > { %v3349_v39 = vpop.permute.xlu1 %3348  ;;  %v2966_v41 = vpop.permute.xlu0 %2965  ;;  %v3730_v26 = vld [vmem:[#allocation3 + $0xa0] sm:$0xff] }
 0x3aa   : > { %3433 = vst.msk [vmem:[#allocation3 + $0xb0] sm:$0xff] %vm1417_vm6, %v3349_v39  ;;  %4010 = vmatmul.mubr.f32.gmra.mrb[20].mxu1 %v3730_v26 }
 0x3ab   : > { %3049 = vst.msk [vmem:[#allocation3 + $0xc0] sm:$0xff] %vm1030_vm4, %v2966_v41  ;;  %3366 = vrot.lane.b32.xlu1 %v6424_v12, %s4691_s27  ;;  %2983 = vrot.lane.b32.xlu0 %v6723_v15, %s4689_s21  ;;  %v6851_v41 = vld [vmem:[#allocation2 + $0x159] sm:$0xff] }
 0x3ac   : > { %4548 = vmatprep.mubr.msk.f32.mxu1 %vm257_vm0, %v3733_v6 }
 0x3ad   : > { %v3541_v53 = vpop.permute.xlu1 %3540  ;;  %v2584_v48 = vpop.permute.xlu0 %2583 }
 0x3ae   : > { %3625 = vst.msk [vmem:[#allocation3 + $0xb0] sm:$0xff] %vm1610_vm7, %v3541_v53 }
 0x3af   : > { %2666 = vst.msk [vmem:[#allocation3 + $0xd0] sm:$0xff] %vm643_vm2, %v2584_v48  ;;  %3558 = vrot.lane.b32.xlu1 %v3474_v8, %s4692_s28  ;;  %3175 = vrot.lane.b32.xlu0 %v6411_v14, %s4690_s22  ;;  %v3745_v48 = vld [vmem:[#allocation3 + $0x118] sm:$0xff] }
 0x3b1   : > { %v3158_v60 = vpop.permute.xlu1 %3157  ;;  %v2776_v28 = vpop.permute.xlu0 %2775 }
 0x3b2   : > { %3241 = vst.msk [vmem:[#allocation3 + $0xc0] sm:$0xff] %vm1223_vm5, %v3158_v60 }
 0x3b3   : > { %2858 = vst.msk [vmem:[#allocation3 + $0xd0] sm:$0xff] %vm837_vm3, %v2776_v28  ;;  %2409 = vrot.lane.b32.xlu1 %v3472_v29, %s4685_s24  ;;  %3368 = vrot.lane.b32.xlu0 %v6426_v54, %s4691_s27  ;;  %v3477_v29 = vld [vmem:[#allocation2 + $0x141] sm:$0xff] }
 0x3b5   : > { %v3351_v18 = vpop.permute.xlu1 %3350  ;;  %v2968_v11 = vpop.permute.xlu0 %2967  ;;  %v3732_v17 = vld [vmem:[#allocation3 + $0xb0] sm:$0xff] }
 0x3b6   : > { %3434 = vst.msk [vmem:[#allocation3 + $0xc0] sm:$0xff] %vm1417_vm6, %v3351_v18  ;;  %4015 = vmatmul.mubr.f32.gmra.mrb[22].mxu1 %v3732_v17  ;;  %v3747_v18 = vld [vmem:[#allocation3 + $0x128] sm:$0xff] }
 0x3b7   : > { %3050 = vst.msk [vmem:[#allocation3 + $0xd0] sm:$0xff] %vm1030_vm4, %v2968_v11  ;;  %2601 = vrot.lane.b32.xlu1 %v6391_v42, %s4686_s25  ;;  %3560 = vrot.lane.b32.xlu0 %v3475_v32, %s4692_s28 }
 0x3b8   : > { %4549 = vmatprep.mubr.msk.f32.mxu1 %vm257_vm0, %v3735_v47  ;;  %v6893_v47 = vld [vmem:[%s7187_s4] ss:$0 sm:$0xff] }
 0x3b9   : > { %v3543_v37 = vpop.permute.xlu1 %3542  ;;  %v2586_v33 = vpop.permute.xlu0 %2585 }
 0x3ba   : > { %3626 = vst.msk [vmem:[#allocation3 + $0xc0] sm:$0xff] %vm1610_vm7, %v3543_v37 }
 0x3bb   : > { %2667 = vst.msk [vmem:[#allocation3 + $0xe0] sm:$0xff] %vm643_vm2, %v2586_v33  ;;  %2793 = vrot.lane.b32.xlu1 %v6424_v12, %s4687_s26  ;;  %2411 = vrot.lane.b32.xlu0 %v6723_v15, %s4685_s24  ;;  %v3737_v12 = vld [vmem:[#allocation3 + $0xd8] sm:$0xff] }
 0x3bd   : > { %v3160_v22 = vpop.permute.xlu1 %3159  ;;  %v2778_v51 = vpop.permute.xlu0 %2777 }
 0x3be   : > { %3242 = vst.msk [vmem:[#allocation3 + $0xd0] sm:$0xff] %vm1223_vm5, %v3160_v22  ;;  %v4569_v22 = vld [vmem:[%s4738_s23 + $0x19] sm:$0xff] }
 0x3bf   : > { %2859 = vst.msk [vmem:[#allocation3 + $0xe0] sm:$0xff] %vm837_vm3, %v2778_v51  ;;  %2985 = vrot.lane.b32.xlu1 %v3474_v8, %s4689_s21  ;;  %2603 = vrot.lane.b32.xlu0 %v6411_v14, %s4686_s25 }
 0x3c1   : > { %v3353_v42 = vpop.permute.xlu1 %3352  ;;  %v2970_v63 = vpop.permute.xlu0 %2969  ;;  %v3734_v10 = vld [vmem:[#allocation3 + $0xc0] sm:$0xff] }
 0x3c2   : > { %3435 = vst.msk [vmem:[#allocation3 + $0xd0] sm:$0xff] %vm1417_vm6, %v3353_v42  ;;  %4020 = vmatmul.mubr.f32.gmra.mrb[24].mxu1 %v3734_v10 }
 0x3c3   : > { %3051 = vst.msk [vmem:[#allocation3 + $0xe0] sm:$0xff] %vm1030_vm4, %v2970_v63  ;;  %3177 = vrot.lane.b32.xlu1 %v6429_v25, %s4690_s22  ;;  %2795 = vrot.lane.b32.xlu0 %v6426_v54, %s4687_s26  ;;  %v6794_v54 = vld [vmem:[#allocation2 + $0x139] sm:$0xff] }
 0x3c4   : > { %4550 = vmatprep.mubr.msk.f32.mxu1 %vm257_vm0, %v3737_v12 }
 0x3c5   : > { %v3545_v3 = vpop.permute.xlu1 %3544  ;;  %v2588_v50 = vpop.permute.xlu0 %2587 }
 0x3c6   : > { %3627 = vst.msk [vmem:[#allocation3 + $0xd0] sm:$0xff] %vm1610_vm7, %v3545_v3 }
 0x3c7   : > { %2668 = vst.msk [vmem:[#allocation3 + $0xf0] sm:$0xff] %vm643_vm2, %v2588_v50  ;;  %3370 = vrot.lane.b32.xlu1 %v6466_v5, %s4691_s27  ;;  %2987 = vrot.lane.b32.xlu0 %v3475_v32, %s4689_s21 }
 0x3c9   : > { %v3162_v14 = vpop.permute.xlu1 %3161  ;;  %v2780_v16 = vpop.permute.xlu0 %2779 }
 0x3ca   : > { %3243 = vst.msk [vmem:[#allocation3 + $0xe0] sm:$0xff] %vm1223_vm5, %v3162_v14  ;;  %v6910_v14 = vld [vmem:[#allocation2 + $0x171] sm:$0xff] }
 0x3cb   : > { %2860 = vst.msk [vmem:[#allocation3 + $0xf0] sm:$0xff] %vm837_vm3, %v2780_v16  ;;  %3562 = vrot.lane.b32.xlu1 %v6794_v54, %s4692_s28  ;;  %3179 = vrot.lane.b32.xlu0 %v6450_v23, %s4690_s22 }
 0x3cd   : > { %v3355_v45 = vpop.permute.xlu1 %3354  ;;  %v2972_v49 = vpop.permute.xlu0 %2971  ;;  %v3736_v31 = vld [vmem:[#allocation3 + $0xd0] sm:$0xff] }
 0x3ce   : > { %3436 = vst.msk [vmem:[#allocation3 + $0xe0] sm:$0xff] %vm1417_vm6, %v3355_v45  ;;  %4025 = vmatmul.mubr.f32.gmra.mrb[26].mxu1 %v3736_v31 }
 0x3cf   : > { %3052 = vst.msk [vmem:[#allocation3 + $0xf0] sm:$0xff] %vm1030_vm4, %v2972_v49  ;;  %2413 = vrot.lane.b32.xlu1 %v3474_v8, %s4685_s24  ;;  %3372 = vrot.lane.b32.xlu0 %v6468_v40, %s4691_s27 }
 0x3d0   : > { %4551 = vmatprep.mubr.msk.f32.mxu1 %vm257_vm0, %v3739_v20  ;;  %v4570_v20 = vld [vmem:[%s4738_s23 + $0x21] sm:$0xff] }
 0x3d1   : > { %v3547_v46 = vpop.permute.xlu1 %3546  ;;  %v2590_v4 = vpop.permute.xlu0 %2589 }
 0x3d2   : > { %3628 = vst.msk [vmem:[#allocation3 + $0xe0] sm:$0xff] %vm1610_vm7, %v3547_v46 }
 0x3d3   : > { %2669 = vst.msk [vmem:[#allocation3 + $0x100] sm:$0xff] %vm643_vm2, %v2590_v4  ;;  %2605 = vrot.lane.b32.xlu1 %v6429_v25, %s4686_s25  ;;  %3564 = vrot.lane.b32.xlu0 %v3477_v29, %s4692_s28  ;;  %v3741_v25 = vld [vmem:[#allocation3 + $0xf8] sm:$0xff] }
 0x3d5   : > { %v3164_v35 = vpop.permute.xlu1 %3163  ;;  %v2782_v44 = vpop.permute.xlu0 %2781 }
 0x3d6   : > { %3244 = vst.msk [vmem:[#allocation3 + $0xf0] sm:$0xff] %vm1223_vm5, %v3164_v35 }
 0x3d7   : > { %2861 = vst.msk [vmem:[#allocation3 + $0x100] sm:$0xff] %vm837_vm3, %v2782_v44  ;;  %2797 = vrot.lane.b32.xlu1 %v6466_v5, %s4687_s26  ;;  %2415 = vrot.lane.b32.xlu0 %v3475_v32, %s4685_s24 }
 0x3d9   : > { %v3357_v7 = vpop.permute.xlu1 %3356  ;;  %v2974_v52 = vpop.permute.xlu0 %2973  ;;  %v3738_v19 = vld [vmem:[#allocation3 + $0xe0] sm:$0xff] }
 0x3da   : > { %3437 = vst.msk [vmem:[#allocation3 + $0xf0] sm:$0xff] %vm1417_vm6, %v3357_v7  ;;  %4030 = vmatmul.mubr.f32.gmra.mrb[28].mxu1 %v3738_v19  ;;  %v3751_v19 = vld [vmem:[#allocation3 + $0x148] sm:$0xff] }
 0x3db   : > { %3053 = vst.msk [vmem:[#allocation3 + $0x100] sm:$0xff] %vm1030_vm4, %v2974_v52  ;;  %2989 = vrot.lane.b32.xlu1 %v6794_v54, %s4689_s21  ;;  %2607 = vrot.lane.b32.xlu0 %v6450_v23, %s4686_s25 }
 0x3dc   : > { %4552 = vmatprep.mubr.msk.f32.mxu1 %vm257_vm0, %v3741_v25 }
 0x3dd   : > { %v3549_v5 = vpop.permute.xlu1 %3548  ;;  %v2592_v15 = vpop.permute.xlu0 %2591 }
 0x3de   : > { %3629 = vst.msk [vmem:[#allocation3 + $0xf0] sm:$0xff] %vm1610_vm7, %v3549_v5  ;;  %v3290_v5 = vld [vmem:[#allocation2 + $0x180] sm:$0xff] }
 0x3df   : > { %2670 = vst.msk [vmem:[#allocation3 + $0x110] sm:$0xff] %vm643_vm2, %v2592_v15  ;;  %3181 = vrot.lane.b32.xlu1 %v6472_v0, %s4690_s22  ;;  %2799 = vrot.lane.b32.xlu0 %v6468_v40, %s4687_s26  ;;  %v6836_v40 = vld [vmem:[#allocation2 + $0x151] sm:$0xff] }
 0x3e1   : > { %v3166_v43 = vpop.permute.xlu1 %3165  ;;  %v2784_v38 = vpop.permute.xlu0 %2783 }
 0x3e2   : > { %3245 = vst.msk [vmem:[#allocation3 + $0x100] sm:$0xff] %vm1223_vm5, %v3166_v43 }
 0x3e3   : > { %2862 = vst.msk [vmem:[#allocation3 + $0x110] sm:$0xff] %vm837_vm3, %v2784_v38  ;;  %3374 = vrot.lane.b32.xlu1 %v6515_v13, %s4691_s27  ;;  %2991 = vrot.lane.b32.xlu0 %v3477_v29, %s4689_s21  ;;  %v4571_v38 = vld [vmem:[%s4738_s23 + $0x31] sm:$0xff] }
 0x3e5   : > { %v3359_v23 = vpop.permute.xlu1 %3358  ;;  %v2976_v36 = vpop.permute.xlu0 %2975  ;;  %v3740_v21 = vld [vmem:[#allocation3 + $0xf0] sm:$0xff] }
 0x3e6   : > { %3438 = vst.msk [vmem:[#allocation3 + $0x100] sm:$0xff] %vm1417_vm6, %v3359_v23  ;;  %4035 = vmatmul.mubr.f32.gmra.mrb[30].mxu1 %v3740_v21  ;;  %v3482_v21 = vld [vmem:[#allocation2 + $0x181] sm:$0xff] }
 0x3e7   : > { %3054 = vst.msk [vmem:[#allocation3 + $0x110] sm:$0xff] %vm1030_vm4, %v2976_v36  ;;  %3566 = vrot.lane.b32.xlu1 %v6836_v40, %s4692_s28  ;;  %3183 = vrot.lane.b32.xlu0 %v6499_v30, %s4690_s22 }
 0x3e8   : > { %4553 = vmatprep.mubr.msk.f32.mxu1 %vm257_vm0, %v3743_v2 }
 0x3e9   : > { %v3551_v58 = vpop.permute.xlu1 %3550  ;;  %v3168_v9 = vpop.permute.xlu0 %3167 }
 0x3ea   : > { %3630 = vst.msk [vmem:[#allocation3 + $0x100] sm:$0xff] %vm1610_vm7, %v3551_v58 }
 0x3eb   : > { %3246 = vst.msk [vmem:[#allocation3 + $0x110] sm:$0xff] %vm1223_vm5, %v3168_v9  ;;  %2417 = vrot.lane.b32.xlu1 %v6794_v54, %s4685_s24  ;;  %3376 = vrot.lane.b32.xlu0 %v6519_v1, %s4691_s27 }
 0x3ed   : > { %v2402_v55 = vpop.permute.xlu1 %2401  ;;  %v3361_v39 = vpop.permute.xlu0 %3360 }
 0x3ee   : > { %2479 = vst.msk [vmem:[#allocation3 + $0x120] sm:$0xff] %vm450_vm1, %v2402_v55  ;;  %v3291_v55 = vld [vmem:[#allocation2 + $0x188] sm:$0xff] }
 0x3ef   : > { %3439 = vst.msk [vmem:[#allocation3 + $0x110] sm:$0xff] %vm1417_vm6, %v3361_v39  ;;  %2609 = vrot.lane.b32.xlu1 %v6472_v0, %s4686_s25  ;;  %3568 = vrot.lane.b32.xlu0 %v6851_v41, %s4692_s28 }
 0x3f1   : > { %v2594_v26 = vpop.permute.xlu1 %2593  ;;  %v3553_v6 = vpop.permute.xlu0 %3552  ;;  %v3742_v53 = vld [vmem:[#allocation3 + $0x100] sm:$0xff] }
 0x3f2   : > { %2671 = vst.msk [vmem:[#allocation3 + $0x120] sm:$0xff] %vm643_vm2, %v2594_v26  ;;  %4040 = vmatmul.mubr.f32.gmra.mrb[32].mxu1 %v3742_v53  ;;  %v3483_v26 = vld [vmem:[#allocation2 + $0x189] sm:$0xff] }
 0x3f3   : > { %3631 = vst.msk [vmem:[#allocation3 + $0x110] sm:$0xff] %vm1610_vm7, %v3553_v6  ;;  %2801 = vrot.lane.b32.xlu1 %v6515_v13, %s4687_s26  ;;  %2419 = vrot.lane.b32.xlu0 %v3477_v29, %s4685_s24 }
 0x3f4   : > { %4554 = vmatprep.mubr.msk.f32.mxu1 %vm257_vm0, %v3745_v48  ;;  %v4572_v48 = vld [vmem:[%s4738_s23 + $0x39] sm:$0xff] }
 0x3f5   : > { %v2786_v0 = vpop.permute.xlu1 %2785  ;;  %v2404_v8 = vpop.permute.xlu0 %2403 }
 0x3f6   : > { %2863 = vst.msk [vmem:[#allocation3 + $0x120] sm:$0xff] %vm837_vm3, %v2786_v0 }
 0x3f7   : > { %2480 = vst.msk [vmem:[#allocation3 + $0x130] sm:$0xff] %vm450_vm1, %v2404_v8  ;;  %2993 = vrot.lane.b32.xlu1 %v6836_v40, %s4689_s21  ;;  %2611 = vrot.lane.b32.xlu0 %v6499_v30, %s4686_s25 }
 0x3f9   : > { %v2978_v60 = vpop.permute.xlu1 %2977  ;;  %v2596_v28 = vpop.permute.xlu0 %2595 }
 0x3fa   : > { %v3744_v13 = vld [vmem:[#allocation3 + $0x110] sm:$0xff]  ;;  %3055 = vst.msk [vmem:[#allocation3 + $0x120] sm:$0xff] %vm1030_vm4, %v2978_v60 }
 0x3fb   : > { %2672 = vst.msk [vmem:[#allocation3 + $0x130] sm:$0xff] %vm643_vm2, %v2596_v28  ;;  %4045 = vmatmul.mubr.f32.gmra.mrb[34].mxu1 %v3744_v13  ;;  %3185 = vrot.lane.b32.xlu1 %v6521_v56, %s4690_s22  ;;  %v3753_v13 = vld [vmem:[#allocation3 + $0x158] sm:$0xff] }
 0x3fc   : > { %2803 = vrot.lane.b32.xlu0 %v6519_v1, %s4687_s26  ;;  %4555 = vmatprep.mubr.msk.f32.mxu1 %vm257_vm0, %v3747_v18  ;;  %v6884_v1 = vld [vmem:[#allocation2 + $0x169] sm:$0xff] }
 0x3fd   : > { %v3170_v11 = vpop.permute.xlu1 %3169  ;;  %v2788_v30 = vpop.permute.xlu0 %2787 }
 0x3fe   : > { %3247 = vst.msk [vmem:[#allocation3 + $0x120] sm:$0xff] %vm1223_vm5, %v3170_v11 }
 0x3ff   : > { %2864 = vst.msk [vmem:[#allocation3 + $0x130] sm:$0xff] %vm837_vm3, %v2788_v30  ;;  %3378 = vrot.lane.b32.xlu1 %v6563_v61, %s4691_s27 }
 0x400   : > { %2995 = vrot.lane.b32.xlu0 %v6851_v41, %s4689_s21 }
 0x401   : > { %v3363_v17 = vpop.permute.xlu1 %3362  ;;  %v2980_v32 = vpop.permute.xlu0 %2979 }
 0x402   : > { %3440 = vst.msk [vmem:[#allocation3 + $0x120] sm:$0xff] %vm1417_vm6, %v3363_v17 }
 0x403   : > { %3056 = vst.msk [vmem:[#allocation3 + $0x130] sm:$0xff] %vm1030_vm4, %v2980_v32  ;;  %3570 = vrot.lane.b32.xlu1 %v6884_v1, %s4692_s28 }
 0x404   : > { %3187 = vrot.lane.b32.xlu0 %v6543_v62, %s4690_s22 }
 0x405   : > { %v3555_v37 = vpop.permute.xlu1 %3554  ;;  %v3961_v33 = vpop.f32.mrb[0].mxu1 }
 0x406   : > { %3632 = vst.msk [vmem:[#allocation3 + $0x120] sm:$0xff] %vm1610_vm7, %v3555_v37  ;;  %v3962_v51 = vadd.f32 %v6893_v47, %v3961_v33  ;;  %v3172_v42 = vpop.permute.xlu0 %3171  ;;  %v3963_v63 = vpop.f32.mrb[1].mxu1  ;;  %v3755_v37 = vld [vmem:[#allocation3 + $0x168] sm:$0xff] }
 0x407   : > { %3248 = vst.msk [vmem:[#allocation3 + $0x130] sm:$0xff] %vm1223_vm5, %v3172_v42  ;;  %2421 = vrot.lane.b32.xlu1 %v6836_v40, %s4685_s24  ;;  %v3292_v33 = vld [vmem:[#allocation2 + $0x198] sm:$0xff] }
 0x408   : > { %3380 = vrot.lane.b32.xlu0 %v6565_v57, %s4691_s27  ;;  %v4152_v10 = vadd.f32 %v4569_v22, %v3962_v51 }
 0x409   : > { %v2406_v12 = vpop.permute.xlu1 %2405 }
 0x40a   : > { %v4184_v3 = vmax.f32 %v4152_v10, 0.0  ;;  %2481 = vst.msk [vmem:[#allocation3 + $0x140] sm:$0xff] %vm450_vm1, %v2406_v12  ;;  %v3365_v50 = vpop.permute.xlu0 %3364  ;;  %v3484_v12 = vld [vmem:[#allocation2 + $0x199] sm:$0xff] }
 0x40b   : > { %3441 = vst.msk [vmem:[#allocation3 + $0x130] sm:$0xff] %vm1417_vm6, %v3365_v50  ;;  %2613 = vrot.lane.b32.xlu1 %v6521_v56, %s4686_s25  ;;  %v3749_v56 = vld [vmem:[#allocation3 + $0x138] sm:$0xff]  ;;  %v3293_v50 = vld [vmem:[#allocation2 + $0x1a0] sm:$0xff] }
 0x40c   : > { %3572 = vrot.lane.b32.xlu0 %v6910_v14, %s4692_s28  ;;  %4216 = vst.msk [vmem:[%s6907_s29] sm:$0xff] %vm257_vm0, %v4184_v3 }
 0x40d   : > { %v2598_v16 = vpop.permute.xlu1 %2597  ;;  %v3746_v54 = vld [vmem:[#allocation3 + $0x120] sm:$0xff] }
 0x40e   : > { %2673 = vst.msk [vmem:[#allocation3 + $0x140] sm:$0xff] %vm643_vm2, %v2598_v16  ;;  %v3557_v45 = vpop.permute.xlu0 %3556  ;;  %4050 = vmatmul.mubr.f32.gmra.mrb[36].mxu1 %v3746_v54 }
 0x40f   : > { %3633 = vst.msk [vmem:[#allocation3 + $0x130] sm:$0xff] %vm1610_vm7, %v3557_v45  ;;  %2805 = vrot.lane.b32.xlu1 %v6563_v61, %s4687_s26  ;;  %4556 = vmatprep.mubr.msk.f32.mxu1 %vm257_vm0, %v3749_v56  ;;  %v3485_v56 = vld [vmem:[#allocation2 + $0x1a1] sm:$0xff] }
 0x410   : > { %2423 = vrot.lane.b32.xlu0 %v6851_v41, %s4685_s24 }
 0x411   : > { %v2790_v49 = vpop.permute.xlu1 %2789  ;;  %v3966_v31 = vpop.f32.mrb[2].mxu1 }
 0x412   : > { %2865 = vst.msk [vmem:[#allocation3 + $0x140] sm:$0xff] %vm837_vm3, %v2790_v49  ;;  %v3967_v46 = vadd.f32 %v6893_v47, %v3966_v31  ;;  %v2408_v4 = vpop.permute.xlu0 %2407  ;;  %v3968_v29 = vpop.f32.mrb[3].mxu1 }
 0x413   : > { %2482 = vst.msk [vmem:[#allocation3 + $0x150] sm:$0xff] %vm450_vm1, %v2408_v4  ;;  %2997 = vrot.lane.b32.xlu1 %v6884_v1, %s4689_s21 }
 0x414   : > { %2615 = vrot.lane.b32.xlu0 %v6543_v62, %s4686_s25  ;;  %v4153_v61 = vadd.f32 %v4570_v20, %v3967_v46  ;;  %v4574_v20 = vld [vmem:[%s4738_s23 + $0x51] sm:$0xff] }
 0x415   : > { %v2982_v35 = vpop.permute.xlu1 %2981 }
 0x416   : > { %v4185_v44 = vmax.f32 %v4153_v61, 0.0  ;;  %3057 = vst.msk [vmem:[#allocation3 + $0x140] sm:$0xff] %vm1030_vm4, %v2982_v35  ;;  %v2600_v7 = vpop.permute.xlu0 %2599  ;;  %v3748_v52 = vld [vmem:[#allocation3 + $0x130] sm:$0xff] }
 0x417   : > { %2674 = vst.msk [vmem:[#allocation3 + $0x150] sm:$0xff] %vm643_vm2, %v2600_v7  ;;  %4055 = vmatmul.mubr.f32.gmra.mrb[38].mxu1 %v3748_v52  ;;  %3189 = vrot.lane.b32.xlu1 %v6571_v27, %s4690_s22  ;;  %v3757_v52 = vld [vmem:[#allocation3 + $0x178] sm:$0xff] }
 0x418   : > { %4217 = vst.msk [vmem:[%s6907_s29 + $0x8] sm:$0xff] %vm257_vm0, %v4185_v44  ;;  %2807 = vrot.lane.b32.xlu0 %v6565_v57, %s4687_s26  ;;  %4557 = vmatprep.mubr.msk.f32.mxu1 %vm257_vm0, %v3751_v19 }
 0x419   : > { %v3174_v62 = vpop.permute.xlu1 %3173 }
 0x41a   : > { %3249 = vst.msk [vmem:[#allocation3 + $0x140] sm:$0xff] %vm1223_vm5, %v3174_v62  ;;  %v2792_v25 = vpop.permute.xlu0 %2791 }
 0x41b   : > { %2866 = vst.msk [vmem:[#allocation3 + $0x150] sm:$0xff] %vm837_vm3, %v2792_v25  ;;  %3382 = vrot.lane.b32.xlu1 %v3290_v5, %s4691_s27 }
 0x41c   : > { %2999 = vrot.lane.b32.xlu0 %v6910_v14, %s4689_s21 }
 0x41d   : > { %v3367_v15 = vpop.permute.xlu1 %3366  ;;  %v3971_v43 = vpop.f32.mrb[4].mxu1 }
 0x41e   : > { %3442 = vst.msk [vmem:[#allocation3 + $0x140] sm:$0xff] %vm1417_vm6, %v3367_v15  ;;  %v2984_v57 = vpop.permute.xlu0 %2983  ;;  %v3972_v23 = vadd.f32 %v6893_v47, %v3971_v43  ;;  %v3973_v36 = vpop.f32.mrb[5].mxu1  ;;  %v4575_v15 = vld [vmem:[%s4738_s23 + $0x61] sm:$0xff] }
 0x41f   : > { %3058 = vst.msk [vmem:[#allocation3 + $0x150] sm:$0xff] %vm1030_vm4, %v2984_v57  ;;  %3574 = vrot.lane.b32.xlu1 %v3482_v21, %s4692_s28  ;;  %v3759_v36 = vld [vmem:[#allocation3 + $0x188] sm:$0xff] }
 0x420   : > { %v4154_v40 = vadd.f32 %v4571_v38, %v3972_v23  ;;  %3191 = vrot.lane.b32.xlu0 %v6595_v24, %s4690_s22 }
 0x421   : > { %v3559_v2 = vpop.permute.xlu1 %3558 }
 0x422   : > { %v4186_v58 = vmax.f32 %v4154_v40, 0.0  ;;  %3634 = vst.msk [vmem:[#allocation3 + $0x140] sm:$0xff] %vm1610_vm7, %v3559_v2  ;;  %v3176_v9 = vpop.permute.xlu0 %3175 }
 0x423   : > { %3250 = vst.msk [vmem:[#allocation3 + $0x150] sm:$0xff] %vm1223_vm5, %v3176_v9  ;;  %2425 = vrot.lane.b32.xlu1 %v6884_v1, %s4685_s24 }
 0x424   : > { %4218 = vst.msk [vmem:[%s6907_s29 + $0x10] sm:$0xff] %vm257_vm0, %v4186_v58  ;;  %3384 = vrot.lane.b32.xlu0 %v3291_v55, %s4691_s27 }
 0x425   : > { %v2410_v39 = vpop.permute.xlu1 %2409 }
 0x426   : > { %2483 = vst.msk [vmem:[#allocation3 + $0x160] sm:$0xff] %vm450_vm1, %v2410_v39  ;;  %v3369_v41 = vpop.permute.xlu0 %3368 }
 0x427   : > { %3443 = vst.msk [vmem:[#allocation3 + $0x150] sm:$0xff] %vm1417_vm6, %v3369_v41  ;;  %2617 = vrot.lane.b32.xlu1 %v6571_v27, %s4686_s25 }
 0x428   : > { %3576 = vrot.lane.b32.xlu0 %v3483_v26, %s4692_s28 }
 0x429   : > { %v2602_v6 = vpop.permute.xlu1 %2601  ;;  %v3976_v53 = vpop.f32.mrb[6].mxu1  ;;  %v3750_v0 = vld [vmem:[#allocation3 + $0x140] sm:$0xff] }
 0x42a   : > { %2675 = vst.msk [vmem:[#allocation3 + $0x160] sm:$0xff] %vm643_vm2, %v2602_v6  ;;  %v3561_v8 = vpop.permute.xlu0 %3560  ;;  %v3977_v60 = vadd.f32 %v6893_v47, %v3976_v53  ;;  %v3978_v28 = vpop.f32.mrb[7].mxu1  ;;  %4060 = vmatmul.mubr.f32.gmra.mrb[40].mxu1 %v3750_v0 }
 0x42b   : > { %3635 = vst.msk [vmem:[#allocation3 + $0x150] sm:$0xff] %vm1610_vm7, %v3561_v8  ;;  %2809 = vrot.lane.b32.xlu1 %v3290_v5, %s4687_s26  ;;  %4558 = vmatprep.mubr.msk.f32.mxu1 %vm257_vm0, %v3753_v13 }
 0x42c   : > { %v4155_v27 = vadd.f32 %v4572_v48, %v3977_v60  ;;  %2427 = vrot.lane.b32.xlu0 %v6910_v14, %s4685_s24 }
 0x42d   : > { %v2794_v18 = vpop.permute.xlu1 %2793 }
 0x42e   : > { %v4187_v11 = vmax.f32 %v4155_v27, 0.0  ;;  %2867 = vst.msk [vmem:[#allocation3 + $0x160] sm:$0xff] %vm837_vm3, %v2794_v18  ;;  %v2412_v30 = vpop.permute.xlu0 %2411 }
 0x42f   : > { %2484 = vst.msk [vmem:[#allocation3 + $0x170] sm:$0xff] %vm450_vm1, %v2412_v30  ;;  %3001 = vrot.lane.b32.xlu1 %v3482_v21, %s4689_s21 }
 0x430   : > { %4219 = vst.msk [vmem:[%s6907_s29 + $0x18] sm:$0xff] %vm257_vm0, %v4187_v11  ;;  %2619 = vrot.lane.b32.xlu0 %v6595_v24, %s4686_s25  ;;  %v4573_v24 = vld [vmem:[%s4738_s23 + $0x49] sm:$0xff] }
 0x431   : > { %v2986_v17 = vpop.permute.xlu1 %2985  ;;  %v3761_v11 = vld [vmem:[#allocation3 + $0x198] sm:$0xff] }
 0x432   : > { %3059 = vst.msk [vmem:[#allocation3 + $0x160] sm:$0xff] %vm1030_vm4, %v2986_v17  ;;  %v2604_v32 = vpop.permute.xlu0 %2603  ;;  %v3752_v1 = vld [vmem:[#allocation3 + $0x150] sm:$0xff] }
 0x433   : > { %2676 = vst.msk [vmem:[#allocation3 + $0x170] sm:$0xff] %vm643_vm2, %v2604_v32  ;;  %4065 = vmatmul.mubr.f32.gmra.mrb[42].mxu1 %v3752_v1  ;;  %3193 = vrot.lane.b32.xlu1 %v6618_v59, %s4690_s22  ;;  %v4577_v32 = vld [vmem:[%s4738_s23 + $0x79] sm:$0xff] }
 0x434   : > { %2811 = vrot.lane.b32.xlu0 %v3291_v55, %s4687_s26  ;;  %4559 = vmatprep.mubr.msk.f32.mxu1 %vm257_vm0, %v3755_v37 }
 0x435   : > { %v3178_v22 = vpop.permute.xlu1 %3177  ;;  %v3981_v51 = vpop.f32.mrb[8].mxu1 }
 0x436   : > { %3251 = vst.msk [vmem:[#allocation3 + $0x160] sm:$0xff] %vm1223_vm5, %v3178_v22  ;;  %v2796_v42 = vpop.permute.xlu0 %2795  ;;  %v3982_v63 = vadd.f32 %v6893_v47, %v3981_v51  ;;  %v3983_v10 = vpop.f32.mrb[9].mxu1 }
 0x437   : > { %2868 = vst.msk [vmem:[#allocation3 + $0x170] sm:$0xff] %vm837_vm3, %v2796_v42  ;;  %3386 = vrot.lane.b32.xlu1 %v3292_v33, %s4691_s27  ;;  %v3763_v10 = vld [vmem:[#allocation3 + $0x1a8] sm:$0xff] }
 0x438   : > { %v4156_v59 = vadd.f32 %v4573_v24, %v3982_v63  ;;  %3003 = vrot.lane.b32.xlu0 %v3483_v26, %s4689_s21  ;;  %v4576_v26 = vld [vmem:[%s4738_s23 + $0x69] sm:$0xff] }
 0x439   : > { %v3371_v3 = vpop.permute.xlu1 %3370 }
 0x43a   : > { %v4188_v14 = vmax.f32 %v4156_v59, 0.0  ;;  %3444 = vst.msk [vmem:[#allocation3 + $0x160] sm:$0xff] %vm1417_vm6, %v3371_v3  ;;  %v2988_v16 = vpop.permute.xlu0 %2987 }
 0x43b   : > { %3060 = vst.msk [vmem:[#allocation3 + $0x170] sm:$0xff] %vm1030_vm4, %v2988_v16  ;;  %3578 = vrot.lane.b32.xlu1 %v3484_v12, %s4692_s28 }
 0x43c   : > { %4220 = vst.msk [vmem:[%s6907_s29 + $0x20] sm:$0xff] %vm257_vm0, %v4188_v14  ;;  %3388 = vrot.lane.b32.xlu0 %v3293_v50, %s4691_s27  ;;  %v4578_v14 = vld [vmem:[%s4738_s23 + $0x81] sm:$0xff] }
 0x43d   : > { %v3563_v54 = vpop.permute.xlu1 %3562 }
 0x43e   : > { %3636 = vst.msk [vmem:[#allocation3 + $0x160] sm:$0xff] %vm1610_vm7, %v3563_v54  ;;  %v3180_v45 = vpop.permute.xlu0 %3179 }
 0x43f   : > { %3252 = vst.msk [vmem:[#allocation3 + $0x170] sm:$0xff] %vm1223_vm5, %v3180_v45  ;;  %3195 = vrot.lane.b32.xlu1 %v6631_v34, %s4690_s22 }
 0x441   : > { %v2414_v49 = vpop.permute.xlu1 %2413  ;;  %v3986_v31 = vpop.f32.mrb[10].mxu1 }
 0x442   : > { %2485 = vst.msk [vmem:[#allocation3 + $0x180] sm:$0xff] %vm450_vm1, %v2414_v49  ;;  %v3373_v46 = vpop.permute.xlu0 %3372  ;;  %v3987_v4 = vadd.f32 %v6893_v47, %v3986_v31  ;;  %v3988_v29 = vpop.f32.mrb[11].mxu1 }
 0x443   : > { %3445 = vst.msk [vmem:[#allocation3 + $0x170] sm:$0xff] %vm1417_vm6, %v3373_v46  ;;  %3580 = vrot.lane.b32.xlu1 %v3485_v56, %s4692_s28 }
 0x444   : > { %v4157_v61 = vadd.f32 %v4574_v20, %v3987_v4 }
 0x445   : > { %v2606_v35 = vpop.permute.xlu1 %2605  ;;  %v3754_v44 = vld [vmem:[#allocation3 + $0x160] sm:$0xff] }
 0x446   : > { %v4189_v34 = vmax.f32 %v4157_v61, 0.0  ;;  %2677 = vst.msk [vmem:[#allocation3 + $0x180] sm:$0xff] %vm643_vm2, %v2606_v35  ;;  %v3565_v7 = vpop.permute.xlu0 %3564  ;;  %4070 = vmatmul.mubr.f32.gmra.mrb[44].mxu1 %v3754_v44  ;;  %v4579_v35 = vld [vmem:[%s4738_s23 + $0x91] sm:$0xff] }
 0x447   : > { %3637 = vst.msk [vmem:[#allocation3 + $0x170] sm:$0xff] %vm1610_vm7, %v3565_v7  ;;  %4560 = vmatprep.mubr.msk.f32.mxu1 %vm257_vm0, %v3757_v52 }
 0x448   : > { %4221 = vst.msk [vmem:[%s6907_s29 + $0x28] sm:$0xff] %vm257_vm0, %v4189_v34 }
 0x449   : > { %v2798_v19 = vpop.permute.xlu1 %2797 }
 0x44a   : > { %2869 = vst.msk [vmem:[#allocation3 + $0x180] sm:$0xff] %vm837_vm3, %v2798_v19  ;;  %v2416_v62 = vpop.permute.xlu0 %2415  ;;  %v3765_v19 = vld [vmem:[#allocation3 + $0x1b8] sm:$0xff] }
 0x44b   : > { %2486 = vst.msk [vmem:[#allocation3 + $0x190] sm:$0xff] %vm450_vm1, %v2416_v62 }
 0x44d   : > { %v2990_v25 = vpop.permute.xlu1 %2989  ;;  %v3991_v5 = vpop.f32.mrb[12].mxu1 }
 0x44e   : > { %3061 = vst.msk [vmem:[#allocation3 + $0x180] sm:$0xff] %vm1030_vm4, %v2990_v25  ;;  %v2608_v43 = vpop.permute.xlu0 %2607  ;;  %v3992_v38 = vadd.f32 %v6893_v47, %v3991_v5  ;;  %v3993_v57 = vpop.f32.mrb[13].mxu1  ;;  %v3756_v23 = vld [vmem:[#allocation3 + $0x170] sm:$0xff] }
 0x44f   : > { %2678 = vst.msk [vmem:[#allocation3 + $0x190] sm:$0xff] %vm643_vm2, %v2608_v43  ;;  %4075 = vmatmul.mubr.f32.gmra.mrb[46].mxu1 %v3756_v23  ;;  %v3767_v23 = vld [vmem:[#allocation3 + $0x1c8] sm:$0xff] }
 0x450   : > { %v4158_v21 = vadd.f32 %v4575_v15, %v3992_v38  ;;  %4561 = vmatprep.mubr.msk.f32.mxu1 %vm257_vm0, %v3759_v36 }
 0x451   : > { %v3182_v40 = vpop.permute.xlu1 %3181 }
 0x452   : > { %v4190_v2 = vmax.f32 %v4158_v21, 0.0  ;;  %3253 = vst.msk [vmem:[#allocation3 + $0x180] sm:$0xff] %vm1223_vm5, %v3182_v40  ;;  %v2800_v58 = vpop.permute.xlu0 %2799  ;;  %v4580_v40 = vld [vmem:[%s4738_s23 + $0x99] sm:$0xff] }
 0x453   : > { %2870 = vst.msk [vmem:[#allocation3 + $0x190] sm:$0xff] %vm837_vm3, %v2800_v58 }
 0x454   : > { %4222 = vst.msk [vmem:[%s6907_s29 + $0x30] sm:$0xff] %vm257_vm0, %v4190_v2 }
 0x455   : > { %v3375_v9 = vpop.permute.xlu1 %3374 }
 0x456   : > { %3446 = vst.msk [vmem:[#allocation3 + $0x180] sm:$0xff] %vm1417_vm6, %v3375_v9  ;;  %v2992_v55 = vpop.permute.xlu0 %2991 }
 0x457   : > { %3062 = vst.msk [vmem:[#allocation3 + $0x190] sm:$0xff] %vm1030_vm4, %v2992_v55 }
 0x459   : > { %v3567_v39 = vpop.permute.xlu1 %3566  ;;  %v3996_v41 = vpop.f32.mrb[14].mxu1 }
 0x45a   : > { %3638 = vst.msk [vmem:[#allocation3 + $0x180] sm:$0xff] %vm1610_vm7, %v3567_v39  ;;  %v3184_v6 = vpop.permute.xlu0 %3183  ;;  %v3997_v53 = vadd.f32 %v6893_v47, %v3996_v41  ;;  %v3998_v48 = vpop.f32.mrb[15].mxu1 }
 0x45b   : > { %3254 = vst.msk [vmem:[#allocation3 + $0x190] sm:$0xff] %vm1223_vm5, %v3184_v6 }
 0x45c   : > { %v4159_v0 = vadd.f32 %v4576_v26, %v3997_v53 }
 0x45d   : > { %v2418_v8 = vpop.permute.xlu1 %2417 }
 0x45e   : > { %v4191_v60 = vmax.f32 %v4159_v0, 0.0  ;;  %2487 = vst.msk [vmem:[#allocation3 + $0x1a0] sm:$0xff] %vm450_vm1, %v2418_v8  ;;  %v3377_v28 = vpop.permute.xlu0 %3376  ;;  %v4581_v8 = vld [vmem:[%s4738_s23 + $0xa9] sm:$0xff] }
 0x45f   : > { %3447 = vst.msk [vmem:[#allocation3 + $0x190] sm:$0xff] %vm1417_vm6, %v3377_v28 }
 0x460   : > { %4223 = vst.msk [vmem:[%s6907_s29 + $0x38] sm:$0xff] %vm257_vm0, %v4191_v60 }
 0x461   : > { %v2610_v13 = vpop.permute.xlu1 %2609  ;;  %v3758_v27 = vld [vmem:[#allocation3 + $0x180] sm:$0xff] }
 0x462   : > { %2679 = vst.msk [vmem:[#allocation3 + $0x1a0] sm:$0xff] %vm643_vm2, %v2610_v13  ;;  %v3569_v18 = vpop.permute.xlu0 %3568  ;;  %4080 = vmatmul.mubr.f32.gmra.mrb[48].mxu1 %v3758_v27 }
 0x463   : > { %3639 = vst.msk [vmem:[#allocation3 + $0x190] sm:$0xff] %vm1610_vm7, %v3569_v18  ;;  %4562 = vmatprep.mubr.msk.f32.mxu1 %vm257_vm0, %v3761_v11 }
 0x465   : > { %v2802_v30 = vpop.permute.xlu1 %2801  ;;  %v4001_v17 = vpop.f32.mrb[16].mxu1 }
 0x466   : > { %2871 = vst.msk [vmem:[#allocation3 + $0x1a0] sm:$0xff] %vm837_vm3, %v2802_v30  ;;  %v2420_v1 = vpop.permute.xlu0 %2419  ;;  %v4002_v37 = vadd.f32 %v6893_v47, %v4001_v17  ;;  %v4003_v33 = vpop.f32.mrb[17].mxu1 }
 0x467   : > { %2488 = vst.msk [vmem:[#allocation3 + $0x1b0] sm:$0xff] %vm450_vm1, %v2420_v1 }
 0x468   : > { %v4160_v22 = vadd.f32 %v4577_v32, %v4002_v37  ;;  %v3769_v32 = vld [vmem:[#allocation3 + $0x1d8] sm:$0xff] }
 0x469   : > { %v2994_v51 = vpop.permute.xlu1 %2993 }
 0x46a   : > { %v4192_v24 = vmax.f32 %v4160_v22, 0.0  ;;  %3063 = vst.msk [vmem:[#allocation3 + $0x1a0] sm:$0xff] %vm1030_vm4, %v2994_v51  ;;  %v2612_v42 = vpop.permute.xlu0 %2611  ;;  %v3760_v63 = vld [vmem:[#allocation3 + $0x190] sm:$0xff]  ;;  %v4582_v51 = vld [vmem:[%s4738_s23 + $0xb1] sm:$0xff] }
 0x46b   : > { %2680 = vst.msk [vmem:[#allocation3 + $0x1b0] sm:$0xff] %vm643_vm2, %v2612_v42  ;;  %4085 = vmatmul.mubr.f32.gmra.mrb[50].mxu1 %v3760_v63 }
 0x46c   : > { %4224 = vst.msk [vmem:[%s6907_s29 + $0x40] sm:$0xff] %vm257_vm0, %v4192_v24  ;;  %4563 = vmatprep.mubr.msk.f32.mxu1 %vm257_vm0, %v3763_v10  ;;  %v3771_v24 = vld [vmem:[#allocation3 + $0x1e8] sm:$0xff] }
 0x46d   : > { %v3186_v59 = vpop.permute.xlu1 %3185 }
 0x46e   : > { %3255 = vst.msk [vmem:[#allocation3 + $0x1a0] sm:$0xff] %vm1223_vm5, %v3186_v59  ;;  %v2804_v12 = vpop.permute.xlu0 %2803 }
 0x46f   : > { %2872 = vst.msk [vmem:[#allocation3 + $0x1b0] sm:$0xff] %vm837_vm3, %v2804_v12 }
 0x471   : > { %v3379_v3 = vpop.permute.xlu1 %3378  ;;  %v4006_v50 = vpop.f32.mrb[18].mxu1 }
 0x472   : > { %3448 = vst.msk [vmem:[#allocation3 + $0x1a0] sm:$0xff] %vm1417_vm6, %v3379_v3  ;;  %v2996_v16 = vpop.permute.xlu0 %2995  ;;  %v4007_v54 = vadd.f32 %v6893_v47, %v4006_v50  ;;  %v4008_v45 = vpop.f32.mrb[19].mxu1 }
 0x473   : > { %3064 = vst.msk [vmem:[#allocation3 + $0x1b0] sm:$0xff] %vm1030_vm4, %v2996_v16 }
 0x474   : > { %v4161_v56 = vadd.f32 %v4578_v14, %v4007_v54 }
 0x475   : > { %v3571_v49 = vpop.permute.xlu1 %3570 }
 0x476   : > { %v4193_v31 = vmax.f32 %v4161_v56, 0.0  ;;  %3640 = vst.msk [vmem:[#allocation3 + $0x1a0] sm:$0xff] %vm1610_vm7, %v3571_v49  ;;  %v3188_v20 = vpop.permute.xlu0 %3187  ;;  %v4583_v49 = vld [vmem:[%s4738_s23 + $0xc1] sm:$0xff] }
 0x477   : > { %3256 = vst.msk [vmem:[#allocation3 + $0x1b0] sm:$0xff] %vm1223_vm5, %v3188_v20 }
 0x478   : > { %4225 = vst.msk [vmem:[%s6907_s29 + $0x48] sm:$0xff] %vm257_vm0, %v4193_v31 }
 0x479   : > { %v2422_v46 = vpop.permute.xlu1 %2421 }
 0x47a   : > { %2489 = vst.msk [vmem:[#allocation3 + $0x1c0] sm:$0xff] %vm450_vm1, %v2422_v46  ;;  %v3381_v4 = vpop.permute.xlu0 %3380 }
 0x47b   : > { %3449 = vst.msk [vmem:[#allocation3 + $0x1b0] sm:$0xff] %vm1417_vm6, %v3381_v4 }
 0x47d   : > { %v2614_v29 = vpop.permute.xlu1 %2613  ;;  %v4011_v61 = vpop.f32.mrb[20].mxu1  ;;  %v3762_v44 = vld [vmem:[#allocation3 + $0x1a0] sm:$0xff] }
 0x47e   : > { %2681 = vst.msk [vmem:[#allocation3 + $0x1c0] sm:$0xff] %vm643_vm2, %v2614_v29  ;;  %v3573_v34 = vpop.permute.xlu0 %3572  ;;  %v4012_v7 = vadd.f32 %v6893_v47, %v4011_v61  ;;  %v4013_v52 = vpop.f32.mrb[21].mxu1  ;;  %4090 = vmatmul.mubr.f32.gmra.mrb[52].mxu1 %v3762_v44 }
 0x47f   : > { %3641 = vst.msk [vmem:[#allocation3 + $0x1b0] sm:$0xff] %vm1610_vm7, %v3573_v34  ;;  %4564 = vmatprep.mubr.msk.f32.mxu1 %vm257_vm0, %v3765_v19  ;;  %v4584_v52 = vld [vmem:[%s4738_s23 + $0xc9] sm:$0xff] }
 0x480   : > { %v4162_v62 = vadd.f32 %v4579_v35, %v4012_v7  ;;  %v3773_v35 = vld [vmem:[#allocation3 + $0x1f8] sm:$0xff] }
 0x481   : > { %v2806_v25 = vpop.permute.xlu1 %2805 }
 0x482   : > { %v4194_v5 = vmax.f32 %v4162_v62, 0.0  ;;  %2873 = vst.msk [vmem:[#allocation3 + $0x1c0] sm:$0xff] %vm837_vm3, %v2806_v25  ;;  %v2424_v15 = vpop.permute.xlu0 %2423 }
 0x483   : > { %2490 = vst.msk [vmem:[#allocation3 + $0x1d0] sm:$0xff] %vm450_vm1, %v2424_v15 }
 0x484   : > { %4226 = vst.msk [vmem:[%s6907_s29 + $0x50] sm:$0xff] %vm257_vm0, %v4194_v5 }
 0x485   : > { %v2998_v43 = vpop.permute.xlu1 %2997 }
 0x486   : > { %3065 = vst.msk [vmem:[#allocation3 + $0x1c0] sm:$0xff] %vm1030_vm4, %v2998_v43  ;;  %v2616_v38 = vpop.permute.xlu0 %2615  ;;  %v3764_v57 = vld [vmem:[#allocation3 + $0x1b0] sm:$0xff] }
 0x487   : > { %2682 = vst.msk [vmem:[#allocation3 + $0x1d0] sm:$0xff] %vm643_vm2, %v2616_v38  ;;  %4095 = vmatmul.mubr.f32.gmra.mrb[54].mxu1 %v3764_v57  ;;  %v4585_v38 = vld [vmem:[%s4738_s23 + $0xd9] sm:$0xff] }
 0x488   : > { %4565 = vmatprep.mubr.msk.f32.mxu1 %vm257_vm0, %v3767_v23 }
 0x489   : > { %v3190_v36 = vpop.permute.xlu1 %3189  ;;  %v4016_v21 = vpop.f32.mrb[22].mxu1 }
 0x48a   : > { %3257 = vst.msk [vmem:[#allocation3 + $0x1c0] sm:$0xff] %vm1223_vm5, %v3190_v36  ;;  %v2808_v2 = vpop.permute.xlu0 %2807  ;;  %v4017_v58 = vadd.f32 %v6893_v47, %v4016_v21  ;;  %v4018_v9 = vpop.f32.mrb[23].mxu1 }
 0x48b   : > { %2874 = vst.msk [vmem:[#allocation3 + $0x1d0] sm:$0xff] %vm837_vm3, %v2808_v2  ;;  %v4586_v2 = vld [vmem:[%s4738_s23 + $0xe1] sm:$0xff] }
 0x48c   : > { %v4163_v55 = vadd.f32 %v4580_v40, %v4017_v58 }
 0x48d   : > { %v3383_v39 = vpop.permute.xlu1 %3382 }
 0x48e   : > { %v4195_v41 = vmax.f32 %v4163_v55, 0.0  ;;  %3450 = vst.msk [vmem:[#allocation3 + $0x1c0] sm:$0xff] %vm1417_vm6, %v3383_v39  ;;  %v3000_v26 = vpop.permute.xlu0 %2999 }
 0x48f   : > { %3066 = vst.msk [vmem:[#allocation3 + $0x1d0] sm:$0xff] %vm1030_vm4, %v3000_v26  ;;  %v4587_v26 = vld [vmem:[%s4738_s23 + $0xf1] sm:$0xff] }
 0x490   : > { %4227 = vst.msk [vmem:[%s6907_s29 + $0x58] sm:$0xff] %vm257_vm0, %v4195_v41 }
 0x491   : > { %v3575_v6 = vpop.permute.xlu1 %3574 }
 0x492   : > { %3642 = vst.msk [vmem:[#allocation3 + $0x1c0] sm:$0xff] %vm1610_vm7, %v3575_v6  ;;  %v3192_v53 = vpop.permute.xlu0 %3191 }
 0x493   : > { %3258 = vst.msk [vmem:[#allocation3 + $0x1d0] sm:$0xff] %vm1223_vm5, %v3192_v53 }
 0x495   : > { %v2426_v48 = vpop.permute.xlu1 %2425  ;;  %v4021_v0 = vpop.f32.mrb[24].mxu1 }
 0x496   : > { %2491 = vst.msk [vmem:[#allocation3 + $0x1e0] sm:$0xff] %vm450_vm1, %v2426_v48  ;;  %v3385_v60 = vpop.permute.xlu0 %3384  ;;  %v4022_v28 = vadd.f32 %v6893_v47, %v4021_v0  ;;  %v4023_v13 = vpop.f32.mrb[25].mxu1 }
 0x497   : > { %3451 = vst.msk [vmem:[#allocation3 + $0x1d0] sm:$0xff] %vm1417_vm6, %v3385_v60  ;;  %v4588_v60 = vld [vmem:[%s4738_s23 + $0xf9] sm:$0xff] }
 0x498   : > { %v4164_v27 = vadd.f32 %v4581_v8, %v4022_v28 }
 0x499   : > { %v2618_v18 = vpop.permute.xlu1 %2617  ;;  %v3766_v11 = vld [vmem:[#allocation3 + $0x1c0] sm:$0xff] }
 0x49a   : > { %v4196_v30 = vmax.f32 %v4164_v27, 0.0  ;;  %2683 = vst.msk [vmem:[#allocation3 + $0x1e0] sm:$0xff] %vm643_vm2, %v2618_v18  ;;  %v3577_v17 = vpop.permute.xlu0 %3576  ;;  %4100 = vmatmul.mubr.f32.gmra.mrb[56].mxu1 %v3766_v11 }
 0x49b   : > { %3643 = vst.msk [vmem:[#allocation3 + $0x1d0] sm:$0xff] %vm1610_vm7, %v3577_v17  ;;  %4566 = vmatprep.mubr.msk.f32.mxu1 %vm257_vm0, %v3769_v32 }
 0x49c   : > { %4228 = vst.msk [vmem:[%s6907_s29 + $0x60] sm:$0xff] %vm257_vm0, %v4196_v30  ;;  %v4589_v30 = vld [vmem:[%s4738_s23 + $0x109] sm:$0xff] }
 0x49d   : > { %v2810_v1 = vpop.permute.xlu1 %2809 }
 0x49e   : > { %2875 = vst.msk [vmem:[#allocation3 + $0x1e0] sm:$0xff] %vm837_vm3, %v2810_v1  ;;  %v2428_v37 = vpop.permute.xlu0 %2427 }
 0x49f   : > { %2492 = vst.msk [vmem:[#allocation3 + $0x1f0] sm:$0xff] %vm450_vm1, %v2428_v37 }
 0x4a1   : > { %v3002_v33 = vpop.permute.xlu1 %3001  ;;  %v4026_v22 = vpop.f32.mrb[26].mxu1 }
 0x4a2   : > { %3067 = vst.msk [vmem:[#allocation3 + $0x1e0] sm:$0xff] %vm1030_vm4, %v3002_v33  ;;  %v2620_v42 = vpop.permute.xlu0 %2619  ;;  %v4027_v63 = vadd.f32 %v6893_v47, %v4026_v22  ;;  %v4028_v10 = vpop.f32.mrb[27].mxu1  ;;  %v3768_v59 = vld [vmem:[#allocation3 + $0x1d0] sm:$0xff]  ;;  %v4590_v22 = vld [vmem:[%s4738_s23 + $0x111] sm:$0xff] }
 0x4a3   : > { %2684 = vst.msk [vmem:[#allocation3 + $0x1f0] sm:$0xff] %vm643_vm2, %v2620_v42  ;;  %4105 = vmatmul.mubr.f32.gmra.mrb[58].mxu1 %v3768_v59  ;;  %v4591_v59 = vld [vmem:[%s4738_s23 + $0x121] sm:$0xff] }
 0x4a4   : > { %v4165_v12 = vadd.f32 %v4582_v51, %v4027_v63  ;;  %4567 = vmatprep.mubr.msk.f32.mxu1 %vm257_vm0, %v3771_v24 }
 0x4a5   : > { %v3194_v3 = vpop.permute.xlu1 %3193 }
 0x4a6   : > { %v4197_v50 = vmax.f32 %v4165_v12, 0.0  ;;  %3259 = vst.msk [vmem:[#allocation3 + $0x1e0] sm:$0xff] %vm1223_vm5, %v3194_v3  ;;  %v2812_v14 = vpop.permute.xlu0 %2811 }
 0x4a7   : > { %2876 = vst.msk [vmem:[#allocation3 + $0x1f0] sm:$0xff] %vm837_vm3, %v2812_v14 }
 0x4a8   : > { %4229 = vst.msk [vmem:[%s6907_s29 + $0x68] sm:$0xff] %vm257_vm0, %v4197_v50 }
 0x4a9   : > { %v3387_v16 = vpop.permute.xlu1 %3386 }
 0x4aa   : > { %3452 = vst.msk [vmem:[#allocation3 + $0x1e0] sm:$0xff] %vm1417_vm6, %v3387_v16  ;;  %v3004_v54 = vpop.permute.xlu0 %3003 }
 0x4ab   : > { %3068 = vst.msk [vmem:[#allocation3 + $0x1f0] sm:$0xff] %vm1030_vm4, %v3004_v54  ;;  %v4592_v54 = vld [vmem:[%s4738_s23 + $0x129] sm:$0xff] }
 0x4ad   : > { %v3579_v45 = vpop.permute.xlu1 %3578  ;;  %v4031_v56 = vpop.f32.mrb[28].mxu1 }
 0x4ae   : > { %3644 = vst.msk [vmem:[#allocation3 + $0x1e0] sm:$0xff] %vm1610_vm7, %v3579_v45  ;;  %v4032_v31 = vadd.f32 %v6893_v47, %v4031_v56  ;;  %v4033_v20 = vpop.f32.mrb[29].mxu1  ;;  %v3389_v4 = vpop.permute.xlu0 %3388 }
 0x4b0   : > { %v4166_v46 = vadd.f32 %v4583_v49, %v4032_v31 }
 0x4b1   : > { %v3196_v29 = vpop.permute.xlu1 %3195 }
 0x4b2   : > { %v4198_v61 = vmax.f32 %v4166_v46, 0.0  ;;  %3260 = vst.msk [vmem:[#allocation3 + $0x1f0] sm:$0xff] %vm1223_vm5, %v3196_v29  ;;  %v4593_v46 = vld [vmem:[%s4738_s23 + $0x139] sm:$0xff] }
 0x4b3   : > { %3453 = vst.msk [vmem:[#allocation3 + $0x1f0] sm:$0xff] %vm1417_vm6, %v3389_v4 }
 0x4b4   : > { %4230 = vst.msk [vmem:[%s6907_s29 + $0x70] sm:$0xff] %vm257_vm0, %v4198_v61 }
 0x4b5   : > { %v3581_v44 = vpop.permute.xlu1 %3580  ;;  %v3770_v34 = vld [vmem:[#allocation3 + $0x1e0] sm:$0xff] }
 0x4b6   : > { %3645 = vst.msk [vmem:[#allocation3 + $0x1f0] sm:$0xff] %vm1610_vm7, %v3581_v44  ;;  %4110 = vmatmul.mubr.f32.gmra.mrb[60].mxu1 %v3770_v34  ;;  %v4594_v34 = vld [vmem:[%s4738_s23 + $0x141] sm:$0xff] }
 0x4b7   : > { %4568 = vmatprep.mubr.msk.f32.mxu1 %vm257_vm0, %v3773_v35 }
 0x4b9   : > { %v4036_v7 = vpop.f32.mrb[30].mxu1 }
 0x4ba   : > { %v4037_v19 = vadd.f32 %v6893_v47, %v4036_v7  ;;  %v4038_v62 = vpop.f32.mrb[31].mxu1 }
 0x4bc   : > { %v4167_v25 = vadd.f32 %v4584_v52, %v4037_v19 }
 0x4bd   : > { %v3772_v5 = vld [vmem:[#allocation3 + $0x1f0] sm:$0xff] }
 0x4be   : > { %v4199_v15 = vmax.f32 %v4167_v25, 0.0  ;;  %4115 = vmatmul.mubr.f32.gmra.mrb[62].mxu1 %v3772_v5  ;;  %v4595_v5 = vld [vmem:[%s4738_s23 + $0x151] sm:$0xff] }
 0x4c0   : > { %4231 = vst.msk [vmem:[%s6907_s29 + $0x78] sm:$0xff] %vm257_vm0, %v4199_v15 }
 0x4c5   : > { %v4041_v43 = vpop.f32.mrb[32].mxu1 }
 0x4c6   : > { %v4042_v57 = vadd.f32 %v6893_v47, %v4041_v43  ;;  %v4043_v23 = vpop.f32.mrb[33].mxu1 }
 0x4c8   : > { %v4168_v36 = vadd.f32 %v4585_v38, %v4042_v57 }
 0x4ca   : > { %v4200_v21 = vmax.f32 %v4168_v36, 0.0  ;;  %v4596_v36 = vld [vmem:[%s4738_s23 + $0x159] sm:$0xff] }
 0x4cc   : > { %4232 = vst.msk [vmem:[%s6907_s29 + $0x80] sm:$0xff] %vm257_vm0, %v4200_v21 }
 0x4ce   : > { %v4046_v40 = vpop.f32.mrb[34].mxu1 }
 0x4cf   : > { %v4047_v58 = vadd.f32 %v6893_v47, %v4046_v40  ;;  %v4048_v9 = vpop.f32.mrb[35].mxu1 }
 0x4d1   : > { %v4169_v55 = vadd.f32 %v4586_v2, %v4047_v58 }
 0x4d3   : > { %v4201_v39 = vmax.f32 %v4169_v55, 0.0  ;;  %v4597_v55 = vld [vmem:[%s4738_s23 + $0x169] sm:$0xff] }
 0x4d5   : > { %4233 = vst.msk [vmem:[%s6907_s29 + $0x88] sm:$0xff] %vm257_vm0, %v4201_v39 }
 0x4e1   : > { %v4051_v41 = vpop.f32.mrb[36].mxu1 }
 0x4e2   : > { %v4052_v6 = vadd.f32 %v6893_v47, %v4051_v41  ;;  %v4053_v53 = vpop.f32.mrb[37].mxu1 }
 0x4e4   : > { %v4170_v48 = vadd.f32 %v4587_v26, %v4052_v6 }
 0x4e6   : > { %v4202_v0 = vmax.f32 %v4170_v48, 0.0  ;;  %v4598_v48 = vld [vmem:[%s4738_s23 + $0x171] sm:$0xff] }
 0x4e8   : > { %4234 = vst.msk [vmem:[%s6907_s29 + $0x90] sm:$0xff] %vm257_vm0, %v4202_v0 }
 0x4ea   : > { %v4056_v8 = vpop.f32.mrb[38].mxu1 }
 0x4eb   : > { %v4057_v28 = vadd.f32 %v6893_v47, %v4056_v8  ;;  %v4058_v13 = vpop.f32.mrb[39].mxu1 }
 0x4ed   : > { %v4171_v27 = vadd.f32 %v4588_v60, %v4057_v28 }
 0x4ef   : > { %v4203_v18 = vmax.f32 %v4171_v27, 0.0  ;;  %v4599_v27 = vld [vmem:[%s4738_s23 + $0x181] sm:$0xff] }
 0x4f1   : > { %4235 = vst.msk [vmem:[%s6907_s29 + $0x98] sm:$0xff] %vm257_vm0, %v4203_v18 }
 0x4fd   : > { %v4061_v11 = vpop.f32.mrb[40].mxu1 }
 0x4fe   : > { %v4062_v17 = vadd.f32 %v6893_v47, %v4061_v11  ;;  %v4063_v32 = vpop.f32.mrb[41].mxu1 }
 0x500   : > { %v4172_v1 = vadd.f32 %v4589_v30, %v4062_v17 }
 0x502   : > { %v4204_v37 = vmax.f32 %v4172_v1, 0.0  ;;  %v4600_v1 = vld [vmem:[%s4738_s23 + $0x189] sm:$0xff] }
 0x504   : > { %4236 = vst.msk [vmem:[%s6907_s29 + $0xa0] sm:$0xff] %vm257_vm0, %v4204_v37 }
 0x506   : > { %v4066_v33 = vpop.f32.mrb[42].mxu1 }
 0x507   : > { %v4067_v51 = vadd.f32 %v6893_v47, %v4066_v33  ;;  %v4068_v24 = vpop.f32.mrb[43].mxu1 }
 0x509   : > { %v4173_v42 = vadd.f32 %v4590_v22, %v4067_v51 }
 0x50b   : > { %v4205_v63 = vmax.f32 %v4173_v42, 0.0 }
 0x50d   : > { %4237 = vst.msk [vmem:[%s6907_s29 + $0xa8] sm:$0xff] %vm257_vm0, %v4205_v63 }
 0x519   : > { %v4071_v10 = vpop.f32.mrb[44].mxu1 }
 0x51a   : > { %v4072_v12 = vadd.f32 %v6893_v47, %v4071_v10  ;;  %v4073_v3 = vpop.f32.mrb[45].mxu1 }
 0x51c   : > { %v4174_v50 = vadd.f32 %v4591_v59, %v4072_v12 }
 0x51e   : > { %v4206_v14 = vmax.f32 %v4174_v50, 0.0 }
 0x520   : > { %4238 = vst.msk [vmem:[%s6907_s29 + $0xb0] sm:$0xff] %vm257_vm0, %v4206_v14 }
 0x522   : > { %v4076_v16 = vpop.f32.mrb[46].mxu1 }
 0x523   : > { %v4077_v45 = vadd.f32 %v6893_v47, %v4076_v16  ;;  %v4078_v56 = vpop.f32.mrb[47].mxu1 }
 0x525   : > { %v4175_v49 = vadd.f32 %v4592_v54, %v4077_v45 }
 0x527   : > { %v4207_v31 = vmax.f32 %v4175_v49, 0.0 }
 0x529   : > { %4239 = vst.msk [vmem:[%s6907_s29 + $0xb8] sm:$0xff] %vm257_vm0, %v4207_v31 }
 0x535   : > { %v4081_v20 = vpop.f32.mrb[48].mxu1 }
 0x536   : > { %v4082_v4 = vadd.f32 %v6893_v47, %v4081_v20  ;;  %v4083_v29 = vpop.f32.mrb[49].mxu1 }
 0x538   : > { %v4176_v61 = vadd.f32 %v4593_v46, %v4082_v4 }
 0x53a   : > { %v4208_v35 = vmax.f32 %v4176_v61, 0.0 }
 0x53c   : > { %4240 = vst.msk [vmem:[%s6907_s29 + $0xc0] sm:$0xff] %vm257_vm0, %v4208_v35 }
 0x53e   : > { %v4086_v44 = vpop.f32.mrb[50].mxu1 }
 0x53f   : > { %v4087_v7 = vadd.f32 %v6893_v47, %v4086_v44  ;;  %v4088_v52 = vpop.f32.mrb[51].mxu1 }
 0x541   : > { %v4177_v19 = vadd.f32 %v4594_v34, %v4087_v7 }
 0x543   : > { %v4209_v62 = vmax.f32 %v4177_v19, 0.0 }
 0x545   : > { %4241 = vst.msk [vmem:[%s6907_s29 + $0xc8] sm:$0xff] %vm257_vm0, %v4209_v62 }
 0x551   : > { %v4091_v25 = vpop.f32.mrb[52].mxu1 }
 0x552   : > { %v4092_v15 = vadd.f32 %v6893_v47, %v4091_v25  ;;  %v4093_v43 = vpop.f32.mrb[53].mxu1 }
 0x554   : > { %v4178_v38 = vadd.f32 %v4595_v5, %v4092_v15 }
 0x556   : > { %v4210_v57 = vmax.f32 %v4178_v38, 0.0 }
 0x558   : > { %4242 = vst.msk [vmem:[%s6907_s29 + $0xd0] sm:$0xff] %vm257_vm0, %v4210_v57 }
 0x55a   : > { %v4096_v23 = vpop.f32.mrb[54].mxu1 }
 0x55b   : > { %v4097_v21 = vadd.f32 %v6893_v47, %v4096_v23  ;;  %v4098_v40 = vpop.f32.mrb[55].mxu1 }
 0x55d   : > { %v4179_v2 = vadd.f32 %v4596_v36, %v4097_v21 }
 0x55f   : > { %v4211_v58 = vmax.f32 %v4179_v2, 0.0 }
 0x561   : > { %4243 = vst.msk [vmem:[%s6907_s29 + $0xd8] sm:$0xff] %vm257_vm0, %v4211_v58 }
 0x56d   : > { %v4101_v9 = vpop.f32.mrb[56].mxu1 }
 0x56e   : > { %v4102_v39 = vadd.f32 %v6893_v47, %v4101_v9  ;;  %v4103_v41 = vpop.f32.mrb[57].mxu1 }
 0x570   : > { %v4180_v26 = vadd.f32 %v4597_v55, %v4102_v39 }
 0x572   : > { %v4212_v6 = vmax.f32 %v4180_v26, 0.0 }
 0x574   : > { %4244 = vst.msk [vmem:[%s6907_s29 + $0xe0] sm:$0xff] %vm257_vm0, %v4212_v6 }
 0x576   : > { %v4106_v53 = vpop.f32.mrb[58].mxu1 }
 0x577   : > { %v4107_v0 = vadd.f32 %v6893_v47, %v4106_v53  ;;  %v4108_v8 = vpop.f32.mrb[59].mxu1 }
 0x579   : > { %v4181_v60 = vadd.f32 %v4598_v48, %v4107_v0 }
 0x57b   : > { %v4213_v28 = vmax.f32 %v4181_v60, 0.0 }
 0x57d   : > { %4245 = vst.msk [vmem:[%s6907_s29 + $0xe8] sm:$0xff] %vm257_vm0, %v4213_v28 }
 0x589   : > { %v4111_v13 = vpop.f32.mrb[60].mxu1 }
 0x58a   : > { %v4112_v18 = vadd.f32 %v6893_v47, %v4111_v13  ;;  %v4113_v11 = vpop.f32.mrb[61].mxu1 }
 0x58c   : > { %v4182_v30 = vadd.f32 %v4599_v27, %v4112_v18 }
 0x58e   : > { %v4214_v17 = vmax.f32 %v4182_v30, 0.0 }
 0x590   : > { %4246 = vst.msk [vmem:[%s6907_s29 + $0xf0] sm:$0xff] %vm257_vm0, %v4214_v17 }
 0x591   : > { %v4116_v32 = vpop.f32.mrb[62].mxu1 }
 0x592   : > { %v4117_v37 = vadd.f32 %v6893_v47, %v4116_v32  ;;  %v4118_v33 = vpop.f32.mrb[63].mxu1 }
 0x594   : > { %v4183_v22 = vadd.f32 %v4600_v1, %v4117_v37 }
 0x596   : > { %v4215_v51 = vmax.f32 %v4183_v22, 0.0 }
 0x598   : > { %4247 = vst.msk [vmem:[%s6907_s29 + $0xf8] sm:$0xff] %vm257_vm0, %v4215_v51 }
 0x599 PF: > { %s15_s18 = sadd.s32 1, %s4683_s18  }
 0x59a   : > { %p12_p4 = scmp.ge.s32.totalorder %s15_s18, 4  }
 0x59c   :  { %14 = sbr.rel (!%p12_p4) target bundleno = 1 (0x1), region = 74 }

</bundles_post_ra>
